<compile_context>
chip_gen: v7x
topology: tpu7x:2x2x1
jax: 0.10.0
libtpu: 0.0.40
codegen_flags: <defaults>
</compile_context>

<pallas_src>
import math
from functools import partial

import jax
import jax.numpy as jnp
from jax import lax
from jax.experimental import pallas as pl
from jax.experimental.pallas import tpu as pltpu


def _round_up(a, m):
    return ((a + m - 1) // m) * m


def _safe_pow(base, exponent):
    """clamp(base, 0) ** exponent, NaN-free at base <= 0 (exponent > 0). Matches entmax _p."""
    base = jnp.maximum(base, 0.0)
    pos = base > 0.0
    logb = jnp.log(jnp.where(pos, base, 1.0))
    return jnp.where(pos, jnp.exp(exponent * logb), 0.0)


def _dual_attention_kernel(
    x_emb_ref, pos_emb_ref, mask_ref,
    w_i_ref, w_p_ref, b_ref,
    out_ref,
    *, norm, n_iter, seq_len):
    x_emb = x_emb_ref[...]        # (TB, Lpad, Di) bf16; rows >= seq_len are zero padding
    pos_emb = pos_emb_ref[...]    # (TB, Lpad, Dp) bf16
    mask = mask_ref[...]          # (TB, Lpad) f32; column `seq_len` (appended mean row) == 1

    TB, Lpad, Di = x_emb.shape
    Dp = pos_emb.shape[2]
    L = seq_len                   # index of appended mean row; also torch.mean divisor

    # ---- get_final_embedding: masked sum over item slots / L (torch.mean over dim of size L) ----
    mean_emb = jnp.sum(x_emb.astype(jnp.float32) * mask[:, :, None], axis=1) * (1.0 / L)  # (TB, Di)

    # ---- fe: x_emb with the appended row (index L) replaced by mean_emb (iota select) ----
    is_mean_row = lax.broadcasted_iota(jnp.int32, (Lpad, Di), 0) == L
    fe = jnp.where(is_mean_row[None, :, :],
                   mean_emb[:, None, :].astype(x_emb.dtype), x_emb)      # (TB, Lpad, Di) bf16

    # ---- one fused lane-dense [K | V | Q | alpha] projection (bf16 MXU, f32 accumulate) ----
    kv = jnp.dot(fe.reshape(TB * Lpad, Di), w_i_ref[...],
                 preferred_element_type=jnp.float32)
    kv = kv + jnp.dot(pos_emb.reshape(TB * Lpad, Dp), w_p_ref[...],
                      preferred_element_type=jnp.float32)
    kv = kv + b_ref[...]                                                 # (TB*Lpad, Wpad) f32, raw
    Wp = kv.shape[1]
    kv3 = kv.reshape(TB, Lpad, Wp)

    row_mean = kv3[:, L, :]                                              # appended-mean row, raw
    a_logit = row_mean[:, 3 * Di:3 * Di + 1]                             # alpha_w(x_[:, -1, :]), no relu
    q_last = jnp.maximum(row_mean[:, 2 * Di:3 * Di], 0.0)                # relu(Q) for the last row

    kv3 = jnp.maximum(kv3, 0.0)                                          # relu(K), relu(V)
    k_ = kv3[:, :, :Di]                                                  # (TB, Lpad, Di)
    v_ = kv3[:, :, Di:2 * Di]

    # ---- alpha_ent = add_value(sigmoid(.) + 1); fold (alpha-1)/sqrt(Di) into the q row ----
    alpha = jax.nn.sigmoid(a_logit) + 1.0
    alpha = jnp.where(alpha == 1.0, 1.00001, alpha)                      # add_value
    am1 = alpha - 1.0                                                    # (TB, 1)
    q_scaled = q_last * (am1 * (1.0 / math.sqrt(Di)))                    # (TB, Di)

    # ---- last-row scores; additive -1e30 mask is exact under the entmax clamp ----
    X = jnp.sum(q_scaled[:, None, :] * k_, axis=-1)                      # (TB, Lpad), already *(alpha-1)/sqrt(Di)
    X = X + (mask - 1.0) * 1e30

    # ---- entmax bisection with batch on the LANE axis: (Lpad, TB) working set ----
    Xt = X.T                                                             # (Lpad, TB)
    am1_t = am1.T                                                        # (1, TB)
    inv_am1_t = 1.0 / am1_t
    max_t = jnp.max(Xt, axis=0, keepdims=True)                           # (1, TB)
    tau_lo = max_t - 1.0                                                 # _gp(1, alpha) == 1
    tau_hi = max_t - jnp.exp(am1_t * math.log(1.0 / Lpad))               # _gp(1/d, alpha); padded d is a valid bracket
    f_lo = jnp.sum(_safe_pow(Xt - tau_lo, inv_am1_t), axis=0, keepdims=True) - 1.0
    dm0 = tau_hi - tau_lo

    def body(_, carry):
        tau_lo_c, dm_c, _prev = carry
        dm_c = dm_c * 0.5
        tau_m = tau_lo_c + dm_c
        f_m = jnp.sum(_safe_pow(Xt - tau_m, inv_am1_t), axis=0, keepdims=True) - 1.0
        tau_lo_c = jnp.where((f_m * f_lo) >= 0.0, tau_m, tau_lo_c)
        return (tau_lo_c, dm_c, tau_m)

    _, _, tau_m = lax.fori_loop(0, n_iter, body, (tau_lo, dm0, tau_lo), unroll=True)
    p_t = _safe_pow(Xt - tau_m, inv_am1_t)                               # (Lpad, TB)
    p_t = p_t / jnp.sum(p_t, axis=0, keepdims=True)                      # exact ensure_sum_one
    p_m = p_t.T                                                          # (TB, Lpad)

    # ---- attention output for the last row, relu, optional L2 normalize ----
    att = jnp.sum(p_m[:, :, None] * v_, axis=1)                          # (TB, Di)
    att = jnp.maximum(att, 0.0)
    if norm:
        ss = jnp.sum(att * att, axis=-1, keepdims=True)
        att = att * lax.rsqrt(jnp.maximum(ss, 1e-24))                    # == F.normalize(dim=-1)

    out_ref[...] = att                                                   # direct (tb, Di) store


def dual_attention_forward(x, pos, params, *, data_aug=True, norm=True, n_iter=24,
                           batch_tile=None):
    # --- JAX glue: graph conv on the item table, embedding lookups, padding/masks ---
    item_table = params['item_emb']                      # (n_items, Di)
    if data_aug:
        # GlobalItemConv(layers=1, feat_drop=0): h = adj @ item_table
        # TODO(synk): th.sparse.mm is realized as a dense matmul in the JAX glue (no sparse mm here).
        item_table = jnp.dot(params['adj'], item_table)
    x_emb = jnp.take(item_table, x, axis=0).astype(jnp.float32)               # (B, L, Di)
    pos_emb = jnp.take(params['pos_emb'], pos, axis=0).astype(jnp.float32)    # (B, Lp, Dp)

    B, L, Di = x_emb.shape
    Lp = pos_emb.shape[1]
    assert Lp == L + 1, "pos must have length L+1 (pos_num)"
    Dp = pos_emb.shape[2]

    # padding mask (1 for real items), plus the always-on appended mean row
    mask = (x != 0).astype(jnp.float32)                                       # (B, L)
    full_mask = jnp.concatenate([mask, jnp.ones((B, 1), jnp.float32)], axis=1)  # (B, Lp)

    # --- pad Lp to a multiple of 16 (bf16 sublane tile) -> layout-preserving in-kernel flattens ---
    Lpad = _round_up(Lp, 16)

    # --- batch tiling: big tiles, pad B up to a multiple of the tile (never tb=B fallback) ---
    if batch_tile is not None:
        tb = _round_up(batch_tile, 8)
    elif B >= 1024:
        tb = 512                       # fits 64 MiB VMEM (v7x); raise via batch_tile on v5e/v6e
    elif B >= 512:
        tb = _round_up((B + 1) // 2, 8)  # two grid steps so both v7x TensorCores stay busy
    else:
        tb = _round_up(B, 8)             # tiny batches: one tile, minimal padding
    B_pad = _round_up(B, tb)
    grid = (B_pad // tb,)

    x_emb_p = jnp.pad(x_emb, ((0, B_pad - B), (0, Lpad - L), (0, 0))).astype(jnp.bfloat16)
    pos_emb_p = jnp.pad(pos_emb, ((0, B_pad - B), (0, Lpad - Lp), (0, 0))).astype(jnp.bfloat16)
    mask_p = jnp.pad(full_mask, ((0, B_pad - B), (0, Lpad - Lp)))

    # --- fused [K | V | Q | alpha] weight, lane-padded to a multiple of 128, streamed as bf16 ---
    def split(w):  # torch Linear weight (out, Di+Dp) -> item / pos halves
        return w[:, :Di], w[:, Di:]

    wq_i, wq_p = split(params['wq'])
    wk_i, wk_p = split(params['wk'])
    wv_i, wv_p = split(params['wv'])
    wa_i, wa_p = split(params['wa'])

    Wpad = _round_up(3 * Di + 1, 128)
    w_i = jnp.zeros((Di, Wpad), jnp.float32)
    w_i = (w_i.at[:, :Di].set(wk_i.T)
              .at[:, Di:2 * Di].set(wv_i.T)
              .at[:, 2 * Di:3 * Di].set(wq_i.T)
              .at[:, 3 * Di].set(wa_i[0]))
    w_p = jnp.zeros((Dp, Wpad), jnp.float32)
    w_p = (w_p.at[:, :Di].set(wk_p.T)
              .at[:, Di:2 * Di].set(wv_p.T)
              .at[:, 2 * Di:3 * Di].set(wq_p.T)
              .at[:, 3 * Di].set(wa_p[0]))
    bias = jnp.zeros((1, Wpad), jnp.float32)
    bias = (bias.at[0, :Di].set(params['bk'])
                .at[0, Di:2 * Di].set(params['bv'])
                .at[0, 2 * Di:3 * Di].set(params['bq'])
                .at[0, 3 * Di].set(params['ba'][0]))
    w_i = w_i.astype(jnp.bfloat16)
    w_p = w_p.astype(jnp.bfloat16)

    def tiled(shape):
        nd = len(shape)
        return pl.BlockSpec((tb,) + tuple(shape[1:]),
                            lambda i, _nd=nd: (i,) + (0,) * (_nd - 1))

    def resident(a):
        nd = a.ndim
        return pl.BlockSpec(a.shape, lambda i, _nd=nd: (0,) * _nd)

    inputs = (x_emb_p, pos_emb_p, mask_p, w_i, w_p, bias)
    in_specs = [tiled(x_emb_p.shape), tiled(pos_emb_p.shape), tiled(mask_p.shape),
                resident(w_i), resident(w_p), resident(bias)]

    kernel = partial(_dual_attention_kernel, norm=norm, n_iter=n_iter, seq_len=L)
    out = pl.pallas_call(
        kernel,
        grid=grid,
        in_specs=in_specs,
        out_specs=pl.BlockSpec((tb, Di), lambda i: (i, 0)),
        out_shape=jax.ShapeDtypeStruct((B_pad, Di), jnp.float32),
        compiler_params=pltpu.CompilerParams(
            dimension_semantics=("parallel",),
            vmem_limit_bytes=48 * 1024 * 1024),
    )(*inputs)
    return out[:B]


if __name__ == "__main__":
    n_items, item_dim, pos_dim = 20, 32, 16
    B, L = 2, 8
    Lp = L + 1                      # pos_num
    dim = item_dim + pos_dim

    key = jax.random.PRNGKey(0)
    ks = jax.random.split(key, 12)
    params = {
        'item_emb': jax.random.normal(ks[0], (n_items, item_dim), jnp.float32) * 0.1,
        'pos_emb':  jax.random.normal(ks[1], (16, pos_dim), jnp.float32) * 0.1,
        'adj':      jax.nn.softmax(jax.random.normal(ks[2], (n_items, n_items), jnp.float32), axis=-1),
        'wq': jax.random.normal(ks[3], (item_dim, dim), jnp.float32) * 0.1,
        'bq': jax.random.normal(ks[4], (item_dim,), jnp.float32) * 0.01,
        'wk': jax.random.normal(ks[5], (item_dim, dim), jnp.float32) * 0.1,
        'bk': jax.random.normal(ks[6], (item_dim,), jnp.float32) * 0.01,
        'wv': jax.random.normal(ks[7], (item_dim, dim), jnp.float32) * 0.1,
        'bv': jax.random.normal(ks[8], (item_dim,), jnp.float32) * 0.01,
        'wa': jax.random.normal(ks[9], (1, dim), jnp.float32) * 0.1,
        'ba': jnp.zeros((1,), jnp.float32),
    }

    # session item ids (0 == padding) and positions 0..L (length L+1 for the appended mean row)
    x = jnp.array([[3, 5, 7, 2, 9, 0, 0, 0],
                   [1, 4, 6, 8, 2, 3, 5, 0]], dtype=jnp.int32)
    pos = jnp.tile(jnp.arange(Lp, dtype=jnp.int32)[None, :], (B, 1))

    m_s = dual_attention_forward(x, pos, params, data_aug=True, norm=True)
    jax.block_until_ready(m_s)
    assert m_s.shape == (B, item_dim)
    assert bool(jnp.all(jnp.isfinite(m_s)))
    print("KERNEL_OK")
</pallas_src>

<mosaic_0001>
module attributes {stable_mosaic.version = 11 : i64} {
  func.func @_dual_attention_kernel(%arg0: i32, %arg1: memref<8x16x32xbf16, #tpu.memory_space<vmem>>, %arg2: memref<8x16x16xbf16, #tpu.memory_space<vmem>>, %arg3: memref<8x16xf32, #tpu.memory_space<vmem>>, %arg4: memref<32x128xbf16, #tpu.memory_space<vmem>>, %arg5: memref<16x128xbf16, #tpu.memory_space<vmem>>, %arg6: memref<1x128xf32, #tpu.memory_space<vmem>>, %arg7: memref<8x32xf32, #tpu.memory_space<vmem>>) attributes {dimension_semantics = [#tpu.dimension_semantics<parallel>], iteration_bounds = array<i64: 1>, scalar_prefetch = 0 : i64, scratch_operands = 0 : i64, tpu.core_type = #tpu.core_type<tc>, window_params = [{transform_indices = @transform_0, window_bounds = array<i64: 8, 16, 32>}, {transform_indices = @transform_1, window_bounds = array<i64: 8, 16, 16>}, {transform_indices = @transform_2, window_bounds = array<i64: 8, 16>}, {pipeline_mode = #tpu.pipeline_mode<synchronous>, transform_indices = @transform_3, window_bounds = array<i64: 32, 128>}, {pipeline_mode = #tpu.pipeline_mode<synchronous>, transform_indices = @transform_4, window_bounds = array<i64: 16, 128>}, {pipeline_mode = #tpu.pipeline_mode<synchronous>, transform_indices = @transform_5, window_bounds = array<i64: 1, 128>}, {transform_indices = @transform_6, window_bounds = array<i64: 8, 32>}]} {
    %c0 = arith.constant 0 : index
    %c0_0 = arith.constant 0 : index
    %c0_1 = arith.constant 0 : index
    %0 = vector.load %arg1[%c0, %c0_0, %c0_1] : memref<8x16x32xbf16, #tpu.memory_space<vmem>>, vector<8x16x32xbf16>
    %c0_2 = arith.constant 0 : index
    %c0_3 = arith.constant 0 : index
    %c0_4 = arith.constant 0 : index
    %1 = vector.load %arg2[%c0_2, %c0_3, %c0_4] : memref<8x16x16xbf16, #tpu.memory_space<vmem>>, vector<8x16x16xbf16>
    %c0_5 = arith.constant 0 : index
    %c0_6 = arith.constant 0 : index
    %2 = vector.load %arg3[%c0_5, %c0_6] : memref<8x16xf32, #tpu.memory_space<vmem>>, vector<8x16xf32>
    %3 = arith.extf %0 : vector<8x16x32xbf16> to vector<8x16x32xf32>
    %4 = vector.shape_cast %2 : vector<8x16xf32> to vector<8x16x1xf32>
    %5 = vector.broadcast %4 : vector<8x16x1xf32> to vector<8x16x32xf32>
    %6 = arith.mulf %3, %5 : vector<8x16x32xf32>
    %cst = arith.constant dense<0.000000e+00> : vector<8x32xf32>
    %7 = vector.multi_reduction <add>, %6, %cst [1] : vector<8x16x32xf32> to vector<8x32xf32>
    %cst_7 = arith.constant 1.250000e-01 : f32
    %8 = vector.broadcast %cst_7 : f32 to vector<8x32xf32>
    %9 = arith.mulf %7, %8 : vector<8x32xf32>
    %10 = tpu.iota {dimensions = array<i32: 0>} : vector<16x32xi32>
    %c8_i32 = arith.constant 8 : i32
    %11 = vector.broadcast %c8_i32 : i32 to vector<16x32xi32>
    %12 = arith.cmpi eq, %10, %11 : vector<16x32xi32>
    %13 = vector.shape_cast %12 : vector<16x32xi1> to vector<1x16x32xi1>
    %14 = vector.shape_cast %9 : vector<8x32xf32> to vector<8x1x32xf32>
    %15 = arith.truncf %14 : vector<8x1x32xf32> to vector<8x1x32xbf16>
    %16 = vector.shape_cast %13 : vector<1x16x32xi1> to vector<1x16x32xi1>
    %17 = vector.broadcast %16 : vector<1x16x32xi1> to vector<8x16x32xi1>
    %18 = vector.shape_cast %15 : vector<8x1x32xbf16> to vector<8x1x32xbf16>
    %19 = vector.broadcast %18 : vector<8x1x32xbf16> to vector<8x16x32xbf16>
    %20 = arith.select %17, %19, %0 : vector<8x16x32xi1>, vector<8x16x32xbf16>
    %21 = vector.shape_cast %20 : vector<8x16x32xbf16> to vector<128x32xbf16>
    %c0_8 = arith.constant 0 : index
    %c0_9 = arith.constant 0 : index
    %22 = vector.load %arg4[%c0_8, %c0_9] : memref<32x128xbf16, #tpu.memory_space<vmem>>, vector<32x128xbf16>
    %cst_10 = arith.constant dense<0.000000e+00> : vector<128x128xf32>
    %23 = tpu.matmul %21, %22, %cst_10 {dimension_numbers = #tpu.dot_dimension_numbers<[1], [0], [0], [1], [0, 0, 1, 1], [], []>} : vector<128x32xbf16>, vector<32x128xbf16>, vector<128x128xf32> -> vector<128x128xf32>
    %24 = vector.shape_cast %1 : vector<8x16x16xbf16> to vector<128x16xbf16>
    %c0_11 = arith.constant 0 : index
    %c0_12 = arith.constant 0 : index
    %25 = vector.load %arg5[%c0_11, %c0_12] : memref<16x128xbf16, #tpu.memory_space<vmem>>, vector<16x128xbf16>
    %cst_13 = arith.constant dense<0.000000e+00> : vector<128x128xf32>
    %26 = tpu.matmul %24, %25, %cst_13 {dimension_numbers = #tpu.dot_dimension_numbers<[1], [0], [0], [1], [0, 0, 1, 1], [], []>} : vector<128x16xbf16>, vector<16x128xbf16>, vector<128x128xf32> -> vector<128x128xf32>
    %27 = arith.addf %23, %26 : vector<128x128xf32>
    %c0_14 = arith.constant 0 : index
    %c0_15 = arith.constant 0 : index
    %28 = vector.load %arg6[%c0_14, %c0_15] : memref<1x128xf32, #tpu.memory_space<vmem>>, vector<1x128xf32>
    %29 = vector.broadcast %28 : vector<1x128xf32> to vector<128x128xf32>
    %30 = arith.addf %27, %29 : vector<128x128xf32>
    %31 = vector.shape_cast %30 : vector<128x128xf32> to vector<8x16x128xf32>
    %32 = vector.extract_strided_slice %31 {offsets = [0, 8, 0], sizes = [8, 1, 128], strides = [1, 1, 1]} : vector<8x16x128xf32> to vector<8x1x128xf32>
    %33 = vector.shape_cast %32 : vector<8x1x128xf32> to vector<8x128xf32>
    %34 = vector.extract_strided_slice %33 {offsets = [0, 96], sizes = [8, 1], strides = [1, 1]} : vector<8x128xf32> to vector<8x1xf32>
    %35 = vector.extract_strided_slice %33 {offsets = [0, 64], sizes = [8, 32], strides = [1, 1]} : vector<8x128xf32> to vector<8x32xf32>
    %cst_16 = arith.constant 0.000000e+00 : f32
    %36 = vector.broadcast %cst_16 : f32 to vector<8x32xf32>
    %37 = arith.maximumf %35, %36 : vector<8x32xf32>
    %cst_17 = arith.constant 0.000000e+00 : f32
    %38 = vector.broadcast %cst_17 : f32 to vector<8x16x128xf32>
    %39 = arith.maximumf %31, %38 : vector<8x16x128xf32>
    %40 = vector.extract_strided_slice %39 {offsets = [0, 0, 0], sizes = [8, 16, 32], strides = [1, 1, 1]} : vector<8x16x128xf32> to vector<8x16x32xf32>
    %41 = vector.extract_strided_slice %39 {offsets = [0, 0, 32], sizes = [8, 16, 32], strides = [1, 1, 1]} : vector<8x16x128xf32> to vector<8x16x32xf32>
    %42 = arith.negf %34 : vector<8x1xf32>
    %43 = math.exp %42 : vector<8x1xf32>
    %cst_18 = arith.constant 1.000000e+00 : f32
    %44 = vector.broadcast %cst_18 : f32 to vector<8x1xf32>
    %45 = arith.addf %44, %43 : vector<8x1xf32>
    %46 = arith.divf %44, %45 : vector<8x1xf32>
    %cst_19 = arith.constant 1.000000e+00 : f32
    %47 = vector.broadcast %cst_19 : f32 to vector<8x1xf32>
    %48 = arith.addf %46, %47 : vector<8x1xf32>
    %cst_20 = arith.constant 1.000000e+00 : f32
    %49 = vector.broadcast %cst_20 : f32 to vector<8x1xf32>
    %50 = arith.cmpf oeq, %48, %49 : vector<8x1xf32>
    %cst_21 = arith.constant 1.000010e+00 : f32
    %51 = vector.broadcast %cst_21 : f32 to vector<8x1xf32>
    %52 = arith.select %50, %51, %48 : vector<8x1xi1>, vector<8x1xf32>
    %cst_22 = arith.constant 1.000000e+00 : f32
    %53 = vector.broadcast %cst_22 : f32 to vector<8x1xf32>
    %54 = arith.subf %52, %53 : vector<8x1xf32>
    %cst_23 = arith.constant 0.176776692 : f32
    %55 = vector.broadcast %cst_23 : f32 to vector<8x1xf32>
    %56 = arith.mulf %54, %55 : vector<8x1xf32>
    %57 = vector.broadcast %56 : vector<8x1xf32> to vector<8x32xf32>
    %58 = arith.mulf %37, %57 : vector<8x32xf32>
    %59 = vector.shape_cast %58 : vector<8x32xf32> to vector<8x1x32xf32>
    %60 = vector.broadcast %59 : vector<8x1x32xf32> to vector<8x16x32xf32>
    %61 = arith.mulf %60, %40 : vector<8x16x32xf32>
    %cst_24 = arith.constant dense<0.000000e+00> : vector<8x16xf32>
    %62 = vector.multi_reduction <add>, %61, %cst_24 [2] : vector<8x16x32xf32> to vector<8x16xf32>
    %cst_25 = arith.constant 1.000000e+00 : f32
    %63 = vector.broadcast %cst_25 : f32 to vector<8x16xf32>
    %64 = arith.subf %2, %63 : vector<8x16xf32>
    %cst_26 = arith.constant 1.000000e+30 : f32
    %65 = vector.broadcast %cst_26 : f32 to vector<8x16xf32>
    %66 = arith.mulf %64, %65 : vector<8x16xf32>
    %67 = arith.addf %62, %66 : vector<8x16xf32>
    %68 = tpu.transpose %67, [1, 0] : vector<8x16xf32> -> vector<16x8xf32>
    %69 = tpu.transpose %54, [1, 0] : vector<8x1xf32> -> vector<1x8xf32>
    %cst_27 = arith.constant 1.000000e+00 : f32
    %70 = vector.broadcast %cst_27 : f32 to vector<1x8xf32>
    %71 = arith.divf %70, %69 : vector<1x8xf32>
    %cst_28 = arith.constant dense<0xFF800000> : vector<8xf32>
    %72 = vector.multi_reduction <maximumf>, %68, %cst_28 [0] : vector<16x8xf32> to vector<8xf32>
    %73 = vector.shape_cast %72 : vector<8xf32> to vector<1x8xf32>
    %cst_29 = arith.constant 1.000000e+00 : f32
    %74 = vector.broadcast %cst_29 : f32 to vector<1x8xf32>
    %75 = arith.subf %73, %74 : vector<1x8xf32>
    %cst_30 = arith.constant -2.77258873 : f32
    %76 = vector.broadcast %cst_30 : f32 to vector<1x8xf32>
    %77 = arith.mulf %69, %76 : vector<1x8xf32>
    %78 = math.exp %77 : vector<1x8xf32>
    %79 = arith.subf %73, %78 : vector<1x8xf32>
    %80 = vector.broadcast %75 : vector<1x8xf32> to vector<16x8xf32>
    %81 = arith.subf %68, %80 : vector<16x8xf32>
    %cst_31 = arith.constant 0.000000e+00 : f32
    %82 = vector.broadcast %cst_31 : f32 to vector<16x8xf32>
    %83 = arith.maximumf %81, %82 : vector<16x8xf32>
    %cst_32 = arith.constant 0.000000e+00 : f32
    %84 = vector.broadcast %cst_32 : f32 to vector<16x8xf32>
    %85 = arith.cmpf ogt, %83, %84 : vector<16x8xf32>
    %cst_33 = arith.constant 1.000000e+00 : f32
    %86 = vector.broadcast %cst_33 : f32 to vector<16x8xf32>
    %87 = arith.select %85, %83, %86 : vector<16x8xi1>, vector<16x8xf32>
    %88 = math.log %87 : vector<16x8xf32>
    %89 = vector.broadcast %71 : vector<1x8xf32> to vector<16x8xf32>
    %90 = arith.mulf %89, %88 : vector<16x8xf32>
    %91 = math.exp %90 : vector<16x8xf32>
    %cst_34 = arith.constant 0.000000e+00 : f32
    %92 = vector.broadcast %cst_34 : f32 to vector<16x8xf32>
    %93 = arith.select %85, %91, %92 : vector<16x8xi1>, vector<16x8xf32>
    %cst_35 = arith.constant dense<0.000000e+00> : vector<8xf32>
    %94 = vector.multi_reduction <add>, %93, %cst_35 [0] : vector<16x8xf32> to vector<8xf32>
    %95 = vector.shape_cast %94 : vector<8xf32> to vector<1x8xf32>
    %cst_36 = arith.constant 1.000000e+00 : f32
    %96 = vector.broadcast %cst_36 : f32 to vector<1x8xf32>
    %97 = arith.subf %95, %96 : vector<1x8xf32>
    %98 = arith.subf %79, %75 : vector<1x8xf32>
    %c0_i32 = arith.constant 0 : i32
    %cst_37 = arith.constant 5.000000e-01 : f32
    %99 = vector.broadcast %cst_37 : f32 to vector<1x8xf32>
    %100 = arith.mulf %98, %99 : vector<1x8xf32>
    %101 = arith.addf %75, %100 : vector<1x8xf32>
    %102 = vector.broadcast %101 : vector<1x8xf32> to vector<16x8xf32>
    %103 = arith.subf %68, %102 : vector<16x8xf32>
    %cst_38 = arith.constant 0.000000e+00 : f32
    %104 = vector.broadcast %cst_38 : f32 to vector<16x8xf32>
    %105 = arith.maximumf %103, %104 : vector<16x8xf32>
    %cst_39 = arith.constant 0.000000e+00 : f32
    %106 = vector.broadcast %cst_39 : f32 to vector<16x8xf32>
    %107 = arith.cmpf ogt, %105, %106 : vector<16x8xf32>
    %cst_40 = arith.constant 1.000000e+00 : f32
    %108 = vector.broadcast %cst_40 : f32 to vector<16x8xf32>
    %109 = arith.select %107, %105, %108 : vector<16x8xi1>, vector<16x8xf32>
    %110 = math.log %109 : vector<16x8xf32>
    %111 = vector.broadcast %71 : vector<1x8xf32> to vector<16x8xf32>
    %112 = arith.mulf %111, %110 : vector<16x8xf32>
    %113 = math.exp %112 : vector<16x8xf32>
    %cst_41 = arith.constant 0.000000e+00 : f32
    %114 = vector.broadcast %cst_41 : f32 to vector<16x8xf32>
    %115 = arith.select %107, %113, %114 : vector<16x8xi1>, vector<16x8xf32>
    %cst_42 = arith.constant dense<0.000000e+00> : vector<8xf32>
    %116 = vector.multi_reduction <add>, %115, %cst_42 [0] : vector<16x8xf32> to vector<8xf32>
    %117 = vector.shape_cast %116 : vector<8xf32> to vector<1x8xf32>
    %cst_43 = arith.constant 1.000000e+00 : f32
    %118 = vector.broadcast %cst_43 : f32 to vector<1x8xf32>
    %119 = arith.subf %117, %118 : vector<1x8xf32>
    %120 = arith.mulf %119, %97 : vector<1x8xf32>
    %cst_44 = arith.constant 0.000000e+00 : f32
    %121 = vector.broadcast %cst_44 : f32 to vector<1x8xf32>
    %122 = arith.cmpf oge, %120, %121 : vector<1x8xf32>
    %123 = arith.select %122, %101, %75 : vector<1x8xi1>, vector<1x8xf32>
    %c1_i32 = arith.constant 1 : i32
    %cst_45 = arith.constant 5.000000e-01 : f32
    %124 = vector.broadcast %cst_45 : f32 to vector<1x8xf32>
    %125 = arith.mulf %100, %124 : vector<1x8xf32>
    %126 = arith.addf %123, %125 : vector<1x8xf32>
    %127 = vector.broadcast %126 : vector<1x8xf32> to vector<16x8xf32>
    %128 = arith.subf %68, %127 : vector<16x8xf32>
    %cst_46 = arith.constant 0.000000e+00 : f32
    %129 = vector.broadcast %cst_46 : f32 to vector<16x8xf32>
    %130 = arith.maximumf %128, %129 : vector<16x8xf32>
    %cst_47 = arith.constant 0.000000e+00 : f32
    %131 = vector.broadcast %cst_47 : f32 to vector<16x8xf32>
    %132 = arith.cmpf ogt, %130, %131 : vector<16x8xf32>
    %cst_48 = arith.constant 1.000000e+00 : f32
    %133 = vector.broadcast %cst_48 : f32 to vector<16x8xf32>
    %134 = arith.select %132, %130, %133 : vector<16x8xi1>, vector<16x8xf32>
    %135 = math.log %134 : vector<16x8xf32>
    %136 = vector.broadcast %71 : vector<1x8xf32> to vector<16x8xf32>
    %137 = arith.mulf %136, %135 : vector<16x8xf32>
    %138 = math.exp %137 : vector<16x8xf32>
    %cst_49 = arith.constant 0.000000e+00 : f32
    %139 = vector.broadcast %cst_49 : f32 to vector<16x8xf32>
    %140 = arith.select %132, %138, %139 : vector<16x8xi1>, vector<16x8xf32>
    %cst_50 = arith.constant dense<0.000000e+00> : vector<8xf32>
    %141 = vector.multi_reduction <add>, %140, %cst_50 [0] : vector<16x8xf32> to vector<8xf32>
    %142 = vector.shape_cast %141 : vector<8xf32> to vector<1x8xf32>
    %cst_51 = arith.constant 1.000000e+00 : f32
    %143 = vector.broadcast %cst_51 : f32 to vector<1x8xf32>
    %144 = arith.subf %142, %143 : vector<1x8xf32>
    %145 = arith.mulf %144, %97 : vector<1x8xf32>
    %cst_52 = arith.constant 0.000000e+00 : f32
    %146 = vector.broadcast %cst_52 : f32 to vector<1x8xf32>
    %147 = arith.cmpf oge, %145, %146 : vector<1x8xf32>
    %148 = arith.select %147, %126, %123 : vector<1x8xi1>, vector<1x8xf32>
    %c2_i32 = arith.constant 2 : i32
    %cst_53 = arith.constant 5.000000e-01 : f32
    %149 = vector.broadcast %cst_53 : f32 to vector<1x8xf32>
    %150 = arith.mulf %125, %149 : vector<1x8xf32>
    %151 = arith.addf %148, %150 : vector<1x8xf32>
    %152 = vector.broadcast %151 : vector<1x8xf32> to vector<16x8xf32>
    %153 = arith.subf %68, %152 : vector<16x8xf32>
    %cst_54 = arith.constant 0.000000e+00 : f32
    %154 = vector.broadcast %cst_54 : f32 to vector<16x8xf32>
    %155 = arith.maximumf %153, %154 : vector<16x8xf32>
    %cst_55 = arith.constant 0.000000e+00 : f32
    %156 = vector.broadcast %cst_55 : f32 to vector<16x8xf32>
    %157 = arith.cmpf ogt, %155, %156 : vector<16x8xf32>
    %cst_56 = arith.constant 1.000000e+00 : f32
    %158 = vector.broadcast %cst_56 : f32 to vector<16x8xf32>
    %159 = arith.select %157, %155, %158 : vector<16x8xi1>, vector<16x8xf32>
    %160 = math.log %159 : vector<16x8xf32>
    %161 = vector.broadcast %71 : vector<1x8xf32> to vector<16x8xf32>
    %162 = arith.mulf %161, %160 : vector<16x8xf32>
    %163 = math.exp %162 : vector<16x8xf32>
    %cst_57 = arith.constant 0.000000e+00 : f32
    %164 = vector.broadcast %cst_57 : f32 to vector<16x8xf32>
    %165 = arith.select %157, %163, %164 : vector<16x8xi1>, vector<16x8xf32>
    %cst_58 = arith.constant dense<0.000000e+00> : vector<8xf32>
    %166 = vector.multi_reduction <add>, %165, %cst_58 [0] : vector<16x8xf32> to vector<8xf32>
    %167 = vector.shape_cast %166 : vector<8xf32> to vector<1x8xf32>
    %cst_59 = arith.constant 1.000000e+00 : f32
    %168 = vector.broadcast %cst_59 : f32 to vector<1x8xf32>
    %169 = arith.subf %167, %168 : vector<1x8xf32>
    %170 = arith.mulf %169, %97 : vector<1x8xf32>
    %cst_60 = arith.constant 0.000000e+00 : f32
    %171 = vector.broadcast %cst_60 : f32 to vector<1x8xf32>
    %172 = arith.cmpf oge, %170, %171 : vector<1x8xf32>
    %173 = arith.select %172, %151, %148 : vector<1x8xi1>, vector<1x8xf32>
    %c3_i32 = arith.constant 3 : i32
    %cst_61 = arith.constant 5.000000e-01 : f32
    %174 = vector.broadcast %cst_61 : f32 to vector<1x8xf32>
    %175 = arith.mulf %150, %174 : vector<1x8xf32>
    %176 = arith.addf %173, %175 : vector<1x8xf32>
    %177 = vector.broadcast %176 : vector<1x8xf32> to vector<16x8xf32>
    %178 = arith.subf %68, %177 : vector<16x8xf32>
    %cst_62 = arith.constant 0.000000e+00 : f32
    %179 = vector.broadcast %cst_62 : f32 to vector<16x8xf32>
    %180 = arith.maximumf %178, %179 : vector<16x8xf32>
    %cst_63 = arith.constant 0.000000e+00 : f32
    %181 = vector.broadcast %cst_63 : f32 to vector<16x8xf32>
    %182 = arith.cmpf ogt, %180, %181 : vector<16x8xf32>
    %cst_64 = arith.constant 1.000000e+00 : f32
    %183 = vector.broadcast %cst_64 : f32 to vector<16x8xf32>
    %184 = arith.select %182, %180, %183 : vector<16x8xi1>, vector<16x8xf32>
    %185 = math.log %184 : vector<16x8xf32>
    %186 = vector.broadcast %71 : vector<1x8xf32> to vector<16x8xf32>
    %187 = arith.mulf %186, %185 : vector<16x8xf32>
    %188 = math.exp %187 : vector<16x8xf32>
    %cst_65 = arith.constant 0.000000e+00 : f32
    %189 = vector.broadcast %cst_65 : f32 to vector<16x8xf32>
    %190 = arith.select %182, %188, %189 : vector<16x8xi1>, vector<16x8xf32>
    %cst_66 = arith.constant dense<0.000000e+00> : vector<8xf32>
    %191 = vector.multi_reduction <add>, %190, %cst_66 [0] : vector<16x8xf32> to vector<8xf32>
    %192 = vector.shape_cast %191 : vector<8xf32> to vector<1x8xf32>
    %cst_67 = arith.constant 1.000000e+00 : f32
    %193 = vector.broadcast %cst_67 : f32 to vector<1x8xf32>
    %194 = arith.subf %192, %193 : vector<1x8xf32>
    %195 = arith.mulf %194, %97 : vector<1x8xf32>
    %cst_68 = arith.constant 0.000000e+00 : f32
    %196 = vector.broadcast %cst_68 : f32 to vector<1x8xf32>
    %197 = arith.cmpf oge, %195, %196 : vector<1x8xf32>
    %198 = arith.select %197, %176, %173 : vector<1x8xi1>, vector<1x8xf32>
    %c4_i32 = arith.constant 4 : i32
    %cst_69 = arith.constant 5.000000e-01 : f32
    %199 = vector.broadcast %cst_69 : f32 to vector<1x8xf32>
    %200 = arith.mulf %175, %199 : vector<1x8xf32>
    %201 = arith.addf %198, %200 : vector<1x8xf32>
    %202 = vector.broadcast %201 : vector<1x8xf32> to vector<16x8xf32>
    %203 = arith.subf %68, %202 : vector<16x8xf32>
    %cst_70 = arith.constant 0.000000e+00 : f32
    %204 = vector.broadcast %cst_70 : f32 to vector<16x8xf32>
    %205 = arith.maximumf %203, %204 : vector<16x8xf32>
    %cst_71 = arith.constant 0.000000e+00 : f32
    %206 = vector.broadcast %cst_71 : f32 to vector<16x8xf32>
    %207 = arith.cmpf ogt, %205, %206 : vector<16x8xf32>
    %cst_72 = arith.constant 1.000000e+00 : f32
    %208 = vector.broadcast %cst_72 : f32 to vector<16x8xf32>
    %209 = arith.select %207, %205, %208 : vector<16x8xi1>, vector<16x8xf32>
    %210 = math.log %209 : vector<16x8xf32>
    %211 = vector.broadcast %71 : vector<1x8xf32> to vector<16x8xf32>
    %212 = arith.mulf %211, %210 : vector<16x8xf32>
    %213 = math.exp %212 : vector<16x8xf32>
    %cst_73 = arith.constant 0.000000e+00 : f32
    %214 = vector.broadcast %cst_73 : f32 to vector<16x8xf32>
    %215 = arith.select %207, %213, %214 : vector<16x8xi1>, vector<16x8xf32>
    %cst_74 = arith.constant dense<0.000000e+00> : vector<8xf32>
    %216 = vector.multi_reduction <add>, %215, %cst_74 [0] : vector<16x8xf32> to vector<8xf32>
    %217 = vector.shape_cast %216 : vector<8xf32> to vector<1x8xf32>
    %cst_75 = arith.constant 1.000000e+00 : f32
    %218 = vector.broadcast %cst_75 : f32 to vector<1x8xf32>
    %219 = arith.subf %217, %218 : vector<1x8xf32>
    %220 = arith.mulf %219, %97 : vector<1x8xf32>
    %cst_76 = arith.constant 0.000000e+00 : f32
    %221 = vector.broadcast %cst_76 : f32 to vector<1x8xf32>
    %222 = arith.cmpf oge, %220, %221 : vector<1x8xf32>
    %223 = arith.select %222, %201, %198 : vector<1x8xi1>, vector<1x8xf32>
    %c5_i32 = arith.constant 5 : i32
    %cst_77 = arith.constant 5.000000e-01 : f32
    %224 = vector.broadcast %cst_77 : f32 to vector<1x8xf32>
    %225 = arith.mulf %200, %224 : vector<1x8xf32>
    %226 = arith.addf %223, %225 : vector<1x8xf32>
    %227 = vector.broadcast %226 : vector<1x8xf32> to vector<16x8xf32>
    %228 = arith.subf %68, %227 : vector<16x8xf32>
    %cst_78 = arith.constant 0.000000e+00 : f32
    %229 = vector.broadcast %cst_78 : f32 to vector<16x8xf32>
    %230 = arith.maximumf %228, %229 : vector<16x8xf32>
    %cst_79 = arith.constant 0.000000e+00 : f32
    %231 = vector.broadcast %cst_79 : f32 to vector<16x8xf32>
    %232 = arith.cmpf ogt, %230, %231 : vector<16x8xf32>
    %cst_80 = arith.constant 1.000000e+00 : f32
    %233 = vector.broadcast %cst_80 : f32 to vector<16x8xf32>
    %234 = arith.select %232, %230, %233 : vector<16x8xi1>, vector<16x8xf32>
    %235 = math.log %234 : vector<16x8xf32>
    %236 = vector.broadcast %71 : vector<1x8xf32> to vector<16x8xf32>
    %237 = arith.mulf %236, %235 : vector<16x8xf32>
    %238 = math.exp %237 : vector<16x8xf32>
    %cst_81 = arith.constant 0.000000e+00 : f32
    %239 = vector.broadcast %cst_81 : f32 to vector<16x8xf32>
    %240 = arith.select %232, %238, %239 : vector<16x8xi1>, vector<16x8xf32>
    %cst_82 = arith.constant dense<0.000000e+00> : vector<8xf32>
    %241 = vector.multi_reduction <add>, %240, %cst_82 [0] : vector<16x8xf32> to vector<8xf32>
    %242 = vector.shape_cast %241 : vector<8xf32> to vector<1x8xf32>
    %cst_83 = arith.constant 1.000000e+00 : f32
    %243 = vector.broadcast %cst_83 : f32 to vector<1x8xf32>
    %244 = arith.subf %242, %243 : vector<1x8xf32>
    %245 = arith.mulf %244, %97 : vector<1x8xf32>
    %cst_84 = arith.constant 0.000000e+00 : f32
    %246 = vector.broadcast %cst_84 : f32 to vector<1x8xf32>
    %247 = arith.cmpf oge, %245, %246 : vector<1x8xf32>
    %248 = arith.select %247, %226, %223 : vector<1x8xi1>, vector<1x8xf32>
    %c6_i32 = arith.constant 6 : i32
    %cst_85 = arith.constant 5.000000e-01 : f32
    %249 = vector.broadcast %cst_85 : f32 to vector<1x8xf32>
    %250 = arith.mulf %225, %249 : vector<1x8xf32>
    %251 = arith.addf %248, %250 : vector<1x8xf32>
    %252 = vector.broadcast %251 : vector<1x8xf32> to vector<16x8xf32>
    %253 = arith.subf %68, %252 : vector<16x8xf32>
    %cst_86 = arith.constant 0.000000e+00 : f32
    %254 = vector.broadcast %cst_86 : f32 to vector<16x8xf32>
    %255 = arith.maximumf %253, %254 : vector<16x8xf32>
    %cst_87 = arith.constant 0.000000e+00 : f32
    %256 = vector.broadcast %cst_87 : f32 to vector<16x8xf32>
    %257 = arith.cmpf ogt, %255, %256 : vector<16x8xf32>
    %cst_88 = arith.constant 1.000000e+00 : f32
    %258 = vector.broadcast %cst_88 : f32 to vector<16x8xf32>
    %259 = arith.select %257, %255, %258 : vector<16x8xi1>, vector<16x8xf32>
    %260 = math.log %259 : vector<16x8xf32>
    %261 = vector.broadcast %71 : vector<1x8xf32> to vector<16x8xf32>
    %262 = arith.mulf %261, %260 : vector<16x8xf32>
    %263 = math.exp %262 : vector<16x8xf32>
    %cst_89 = arith.constant 0.000000e+00 : f32
    %264 = vector.broadcast %cst_89 : f32 to vector<16x8xf32>
    %265 = arith.select %257, %263, %264 : vector<16x8xi1>, vector<16x8xf32>
    %cst_90 = arith.constant dense<0.000000e+00> : vector<8xf32>
    %266 = vector.multi_reduction <add>, %265, %cst_90 [0] : vector<16x8xf32> to vector<8xf32>
    %267 = vector.shape_cast %266 : vector<8xf32> to vector<1x8xf32>
    %cst_91 = arith.constant 1.000000e+00 : f32
    %268 = vector.broadcast %cst_91 : f32 to vector<1x8xf32>
    %269 = arith.subf %267, %268 : vector<1x8xf32>
    %270 = arith.mulf %269, %97 : vector<1x8xf32>
    %cst_92 = arith.constant 0.000000e+00 : f32
    %271 = vector.broadcast %cst_92 : f32 to vector<1x8xf32>
    %272 = arith.cmpf oge, %270, %271 : vector<1x8xf32>
    %273 = arith.select %272, %251, %248 : vector<1x8xi1>, vector<1x8xf32>
    %c7_i32 = arith.constant 7 : i32
    %cst_93 = arith.constant 5.000000e-01 : f32
    %274 = vector.broadcast %cst_93 : f32 to vector<1x8xf32>
    %275 = arith.mulf %250, %274 : vector<1x8xf32>
    %276 = arith.addf %273, %275 : vector<1x8xf32>
    %277 = vector.broadcast %276 : vector<1x8xf32> to vector<16x8xf32>
    %278 = arith.subf %68, %277 : vector<16x8xf32>
    %cst_94 = arith.constant 0.000000e+00 : f32
    %279 = vector.broadcast %cst_94 : f32 to vector<16x8xf32>
    %280 = arith.maximumf %278, %279 : vector<16x8xf32>
    %cst_95 = arith.constant 0.000000e+00 : f32
    %281 = vector.broadcast %cst_95 : f32 to vector<16x8xf32>
    %282 = arith.cmpf ogt, %280, %281 : vector<16x8xf32>
    %cst_96 = arith.constant 1.000000e+00 : f32
    %283 = vector.broadcast %cst_96 : f32 to vector<16x8xf32>
    %284 = arith.select %282, %280, %283 : vector<16x8xi1>, vector<16x8xf32>
    %285 = math.log %284 : vector<16x8xf32>
    %286 = vector.broadcast %71 : vector<1x8xf32> to vector<16x8xf32>
    %287 = arith.mulf %286, %285 : vector<16x8xf32>
    %288 = math.exp %287 : vector<16x8xf32>
    %cst_97 = arith.constant 0.000000e+00 : f32
    %289 = vector.broadcast %cst_97 : f32 to vector<16x8xf32>
    %290 = arith.select %282, %288, %289 : vector<16x8xi1>, vector<16x8xf32>
    %cst_98 = arith.constant dense<0.000000e+00> : vector<8xf32>
    %291 = vector.multi_reduction <add>, %290, %cst_98 [0] : vector<16x8xf32> to vector<8xf32>
    %292 = vector.shape_cast %291 : vector<8xf32> to vector<1x8xf32>
    %cst_99 = arith.constant 1.000000e+00 : f32
    %293 = vector.broadcast %cst_99 : f32 to vector<1x8xf32>
    %294 = arith.subf %292, %293 : vector<1x8xf32>
    %295 = arith.mulf %294, %97 : vector<1x8xf32>
    %cst_100 = arith.constant 0.000000e+00 : f32
    %296 = vector.broadcast %cst_100 : f32 to vector<1x8xf32>
    %297 = arith.cmpf oge, %295, %296 : vector<1x8xf32>
    %298 = arith.select %297, %276, %273 : vector<1x8xi1>, vector<1x8xf32>
    %c8_i32_101 = arith.constant 8 : i32
    %cst_102 = arith.constant 5.000000e-01 : f32
    %299 = vector.broadcast %cst_102 : f32 to vector<1x8xf32>
    %300 = arith.mulf %275, %299 : vector<1x8xf32>
    %301 = arith.addf %298, %300 : vector<1x8xf32>
    %302 = vector.broadcast %301 : vector<1x8xf32> to vector<16x8xf32>
    %303 = arith.subf %68, %302 : vector<16x8xf32>
    %cst_103 = arith.constant 0.000000e+00 : f32
    %304 = vector.broadcast %cst_103 : f32 to vector<16x8xf32>
    %305 = arith.maximumf %303, %304 : vector<16x8xf32>
    %cst_104 = arith.constant 0.000000e+00 : f32
    %306 = vector.broadcast %cst_104 : f32 to vector<16x8xf32>
    %307 = arith.cmpf ogt, %305, %306 : vector<16x8xf32>
    %cst_105 = arith.constant 1.000000e+00 : f32
    %308 = vector.broadcast %cst_105 : f32 to vector<16x8xf32>
    %309 = arith.select %307, %305, %308 : vector<16x8xi1>, vector<16x8xf32>
    %310 = math.log %309 : vector<16x8xf32>
    %311 = vector.broadcast %71 : vector<1x8xf32> to vector<16x8xf32>
    %312 = arith.mulf %311, %310 : vector<16x8xf32>
    %313 = math.exp %312 : vector<16x8xf32>
    %cst_106 = arith.constant 0.000000e+00 : f32
    %314 = vector.broadcast %cst_106 : f32 to vector<16x8xf32>
    %315 = arith.select %307, %313, %314 : vector<16x8xi1>, vector<16x8xf32>
    %cst_107 = arith.constant dense<0.000000e+00> : vector<8xf32>
    %316 = vector.multi_reduction <add>, %315, %cst_107 [0] : vector<16x8xf32> to vector<8xf32>
    %317 = vector.shape_cast %316 : vector<8xf32> to vector<1x8xf32>
    %cst_108 = arith.constant 1.000000e+00 : f32
    %318 = vector.broadcast %cst_108 : f32 to vector<1x8xf32>
    %319 = arith.subf %317, %318 : vector<1x8xf32>
    %320 = arith.mulf %319, %97 : vector<1x8xf32>
    %cst_109 = arith.constant 0.000000e+00 : f32
    %321 = vector.broadcast %cst_109 : f32 to vector<1x8xf32>
    %322 = arith.cmpf oge, %320, %321 : vector<1x8xf32>
    %323 = arith.select %322, %301, %298 : vector<1x8xi1>, vector<1x8xf32>
    %c9_i32 = arith.constant 9 : i32
    %cst_110 = arith.constant 5.000000e-01 : f32
    %324 = vector.broadcast %cst_110 : f32 to vector<1x8xf32>
    %325 = arith.mulf %300, %324 : vector<1x8xf32>
    %326 = arith.addf %323, %325 : vector<1x8xf32>
    %327 = vector.broadcast %326 : vector<1x8xf32> to vector<16x8xf32>
    %328 = arith.subf %68, %327 : vector<16x8xf32>
    %cst_111 = arith.constant 0.000000e+00 : f32
    %329 = vector.broadcast %cst_111 : f32 to vector<16x8xf32>
    %330 = arith.maximumf %328, %329 : vector<16x8xf32>
    %cst_112 = arith.constant 0.000000e+00 : f32
    %331 = vector.broadcast %cst_112 : f32 to vector<16x8xf32>
    %332 = arith.cmpf ogt, %330, %331 : vector<16x8xf32>
    %cst_113 = arith.constant 1.000000e+00 : f32
    %333 = vector.broadcast %cst_113 : f32 to vector<16x8xf32>
    %334 = arith.select %332, %330, %333 : vector<16x8xi1>, vector<16x8xf32>
    %335 = math.log %334 : vector<16x8xf32>
    %336 = vector.broadcast %71 : vector<1x8xf32> to vector<16x8xf32>
    %337 = arith.mulf %336, %335 : vector<16x8xf32>
    %338 = math.exp %337 : vector<16x8xf32>
    %cst_114 = arith.constant 0.000000e+00 : f32
    %339 = vector.broadcast %cst_114 : f32 to vector<16x8xf32>
    %340 = arith.select %332, %338, %339 : vector<16x8xi1>, vector<16x8xf32>
    %cst_115 = arith.constant dense<0.000000e+00> : vector<8xf32>
    %341 = vector.multi_reduction <add>, %340, %cst_115 [0] : vector<16x8xf32> to vector<8xf32>
    %342 = vector.shape_cast %341 : vector<8xf32> to vector<1x8xf32>
    %cst_116 = arith.constant 1.000000e+00 : f32
    %343 = vector.broadcast %cst_116 : f32 to vector<1x8xf32>
    %344 = arith.subf %342, %343 : vector<1x8xf32>
    %345 = arith.mulf %344, %97 : vector<1x8xf32>
    %cst_117 = arith.constant 0.000000e+00 : f32
    %346 = vector.broadcast %cst_117 : f32 to vector<1x8xf32>
    %347 = arith.cmpf oge, %345, %346 : vector<1x8xf32>
    %348 = arith.select %347, %326, %323 : vector<1x8xi1>, vector<1x8xf32>
    %c10_i32 = arith.constant 10 : i32
    %cst_118 = arith.constant 5.000000e-01 : f32
    %349 = vector.broadcast %cst_118 : f32 to vector<1x8xf32>
    %350 = arith.mulf %325, %349 : vector<1x8xf32>
    %351 = arith.addf %348, %350 : vector<1x8xf32>
    %352 = vector.broadcast %351 : vector<1x8xf32> to vector<16x8xf32>
    %353 = arith.subf %68, %352 : vector<16x8xf32>
    %cst_119 = arith.constant 0.000000e+00 : f32
    %354 = vector.broadcast %cst_119 : f32 to vector<16x8xf32>
    %355 = arith.maximumf %353, %354 : vector<16x8xf32>
    %cst_120 = arith.constant 0.000000e+00 : f32
    %356 = vector.broadcast %cst_120 : f32 to vector<16x8xf32>
    %357 = arith.cmpf ogt, %355, %356 : vector<16x8xf32>
    %cst_121 = arith.constant 1.000000e+00 : f32
    %358 = vector.broadcast %cst_121 : f32 to vector<16x8xf32>
    %359 = arith.select %357, %355, %358 : vector<16x8xi1>, vector<16x8xf32>
    %360 = math.log %359 : vector<16x8xf32>
    %361 = vector.broadcast %71 : vector<1x8xf32> to vector<16x8xf32>
    %362 = arith.mulf %361, %360 : vector<16x8xf32>
    %363 = math.exp %362 : vector<16x8xf32>
    %cst_122 = arith.constant 0.000000e+00 : f32
    %364 = vector.broadcast %cst_122 : f32 to vector<16x8xf32>
    %365 = arith.select %357, %363, %364 : vector<16x8xi1>, vector<16x8xf32>
    %cst_123 = arith.constant dense<0.000000e+00> : vector<8xf32>
    %366 = vector.multi_reduction <add>, %365, %cst_123 [0] : vector<16x8xf32> to vector<8xf32>
    %367 = vector.shape_cast %366 : vector<8xf32> to vector<1x8xf32>
    %cst_124 = arith.constant 1.000000e+00 : f32
    %368 = vector.broadcast %cst_124 : f32 to vector<1x8xf32>
    %369 = arith.subf %367, %368 : vector<1x8xf32>
    %370 = arith.mulf %369, %97 : vector<1x8xf32>
    %cst_125 = arith.constant 0.000000e+00 : f32
    %371 = vector.broadcast %cst_125 : f32 to vector<1x8xf32>
    %372 = arith.cmpf oge, %370, %371 : vector<1x8xf32>
    %373 = arith.select %372, %351, %348 : vector<1x8xi1>, vector<1x8xf32>
    %c11_i32 = arith.constant 11 : i32
    %cst_126 = arith.constant 5.000000e-01 : f32
    %374 = vector.broadcast %cst_126 : f32 to vector<1x8xf32>
    %375 = arith.mulf %350, %374 : vector<1x8xf32>
    %376 = arith.addf %373, %375 : vector<1x8xf32>
    %377 = vector.broadcast %376 : vector<1x8xf32> to vector<16x8xf32>
    %378 = arith.subf %68, %377 : vector<16x8xf32>
    %cst_127 = arith.constant 0.000000e+00 : f32
    %379 = vector.broadcast %cst_127 : f32 to vector<16x8xf32>
    %380 = arith.maximumf %378, %379 : vector<16x8xf32>
    %cst_128 = arith.constant 0.000000e+00 : f32
    %381 = vector.broadcast %cst_128 : f32 to vector<16x8xf32>
    %382 = arith.cmpf ogt, %380, %381 : vector<16x8xf32>
    %cst_129 = arith.constant 1.000000e+00 : f32
    %383 = vector.broadcast %cst_129 : f32 to vector<16x8xf32>
    %384 = arith.select %382, %380, %383 : vector<16x8xi1>, vector<16x8xf32>
    %385 = math.log %384 : vector<16x8xf32>
    %386 = vector.broadcast %71 : vector<1x8xf32> to vector<16x8xf32>
    %387 = arith.mulf %386, %385 : vector<16x8xf32>
    %388 = math.exp %387 : vector<16x8xf32>
    %cst_130 = arith.constant 0.000000e+00 : f32
    %389 = vector.broadcast %cst_130 : f32 to vector<16x8xf32>
    %390 = arith.select %382, %388, %389 : vector<16x8xi1>, vector<16x8xf32>
    %cst_131 = arith.constant dense<0.000000e+00> : vector<8xf32>
    %391 = vector.multi_reduction <add>, %390, %cst_131 [0] : vector<16x8xf32> to vector<8xf32>
    %392 = vector.shape_cast %391 : vector<8xf32> to vector<1x8xf32>
    %cst_132 = arith.constant 1.000000e+00 : f32
    %393 = vector.broadcast %cst_132 : f32 to vector<1x8xf32>
    %394 = arith.subf %392, %393 : vector<1x8xf32>
    %395 = arith.mulf %394, %97 : vector<1x8xf32>
    %cst_133 = arith.constant 0.000000e+00 : f32
    %396 = vector.broadcast %cst_133 : f32 to vector<1x8xf32>
    %397 = arith.cmpf oge, %395, %396 : vector<1x8xf32>
    %398 = arith.select %397, %376, %373 : vector<1x8xi1>, vector<1x8xf32>
    %c12_i32 = arith.constant 12 : i32
    %cst_134 = arith.constant 5.000000e-01 : f32
    %399 = vector.broadcast %cst_134 : f32 to vector<1x8xf32>
    %400 = arith.mulf %375, %399 : vector<1x8xf32>
    %401 = arith.addf %398, %400 : vector<1x8xf32>
    %402 = vector.broadcast %401 : vector<1x8xf32> to vector<16x8xf32>
    %403 = arith.subf %68, %402 : vector<16x8xf32>
    %cst_135 = arith.constant 0.000000e+00 : f32
    %404 = vector.broadcast %cst_135 : f32 to vector<16x8xf32>
    %405 = arith.maximumf %403, %404 : vector<16x8xf32>
    %cst_136 = arith.constant 0.000000e+00 : f32
    %406 = vector.broadcast %cst_136 : f32 to vector<16x8xf32>
    %407 = arith.cmpf ogt, %405, %406 : vector<16x8xf32>
    %cst_137 = arith.constant 1.000000e+00 : f32
    %408 = vector.broadcast %cst_137 : f32 to vector<16x8xf32>
    %409 = arith.select %407, %405, %408 : vector<16x8xi1>, vector<16x8xf32>
    %410 = math.log %409 : vector<16x8xf32>
    %411 = vector.broadcast %71 : vector<1x8xf32> to vector<16x8xf32>
    %412 = arith.mulf %411, %410 : vector<16x8xf32>
    %413 = math.exp %412 : vector<16x8xf32>
    %cst_138 = arith.constant 0.000000e+00 : f32
    %414 = vector.broadcast %cst_138 : f32 to vector<16x8xf32>
    %415 = arith.select %407, %413, %414 : vector<16x8xi1>, vector<16x8xf32>
    %cst_139 = arith.constant dense<0.000000e+00> : vector<8xf32>
    %416 = vector.multi_reduction <add>, %415, %cst_139 [0] : vector<16x8xf32> to vector<8xf32>
    %417 = vector.shape_cast %416 : vector<8xf32> to vector<1x8xf32>
    %cst_140 = arith.constant 1.000000e+00 : f32
    %418 = vector.broadcast %cst_140 : f32 to vector<1x8xf32>
    %419 = arith.subf %417, %418 : vector<1x8xf32>
    %420 = arith.mulf %419, %97 : vector<1x8xf32>
    %cst_141 = arith.constant 0.000000e+00 : f32
    %421 = vector.broadcast %cst_141 : f32 to vector<1x8xf32>
    %422 = arith.cmpf oge, %420, %421 : vector<1x8xf32>
    %423 = arith.select %422, %401, %398 : vector<1x8xi1>, vector<1x8xf32>
    %c13_i32 = arith.constant 13 : i32
    %cst_142 = arith.constant 5.000000e-01 : f32
    %424 = vector.broadcast %cst_142 : f32 to vector<1x8xf32>
    %425 = arith.mulf %400, %424 : vector<1x8xf32>
    %426 = arith.addf %423, %425 : vector<1x8xf32>
    %427 = vector.broadcast %426 : vector<1x8xf32> to vector<16x8xf32>
    %428 = arith.subf %68, %427 : vector<16x8xf32>
    %cst_143 = arith.constant 0.000000e+00 : f32
    %429 = vector.broadcast %cst_143 : f32 to vector<16x8xf32>
    %430 = arith.maximumf %428, %429 : vector<16x8xf32>
    %cst_144 = arith.constant 0.000000e+00 : f32
    %431 = vector.broadcast %cst_144 : f32 to vector<16x8xf32>
    %432 = arith.cmpf ogt, %430, %431 : vector<16x8xf32>
    %cst_145 = arith.constant 1.000000e+00 : f32
    %433 = vector.broadcast %cst_145 : f32 to vector<16x8xf32>
    %434 = arith.select %432, %430, %433 : vector<16x8xi1>, vector<16x8xf32>
    %435 = math.log %434 : vector<16x8xf32>
    %436 = vector.broadcast %71 : vector<1x8xf32> to vector<16x8xf32>
    %437 = arith.mulf %436, %435 : vector<16x8xf32>
    %438 = math.exp %437 : vector<16x8xf32>
    %cst_146 = arith.constant 0.000000e+00 : f32
    %439 = vector.broadcast %cst_146 : f32 to vector<16x8xf32>
    %440 = arith.select %432, %438, %439 : vector<16x8xi1>, vector<16x8xf32>
    %cst_147 = arith.constant dense<0.000000e+00> : vector<8xf32>
    %441 = vector.multi_reduction <add>, %440, %cst_147 [0] : vector<16x8xf32> to vector<8xf32>
    %442 = vector.shape_cast %441 : vector<8xf32> to vector<1x8xf32>
    %cst_148 = arith.constant 1.000000e+00 : f32
    %443 = vector.broadcast %cst_148 : f32 to vector<1x8xf32>
    %444 = arith.subf %442, %443 : vector<1x8xf32>
    %445 = arith.mulf %444, %97 : vector<1x8xf32>
    %cst_149 = arith.constant 0.000000e+00 : f32
    %446 = vector.broadcast %cst_149 : f32 to vector<1x8xf32>
    %447 = arith.cmpf oge, %445, %446 : vector<1x8xf32>
    %448 = arith.select %447, %426, %423 : vector<1x8xi1>, vector<1x8xf32>
    %c14_i32 = arith.constant 14 : i32
    %cst_150 = arith.constant 5.000000e-01 : f32
    %449 = vector.broadcast %cst_150 : f32 to vector<1x8xf32>
    %450 = arith.mulf %425, %449 : vector<1x8xf32>
    %451 = arith.addf %448, %450 : vector<1x8xf32>
    %452 = vector.broadcast %451 : vector<1x8xf32> to vector<16x8xf32>
    %453 = arith.subf %68, %452 : vector<16x8xf32>
    %cst_151 = arith.constant 0.000000e+00 : f32
    %454 = vector.broadcast %cst_151 : f32 to vector<16x8xf32>
    %455 = arith.maximumf %453, %454 : vector<16x8xf32>
    %cst_152 = arith.constant 0.000000e+00 : f32
    %456 = vector.broadcast %cst_152 : f32 to vector<16x8xf32>
    %457 = arith.cmpf ogt, %455, %456 : vector<16x8xf32>
    %cst_153 = arith.constant 1.000000e+00 : f32
    %458 = vector.broadcast %cst_153 : f32 to vector<16x8xf32>
    %459 = arith.select %457, %455, %458 : vector<16x8xi1>, vector<16x8xf32>
    %460 = math.log %459 : vector<16x8xf32>
    %461 = vector.broadcast %71 : vector<1x8xf32> to vector<16x8xf32>
    %462 = arith.mulf %461, %460 : vector<16x8xf32>
    %463 = math.exp %462 : vector<16x8xf32>
    %cst_154 = arith.constant 0.000000e+00 : f32
    %464 = vector.broadcast %cst_154 : f32 to vector<16x8xf32>
    %465 = arith.select %457, %463, %464 : vector<16x8xi1>, vector<16x8xf32>
    %cst_155 = arith.constant dense<0.000000e+00> : vector<8xf32>
    %466 = vector.multi_reduction <add>, %465, %cst_155 [0] : vector<16x8xf32> to vector<8xf32>
    %467 = vector.shape_cast %466 : vector<8xf32> to vector<1x8xf32>
    %cst_156 = arith.constant 1.000000e+00 : f32
    %468 = vector.broadcast %cst_156 : f32 to vector<1x8xf32>
    %469 = arith.subf %467, %468 : vector<1x8xf32>
    %470 = arith.mulf %469, %97 : vector<1x8xf32>
    %cst_157 = arith.constant 0.000000e+00 : f32
    %471 = vector.broadcast %cst_157 : f32 to vector<1x8xf32>
    %472 = arith.cmpf oge, %470, %471 : vector<1x8xf32>
    %473 = arith.select %472, %451, %448 : vector<1x8xi1>, vector<1x8xf32>
    %c15_i32 = arith.constant 15 : i32
    %cst_158 = arith.constant 5.000000e-01 : f32
    %474 = vector.broadcast %cst_158 : f32 to vector<1x8xf32>
    %475 = arith.mulf %450, %474 : vector<1x8xf32>
    %476 = arith.addf %473, %475 : vector<1x8xf32>
    %477 = vector.broadcast %476 : vector<1x8xf32> to vector<16x8xf32>
    %478 = arith.subf %68, %477 : vector<16x8xf32>
    %cst_159 = arith.constant 0.000000e+00 : f32
    %479 = vector.broadcast %cst_159 : f32 to vector<16x8xf32>
    %480 = arith.maximumf %478, %479 : vector<16x8xf32>
    %cst_160 = arith.constant 0.000000e+00 : f32
    %481 = vector.broadcast %cst_160 : f32 to vector<16x8xf32>
    %482 = arith.cmpf ogt, %480, %481 : vector<16x8xf32>
    %cst_161 = arith.constant 1.000000e+00 : f32
    %483 = vector.broadcast %cst_161 : f32 to vector<16x8xf32>
    %484 = arith.select %482, %480, %483 : vector<16x8xi1>, vector<16x8xf32>
    %485 = math.log %484 : vector<16x8xf32>
    %486 = vector.broadcast %71 : vector<1x8xf32> to vector<16x8xf32>
    %487 = arith.mulf %486, %485 : vector<16x8xf32>
    %488 = math.exp %487 : vector<16x8xf32>
    %cst_162 = arith.constant 0.000000e+00 : f32
    %489 = vector.broadcast %cst_162 : f32 to vector<16x8xf32>
    %490 = arith.select %482, %488, %489 : vector<16x8xi1>, vector<16x8xf32>
    %cst_163 = arith.constant dense<0.000000e+00> : vector<8xf32>
    %491 = vector.multi_reduction <add>, %490, %cst_163 [0] : vector<16x8xf32> to vector<8xf32>
    %492 = vector.shape_cast %491 : vector<8xf32> to vector<1x8xf32>
    %cst_164 = arith.constant 1.000000e+00 : f32
    %493 = vector.broadcast %cst_164 : f32 to vector<1x8xf32>
    %494 = arith.subf %492, %493 : vector<1x8xf32>
    %495 = arith.mulf %494, %97 : vector<1x8xf32>
    %cst_165 = arith.constant 0.000000e+00 : f32
    %496 = vector.broadcast %cst_165 : f32 to vector<1x8xf32>
    %497 = arith.cmpf oge, %495, %496 : vector<1x8xf32>
    %498 = arith.select %497, %476, %473 : vector<1x8xi1>, vector<1x8xf32>
    %c16_i32 = arith.constant 16 : i32
    %cst_166 = arith.constant 5.000000e-01 : f32
    %499 = vector.broadcast %cst_166 : f32 to vector<1x8xf32>
    %500 = arith.mulf %475, %499 : vector<1x8xf32>
    %501 = arith.addf %498, %500 : vector<1x8xf32>
    %502 = vector.broadcast %501 : vector<1x8xf32> to vector<16x8xf32>
    %503 = arith.subf %68, %502 : vector<16x8xf32>
    %cst_167 = arith.constant 0.000000e+00 : f32
    %504 = vector.broadcast %cst_167 : f32 to vector<16x8xf32>
    %505 = arith.maximumf %503, %504 : vector<16x8xf32>
    %cst_168 = arith.constant 0.000000e+00 : f32
    %506 = vector.broadcast %cst_168 : f32 to vector<16x8xf32>
    %507 = arith.cmpf ogt, %505, %506 : vector<16x8xf32>
    %cst_169 = arith.constant 1.000000e+00 : f32
    %508 = vector.broadcast %cst_169 : f32 to vector<16x8xf32>
    %509 = arith.select %507, %505, %508 : vector<16x8xi1>, vector<16x8xf32>
    %510 = math.log %509 : vector<16x8xf32>
    %511 = vector.broadcast %71 : vector<1x8xf32> to vector<16x8xf32>
    %512 = arith.mulf %511, %510 : vector<16x8xf32>
    %513 = math.exp %512 : vector<16x8xf32>
    %cst_170 = arith.constant 0.000000e+00 : f32
    %514 = vector.broadcast %cst_170 : f32 to vector<16x8xf32>
    %515 = arith.select %507, %513, %514 : vector<16x8xi1>, vector<16x8xf32>
    %cst_171 = arith.constant dense<0.000000e+00> : vector<8xf32>
    %516 = vector.multi_reduction <add>, %515, %cst_171 [0] : vector<16x8xf32> to vector<8xf32>
    %517 = vector.shape_cast %516 : vector<8xf32> to vector<1x8xf32>
    %cst_172 = arith.constant 1.000000e+00 : f32
    %518 = vector.broadcast %cst_172 : f32 to vector<1x8xf32>
    %519 = arith.subf %517, %518 : vector<1x8xf32>
    %520 = arith.mulf %519, %97 : vector<1x8xf32>
    %cst_173 = arith.constant 0.000000e+00 : f32
    %521 = vector.broadcast %cst_173 : f32 to vector<1x8xf32>
    %522 = arith.cmpf oge, %520, %521 : vector<1x8xf32>
    %523 = arith.select %522, %501, %498 : vector<1x8xi1>, vector<1x8xf32>
    %c17_i32 = arith.constant 17 : i32
    %cst_174 = arith.constant 5.000000e-01 : f32
    %524 = vector.broadcast %cst_174 : f32 to vector<1x8xf32>
    %525 = arith.mulf %500, %524 : vector<1x8xf32>
    %526 = arith.addf %523, %525 : vector<1x8xf32>
    %527 = vector.broadcast %526 : vector<1x8xf32> to vector<16x8xf32>
    %528 = arith.subf %68, %527 : vector<16x8xf32>
    %cst_175 = arith.constant 0.000000e+00 : f32
    %529 = vector.broadcast %cst_175 : f32 to vector<16x8xf32>
    %530 = arith.maximumf %528, %529 : vector<16x8xf32>
    %cst_176 = arith.constant 0.000000e+00 : f32
    %531 = vector.broadcast %cst_176 : f32 to vector<16x8xf32>
    %532 = arith.cmpf ogt, %530, %531 : vector<16x8xf32>
    %cst_177 = arith.constant 1.000000e+00 : f32
    %533 = vector.broadcast %cst_177 : f32 to vector<16x8xf32>
    %534 = arith.select %532, %530, %533 : vector<16x8xi1>, vector<16x8xf32>
    %535 = math.log %534 : vector<16x8xf32>
    %536 = vector.broadcast %71 : vector<1x8xf32> to vector<16x8xf32>
    %537 = arith.mulf %536, %535 : vector<16x8xf32>
    %538 = math.exp %537 : vector<16x8xf32>
    %cst_178 = arith.constant 0.000000e+00 : f32
    %539 = vector.broadcast %cst_178 : f32 to vector<16x8xf32>
    %540 = arith.select %532, %538, %539 : vector<16x8xi1>, vector<16x8xf32>
    %cst_179 = arith.constant dense<0.000000e+00> : vector<8xf32>
    %541 = vector.multi_reduction <add>, %540, %cst_179 [0] : vector<16x8xf32> to vector<8xf32>
    %542 = vector.shape_cast %541 : vector<8xf32> to vector<1x8xf32>
    %cst_180 = arith.constant 1.000000e+00 : f32
    %543 = vector.broadcast %cst_180 : f32 to vector<1x8xf32>
    %544 = arith.subf %542, %543 : vector<1x8xf32>
    %545 = arith.mulf %544, %97 : vector<1x8xf32>
    %cst_181 = arith.constant 0.000000e+00 : f32
    %546 = vector.broadcast %cst_181 : f32 to vector<1x8xf32>
    %547 = arith.cmpf oge, %545, %546 : vector<1x8xf32>
    %548 = arith.select %547, %526, %523 : vector<1x8xi1>, vector<1x8xf32>
    %c18_i32 = arith.constant 18 : i32
    %cst_182 = arith.constant 5.000000e-01 : f32
    %549 = vector.broadcast %cst_182 : f32 to vector<1x8xf32>
    %550 = arith.mulf %525, %549 : vector<1x8xf32>
    %551 = arith.addf %548, %550 : vector<1x8xf32>
    %552 = vector.broadcast %551 : vector<1x8xf32> to vector<16x8xf32>
    %553 = arith.subf %68, %552 : vector<16x8xf32>
    %cst_183 = arith.constant 0.000000e+00 : f32
    %554 = vector.broadcast %cst_183 : f32 to vector<16x8xf32>
    %555 = arith.maximumf %553, %554 : vector<16x8xf32>
    %cst_184 = arith.constant 0.000000e+00 : f32
    %556 = vector.broadcast %cst_184 : f32 to vector<16x8xf32>
    %557 = arith.cmpf ogt, %555, %556 : vector<16x8xf32>
    %cst_185 = arith.constant 1.000000e+00 : f32
    %558 = vector.broadcast %cst_185 : f32 to vector<16x8xf32>
    %559 = arith.select %557, %555, %558 : vector<16x8xi1>, vector<16x8xf32>
    %560 = math.log %559 : vector<16x8xf32>
    %561 = vector.broadcast %71 : vector<1x8xf32> to vector<16x8xf32>
    %562 = arith.mulf %561, %560 : vector<16x8xf32>
    %563 = math.exp %562 : vector<16x8xf32>
    %cst_186 = arith.constant 0.000000e+00 : f32
    %564 = vector.broadcast %cst_186 : f32 to vector<16x8xf32>
    %565 = arith.select %557, %563, %564 : vector<16x8xi1>, vector<16x8xf32>
    %cst_187 = arith.constant dense<0.000000e+00> : vector<8xf32>
    %566 = vector.multi_reduction <add>, %565, %cst_187 [0] : vector<16x8xf32> to vector<8xf32>
    %567 = vector.shape_cast %566 : vector<8xf32> to vector<1x8xf32>
    %cst_188 = arith.constant 1.000000e+00 : f32
    %568 = vector.broadcast %cst_188 : f32 to vector<1x8xf32>
    %569 = arith.subf %567, %568 : vector<1x8xf32>
    %570 = arith.mulf %569, %97 : vector<1x8xf32>
    %cst_189 = arith.constant 0.000000e+00 : f32
    %571 = vector.broadcast %cst_189 : f32 to vector<1x8xf32>
    %572 = arith.cmpf oge, %570, %571 : vector<1x8xf32>
    %573 = arith.select %572, %551, %548 : vector<1x8xi1>, vector<1x8xf32>
    %c19_i32 = arith.constant 19 : i32
    %cst_190 = arith.constant 5.000000e-01 : f32
    %574 = vector.broadcast %cst_190 : f32 to vector<1x8xf32>
    %575 = arith.mulf %550, %574 : vector<1x8xf32>
    %576 = arith.addf %573, %575 : vector<1x8xf32>
    %577 = vector.broadcast %576 : vector<1x8xf32> to vector<16x8xf32>
    %578 = arith.subf %68, %577 : vector<16x8xf32>
    %cst_191 = arith.constant 0.000000e+00 : f32
    %579 = vector.broadcast %cst_191 : f32 to vector<16x8xf32>
    %580 = arith.maximumf %578, %579 : vector<16x8xf32>
    %cst_192 = arith.constant 0.000000e+00 : f32
    %581 = vector.broadcast %cst_192 : f32 to vector<16x8xf32>
    %582 = arith.cmpf ogt, %580, %581 : vector<16x8xf32>
    %cst_193 = arith.constant 1.000000e+00 : f32
    %583 = vector.broadcast %cst_193 : f32 to vector<16x8xf32>
    %584 = arith.select %582, %580, %583 : vector<16x8xi1>, vector<16x8xf32>
    %585 = math.log %584 : vector<16x8xf32>
    %586 = vector.broadcast %71 : vector<1x8xf32> to vector<16x8xf32>
    %587 = arith.mulf %586, %585 : vector<16x8xf32>
    %588 = math.exp %587 : vector<16x8xf32>
    %cst_194 = arith.constant 0.000000e+00 : f32
    %589 = vector.broadcast %cst_194 : f32 to vector<16x8xf32>
    %590 = arith.select %582, %588, %589 : vector<16x8xi1>, vector<16x8xf32>
    %cst_195 = arith.constant dense<0.000000e+00> : vector<8xf32>
    %591 = vector.multi_reduction <add>, %590, %cst_195 [0] : vector<16x8xf32> to vector<8xf32>
    %592 = vector.shape_cast %591 : vector<8xf32> to vector<1x8xf32>
    %cst_196 = arith.constant 1.000000e+00 : f32
    %593 = vector.broadcast %cst_196 : f32 to vector<1x8xf32>
    %594 = arith.subf %592, %593 : vector<1x8xf32>
    %595 = arith.mulf %594, %97 : vector<1x8xf32>
    %cst_197 = arith.constant 0.000000e+00 : f32
    %596 = vector.broadcast %cst_197 : f32 to vector<1x8xf32>
    %597 = arith.cmpf oge, %595, %596 : vector<1x8xf32>
    %598 = arith.select %597, %576, %573 : vector<1x8xi1>, vector<1x8xf32>
    %c20_i32 = arith.constant 20 : i32
    %cst_198 = arith.constant 5.000000e-01 : f32
    %599 = vector.broadcast %cst_198 : f32 to vector<1x8xf32>
    %600 = arith.mulf %575, %599 : vector<1x8xf32>
    %601 = arith.addf %598, %600 : vector<1x8xf32>
    %602 = vector.broadcast %601 : vector<1x8xf32> to vector<16x8xf32>
    %603 = arith.subf %68, %602 : vector<16x8xf32>
    %cst_199 = arith.constant 0.000000e+00 : f32
    %604 = vector.broadcast %cst_199 : f32 to vector<16x8xf32>
    %605 = arith.maximumf %603, %604 : vector<16x8xf32>
    %cst_200 = arith.constant 0.000000e+00 : f32
    %606 = vector.broadcast %cst_200 : f32 to vector<16x8xf32>
    %607 = arith.cmpf ogt, %605, %606 : vector<16x8xf32>
    %cst_201 = arith.constant 1.000000e+00 : f32
    %608 = vector.broadcast %cst_201 : f32 to vector<16x8xf32>
    %609 = arith.select %607, %605, %608 : vector<16x8xi1>, vector<16x8xf32>
    %610 = math.log %609 : vector<16x8xf32>
    %611 = vector.broadcast %71 : vector<1x8xf32> to vector<16x8xf32>
    %612 = arith.mulf %611, %610 : vector<16x8xf32>
    %613 = math.exp %612 : vector<16x8xf32>
    %cst_202 = arith.constant 0.000000e+00 : f32
    %614 = vector.broadcast %cst_202 : f32 to vector<16x8xf32>
    %615 = arith.select %607, %613, %614 : vector<16x8xi1>, vector<16x8xf32>
    %cst_203 = arith.constant dense<0.000000e+00> : vector<8xf32>
    %616 = vector.multi_reduction <add>, %615, %cst_203 [0] : vector<16x8xf32> to vector<8xf32>
    %617 = vector.shape_cast %616 : vector<8xf32> to vector<1x8xf32>
    %cst_204 = arith.constant 1.000000e+00 : f32
    %618 = vector.broadcast %cst_204 : f32 to vector<1x8xf32>
    %619 = arith.subf %617, %618 : vector<1x8xf32>
    %620 = arith.mulf %619, %97 : vector<1x8xf32>
    %cst_205 = arith.constant 0.000000e+00 : f32
    %621 = vector.broadcast %cst_205 : f32 to vector<1x8xf32>
    %622 = arith.cmpf oge, %620, %621 : vector<1x8xf32>
    %623 = arith.select %622, %601, %598 : vector<1x8xi1>, vector<1x8xf32>
    %c21_i32 = arith.constant 21 : i32
    %cst_206 = arith.constant 5.000000e-01 : f32
    %624 = vector.broadcast %cst_206 : f32 to vector<1x8xf32>
    %625 = arith.mulf %600, %624 : vector<1x8xf32>
    %626 = arith.addf %623, %625 : vector<1x8xf32>
    %627 = vector.broadcast %626 : vector<1x8xf32> to vector<16x8xf32>
    %628 = arith.subf %68, %627 : vector<16x8xf32>
    %cst_207 = arith.constant 0.000000e+00 : f32
    %629 = vector.broadcast %cst_207 : f32 to vector<16x8xf32>
    %630 = arith.maximumf %628, %629 : vector<16x8xf32>
    %cst_208 = arith.constant 0.000000e+00 : f32
    %631 = vector.broadcast %cst_208 : f32 to vector<16x8xf32>
    %632 = arith.cmpf ogt, %630, %631 : vector<16x8xf32>
    %cst_209 = arith.constant 1.000000e+00 : f32
    %633 = vector.broadcast %cst_209 : f32 to vector<16x8xf32>
    %634 = arith.select %632, %630, %633 : vector<16x8xi1>, vector<16x8xf32>
    %635 = math.log %634 : vector<16x8xf32>
    %636 = vector.broadcast %71 : vector<1x8xf32> to vector<16x8xf32>
    %637 = arith.mulf %636, %635 : vector<16x8xf32>
    %638 = math.exp %637 : vector<16x8xf32>
    %cst_210 = arith.constant 0.000000e+00 : f32
    %639 = vector.broadcast %cst_210 : f32 to vector<16x8xf32>
    %640 = arith.select %632, %638, %639 : vector<16x8xi1>, vector<16x8xf32>
    %cst_211 = arith.constant dense<0.000000e+00> : vector<8xf32>
    %641 = vector.multi_reduction <add>, %640, %cst_211 [0] : vector<16x8xf32> to vector<8xf32>
    %642 = vector.shape_cast %641 : vector<8xf32> to vector<1x8xf32>
    %cst_212 = arith.constant 1.000000e+00 : f32
    %643 = vector.broadcast %cst_212 : f32 to vector<1x8xf32>
    %644 = arith.subf %642, %643 : vector<1x8xf32>
    %645 = arith.mulf %644, %97 : vector<1x8xf32>
    %cst_213 = arith.constant 0.000000e+00 : f32
    %646 = vector.broadcast %cst_213 : f32 to vector<1x8xf32>
    %647 = arith.cmpf oge, %645, %646 : vector<1x8xf32>
    %648 = arith.select %647, %626, %623 : vector<1x8xi1>, vector<1x8xf32>
    %c22_i32 = arith.constant 22 : i32
    %cst_214 = arith.constant 5.000000e-01 : f32
    %649 = vector.broadcast %cst_214 : f32 to vector<1x8xf32>
    %650 = arith.mulf %625, %649 : vector<1x8xf32>
    %651 = arith.addf %648, %650 : vector<1x8xf32>
    %652 = vector.broadcast %651 : vector<1x8xf32> to vector<16x8xf32>
    %653 = arith.subf %68, %652 : vector<16x8xf32>
    %cst_215 = arith.constant 0.000000e+00 : f32
    %654 = vector.broadcast %cst_215 : f32 to vector<16x8xf32>
    %655 = arith.maximumf %653, %654 : vector<16x8xf32>
    %cst_216 = arith.constant 0.000000e+00 : f32
    %656 = vector.broadcast %cst_216 : f32 to vector<16x8xf32>
    %657 = arith.cmpf ogt, %655, %656 : vector<16x8xf32>
    %cst_217 = arith.constant 1.000000e+00 : f32
    %658 = vector.broadcast %cst_217 : f32 to vector<16x8xf32>
    %659 = arith.select %657, %655, %658 : vector<16x8xi1>, vector<16x8xf32>
    %660 = math.log %659 : vector<16x8xf32>
    %661 = vector.broadcast %71 : vector<1x8xf32> to vector<16x8xf32>
    %662 = arith.mulf %661, %660 : vector<16x8xf32>
    %663 = math.exp %662 : vector<16x8xf32>
    %cst_218 = arith.constant 0.000000e+00 : f32
    %664 = vector.broadcast %cst_218 : f32 to vector<16x8xf32>
    %665 = arith.select %657, %663, %664 : vector<16x8xi1>, vector<16x8xf32>
    %cst_219 = arith.constant dense<0.000000e+00> : vector<8xf32>
    %666 = vector.multi_reduction <add>, %665, %cst_219 [0] : vector<16x8xf32> to vector<8xf32>
    %667 = vector.shape_cast %666 : vector<8xf32> to vector<1x8xf32>
    %cst_220 = arith.constant 1.000000e+00 : f32
    %668 = vector.broadcast %cst_220 : f32 to vector<1x8xf32>
    %669 = arith.subf %667, %668 : vector<1x8xf32>
    %670 = arith.mulf %669, %97 : vector<1x8xf32>
    %cst_221 = arith.constant 0.000000e+00 : f32
    %671 = vector.broadcast %cst_221 : f32 to vector<1x8xf32>
    %672 = arith.cmpf oge, %670, %671 : vector<1x8xf32>
    %673 = arith.select %672, %651, %648 : vector<1x8xi1>, vector<1x8xf32>
    %c23_i32 = arith.constant 23 : i32
    %cst_222 = arith.constant 5.000000e-01 : f32
    %674 = vector.broadcast %cst_222 : f32 to vector<1x8xf32>
    %675 = arith.mulf %650, %674 : vector<1x8xf32>
    %676 = arith.addf %673, %675 : vector<1x8xf32>
    %677 = vector.broadcast %676 : vector<1x8xf32> to vector<16x8xf32>
    %678 = arith.subf %68, %677 : vector<16x8xf32>
    %cst_223 = arith.constant 0.000000e+00 : f32
    %679 = vector.broadcast %cst_223 : f32 to vector<16x8xf32>
    %680 = arith.maximumf %678, %679 : vector<16x8xf32>
    %cst_224 = arith.constant 0.000000e+00 : f32
    %681 = vector.broadcast %cst_224 : f32 to vector<16x8xf32>
    %682 = arith.cmpf ogt, %680, %681 : vector<16x8xf32>
    %cst_225 = arith.constant 1.000000e+00 : f32
    %683 = vector.broadcast %cst_225 : f32 to vector<16x8xf32>
    %684 = arith.select %682, %680, %683 : vector<16x8xi1>, vector<16x8xf32>
    %685 = math.log %684 : vector<16x8xf32>
    %686 = vector.broadcast %71 : vector<1x8xf32> to vector<16x8xf32>
    %687 = arith.mulf %686, %685 : vector<16x8xf32>
    %688 = math.exp %687 : vector<16x8xf32>
    %cst_226 = arith.constant 0.000000e+00 : f32
    %689 = vector.broadcast %cst_226 : f32 to vector<16x8xf32>
    %690 = arith.select %682, %688, %689 : vector<16x8xi1>, vector<16x8xf32>
    %cst_227 = arith.constant dense<0.000000e+00> : vector<8xf32>
    %691 = vector.multi_reduction <add>, %690, %cst_227 [0] : vector<16x8xf32> to vector<8xf32>
    %692 = vector.shape_cast %691 : vector<8xf32> to vector<1x8xf32>
    %cst_228 = arith.constant 1.000000e+00 : f32
    %693 = vector.broadcast %cst_228 : f32 to vector<1x8xf32>
    %694 = arith.subf %692, %693 : vector<1x8xf32>
    %695 = arith.mulf %694, %97 : vector<1x8xf32>
    %cst_229 = arith.constant 0.000000e+00 : f32
    %696 = vector.broadcast %cst_229 : f32 to vector<1x8xf32>
    %697 = arith.cmpf oge, %695, %696 : vector<1x8xf32>
    %698 = arith.select %697, %676, %673 : vector<1x8xi1>, vector<1x8xf32>
    %699 = vector.broadcast %676 : vector<1x8xf32> to vector<16x8xf32>
    %700 = arith.subf %68, %699 : vector<16x8xf32>
    %cst_230 = arith.constant 0.000000e+00 : f32
    %701 = vector.broadcast %cst_230 : f32 to vector<16x8xf32>
    %702 = arith.maximumf %700, %701 : vector<16x8xf32>
    %cst_231 = arith.constant 0.000000e+00 : f32
    %703 = vector.broadcast %cst_231 : f32 to vector<16x8xf32>
    %704 = arith.cmpf ogt, %702, %703 : vector<16x8xf32>
    %cst_232 = arith.constant 1.000000e+00 : f32
    %705 = vector.broadcast %cst_232 : f32 to vector<16x8xf32>
    %706 = arith.select %704, %702, %705 : vector<16x8xi1>, vector<16x8xf32>
    %707 = math.log %706 : vector<16x8xf32>
    %708 = vector.broadcast %71 : vector<1x8xf32> to vector<16x8xf32>
    %709 = arith.mulf %708, %707 : vector<16x8xf32>
    %710 = math.exp %709 : vector<16x8xf32>
    %cst_233 = arith.constant 0.000000e+00 : f32
    %711 = vector.broadcast %cst_233 : f32 to vector<16x8xf32>
    %712 = arith.select %704, %710, %711 : vector<16x8xi1>, vector<16x8xf32>
    %cst_234 = arith.constant dense<0.000000e+00> : vector<8xf32>
    %713 = vector.multi_reduction <add>, %712, %cst_234 [0] : vector<16x8xf32> to vector<8xf32>
    %714 = vector.shape_cast %713 : vector<8xf32> to vector<1x8xf32>
    %715 = vector.broadcast %714 : vector<1x8xf32> to vector<16x8xf32>
    %716 = arith.divf %712, %715 : vector<16x8xf32>
    %717 = tpu.transpose %716, [1, 0] : vector<16x8xf32> -> vector<8x16xf32>
    %718 = vector.shape_cast %717 : vector<8x16xf32> to vector<8x16x1xf32>
    %719 = vector.broadcast %718 : vector<8x16x1xf32> to vector<8x16x32xf32>
    %720 = arith.mulf %719, %41 : vector<8x16x32xf32>
    %cst_235 = arith.constant dense<0.000000e+00> : vector<8x32xf32>
    %721 = vector.multi_reduction <add>, %720, %cst_235 [1] : vector<8x16x32xf32> to vector<8x32xf32>
    %cst_236 = arith.constant 0.000000e+00 : f32
    %722 = vector.broadcast %cst_236 : f32 to vector<8x32xf32>
    %723 = arith.maximumf %721, %722 : vector<8x32xf32>
    %724 = arith.mulf %723, %723 : vector<8x32xf32>
    %cst_237 = arith.constant dense<0.000000e+00> : vector<8xf32>
    %725 = vector.multi_reduction <add>, %724, %cst_237 [1] : vector<8x32xf32> to vector<8xf32>
    %726 = vector.shape_cast %725 : vector<8xf32> to vector<8x1xf32>
    %cst_238 = arith.constant 1.000000e-24 : f32
    %727 = vector.broadcast %cst_238 : f32 to vector<8x1xf32>
    %728 = arith.maximumf %726, %727 : vector<8x1xf32>
    %729 = math.rsqrt %728 : vector<8x1xf32>
    %730 = vector.broadcast %729 : vector<8x1xf32> to vector<8x32xf32>
    %731 = arith.mulf %723, %730 : vector<8x32xf32>
    %c0_239 = arith.constant 0 : index
    %c0_240 = arith.constant 0 : index
    %732 = vector.load %arg7[%c0_239, %c0_240] : memref<8x32xf32, #tpu.memory_space<vmem>>, vector<8x32xf32>
    tpu.vector_store %arg7[%c0_239, %c0_240], %731 {strides = array<i32>} : memref<8x32xf32, #tpu.memory_space<vmem>>, vector<8x32xf32>,
    return
  }
  func.func @transform_0(%arg0: i32) -> (i32, i32, i32) {
    %c0_i32 = arith.constant 0 : i32
    %c0_i32_0 = arith.constant 0 : i32
    %c0_i32_1 = arith.constant 0 : i32
    return %arg0, %c0_i32, %c0_i32_0 : i32, i32, i32
  }
  func.func @transform_1(%arg0: i32) -> (i32, i32, i32) {
    %c0_i32 = arith.constant 0 : i32
    %c0_i32_0 = arith.constant 0 : i32
    %c0_i32_1 = arith.constant 0 : i32
    return %arg0, %c0_i32, %c0_i32_0 : i32, i32, i32
  }
  func.func @transform_2(%arg0: i32) -> (i32, i32) {
    %c0_i32 = arith.constant 0 : i32
    %c0_i32_0 = arith.constant 0 : i32
    return %arg0, %c0_i32 : i32, i32
  }
  func.func @transform_3(%arg0: i32) -> (i32, i32) {
    %c0_i32 = arith.constant 0 : i32
    %c0_i32_0 = arith.constant 0 : i32
    %c0_i32_1 = arith.constant 0 : i32
    return %c0_i32, %c0_i32_0 : i32, i32
  }
  func.func @transform_4(%arg0: i32) -> (i32, i32) {
    %c0_i32 = arith.constant 0 : i32
    %c0_i32_0 = arith.constant 0 : i32
    %c0_i32_1 = arith.constant 0 : i32
    return %c0_i32, %c0_i32_0 : i32, i32
  }
  func.func @transform_5(%arg0: i32) -> (i32, i32) {
    %c0_i32 = arith.constant 0 : i32
    %c0_i32_0 = arith.constant 0 : i32
    %c0_i32_1 = arith.constant 0 : i32
    return %c0_i32, %c0_i32_0 : i32, i32
  }
  func.func @transform_6(%arg0: i32) -> (i32, i32) {
    %c0_i32 = arith.constant 0 : i32
    %c0_i32_0 = arith.constant 0 : i32
    return %arg0, %c0_i32 : i32, i32
  }
}

</mosaic_0001>

<bundles_post_ra>
// kernel: tpu_custom_call.1
= control target key start
LH: loop header
LB: loop body
LE: loop exit
PB: predicated region body
PF: predicated region fallthrough
CT: control target
= control target key end

     0   :  { %11 = vsyncpa [#allocation3], 0  ;;  %s4252_s0 = inlined_call_operand.hbm [shape: bf16[8,16,32], index: 0, kind: input, shape index: {}]   ;;  %s4253_s1 = inlined_call_operand.hbm [shape: bf16[8,16,16], index: 1, kind: input, shape index: {}]   ;;  %s4254_s2 = inlined_call_operand.hbm [shape: f32[8,16], index: 2, kind: input, shape index: {}]   ;;  %s4255_s3 = inlined_call_operand.hbm [shape: bf16[32,128], index: 3, kind: input, shape index: {}]   ;;  %s4256_s4 = inlined_call_operand.vmem [shape: bf16[16,128], index: 4, kind: input, shape index: {}]   ;;  %s4257_s5 = inlined_call_operand.vmem [shape: f32[1,128], index: 5, kind: input, shape index: {}]   ;;  %s4258_s6 = inlined_call_operand.hbm [shape: f32[8,32], index: 6, kind: output, shape index: {}]  }
   0x1   :  { %12 = vsyncpa [#allocation6], 0 }
   0x2   :  { %13 = vsyncpa [#allocation9], 0 }
   0x3   :  { %14 = vsyncpa [#allocation4], 0  ;;  %s3324_s21 = smov [#allocation5]   ;;  %s3325_s23 = smov [#allocation2]  }
   0x4   :  { %s32_s22 = sshll.u32 %s3324_s21, 4  ;;  %s20_s24 = sshll.u32 %s3325_s23, 4  ;;  %s33_s22 = int_to_ptr.vmem [resolvable:$true] %s32_s22  ;;  %s3371_s24 = int_to_ptr.vmem [resolvable:$true] %s20_s24 }
   0x5   :  { %s3206_s27 = scalar_lea.hbm %s4253_s1, 1024 }
   0x6   :  { %p3207_p0 = scmp.ne.s32.totalorder %s4253_s1, %s3206_s27  ;;  %p3210_p1 = scmp.lt.u32.totalorder %s3206_s27, %s4253_s1 }
   0x8   :  { %p3212_p2 = pnand %p3210_p1, %p3207_p0 }
   0xa   :  { %3215 = shalt.err (!%p3212_p2)
}
   0xb   :  { %s3216_s8 = scalar_lea.vmem %s33_s22, 1024  ;;  %p3221_p4 = scmp.lt.s32.totalorder %s33_s22, %s33_s22 }
   0xc   :  { %p3217_p3 = scmp.ne.s32.totalorder %s33_s22, %s3216_s8  ;;  %p3222_p5 = scmp.lt.s32.totalorder %s3216_s8, %s3216_s8 }
   0xe   :  { %p3223_p6 = por %p3222_p5, %p3221_p4 }
  0x10   :  { %p3224_p7 = pnand %p3223_p6, %p3217_p3 }
  0x12   :  { %3227 = shalt.err (!%p3224_p7)
}
  0x13   :  { %s3326_s9 = smov 64   ;;  %s3327_s10 = smov 4  }
  0x14   :  { %38 = dma.hbm_to_vmem [thread:$0]  %s4253_s1, 1024, %s33_s22, [#allocation6], %s3326_s9, %s3326_s9, %s3327_s10  }
  0x15   :  { %s3228_s15 = scalar_lea.hbm %s4252_s0, 1024 }
  0x16   :  { %p3229_p8 = scmp.ne.s32.totalorder %s4252_s0, %s3228_s15  ;;  %p3232_p9 = scmp.lt.u32.totalorder %s3228_s15, %s4252_s0 }
  0x18   :  { %p3234_p10 = pnand %p3232_p9, %p3229_p8 }
  0x1a   :  { %3237 = shalt.err (!%p3234_p10)
}
  0x1b   :  { %s3238_s20 = scalar_lea.vmem %s3371_s24, 1024  ;;  %p3243_p12 = scmp.lt.s32.totalorder %s3371_s24, %s3371_s24 }
  0x1c   :  { %p3239_p11 = scmp.ne.s32.totalorder %s3371_s24, %s3238_s20  ;;  %p3244_p13 = scmp.lt.s32.totalorder %s3238_s20, %s3238_s20 }
  0x1e   :  { %p3245_p0 = por %p3244_p13, %p3243_p12 }
  0x20   :  { %p3246_p1 = pnand %p3245_p0, %p3239_p11 }
  0x22   :  { %3249 = shalt.err (!%p3246_p1)
}
  0x23   :  { %26 = dma.hbm_to_vmem [thread:$0]  %s4252_s0, 1024, %s3371_s24, [#allocation3], %s3326_s9, %s3326_s9, %s3327_s10  }
  0x24   :  { %s3328_s22 = smov [#allocation7]   ;;  %s3329_s25 = smov [#allocation8]  }
  0x25   :  { %s45_s23 = sshll.u32 %s3328_s22, 4  ;;  %s54_s26 = sshll.u32 %s3329_s25, 4  ;;  %s46_s23 = int_to_ptr.vmem [resolvable:$true] %s45_s23  ;;  %s3408_s26 = int_to_ptr.vmem [resolvable:$true] %s54_s26 }
  0x26   :  { %s3250_s29 = scalar_lea.hbm %s4254_s2, 128 }
  0x27   :  { %p3251_p2 = scmp.ne.s32.totalorder %s4254_s2, %s3250_s29  ;;  %p3254_p3 = scmp.lt.u32.totalorder %s3250_s29, %s4254_s2 }
  0x29   :  { %p3256_p4 = pnand %p3254_p3, %p3251_p2 }
  0x2b   :  { %3259 = shalt.err (!%p3256_p4)
}
  0x2c   :  { %s3260_s0 = scalar_lea.vmem %s46_s23, 128  ;;  %p3265_p6 = scmp.lt.s32.totalorder %s46_s23, %s46_s23 }
  0x2d   :  { %p3261_p5 = scmp.ne.s32.totalorder %s46_s23, %s3260_s0  ;;  %p3266_p7 = scmp.lt.s32.totalorder %s3260_s0, %s3260_s0 }
  0x2f   :  { %p3267_p8 = por %p3266_p7, %p3265_p6 }
  0x31   :  { %p3268_p9 = pnand %p3267_p8, %p3261_p5 }
  0x33   :  { %3271 = shalt.err (!%p3268_p9)
}
  0x34   :  { %48 = dma.hbm_to_vmem [thread:$0]  %s4254_s2, 128, %s46_s23, [#allocation6]  }
  0x35   :  { %s3272_s15 = scalar_lea.hbm %s4255_s3, 256 }
  0x36   :  { %p3273_p10 = scmp.ne.s32.totalorder %s4255_s3, %s3272_s15  ;;  %p3276_p11 = scmp.lt.u32.totalorder %s3272_s15, %s4255_s3 }
  0x38   :  { %p3278_p12 = pnand %p3276_p11, %p3273_p10 }
  0x3a   :  { %3281 = shalt.err (!%p3278_p12)
}
  0x3b   :  { %s3282_s20 = scalar_lea.vmem %s3408_s26, 256  ;;  %p3287_p0 = scmp.lt.s32.totalorder %s3408_s26, %s3408_s26 }
  0x3c   :  { %p3283_p13 = scmp.ne.s32.totalorder %s3408_s26, %s3282_s20  ;;  %p3288_p1 = scmp.lt.s32.totalorder %s3282_s20, %s3282_s20 }
  0x3e   :  { %p3289_p2 = por %p3288_p1, %p3287_p0 }
  0x40   :  { %p3290_p3 = pnand %p3289_p2, %p3283_p13 }
  0x42   :  { %3293 = shalt.err (!%p3290_p3)
}
  0x43   :  { %60 = dma.hbm_to_vmem [thread:$0]  %s4255_s3, 256, %s3408_s26, [#allocation9], %s3326_s9, %s3326_s9, %s3327_s10  }
  0x44   :  { %3316 = dma.done.wait [#allocation3], 1024  }
  0x45   :  { %3317 = vsyncadd [#allocation3], 4294966272 }
  0x46   :  { %3318 = dma.done.wait [#allocation6], 1152  }
  0x47   :  { %3319 = vsyncadd [#allocation6], 4294966144 }
  0x48   :  { %3320 = dma.done.wait [#allocation9], 256  }
  0x49   :  { %3321 = vsyncadd [#allocation9], 4294967040  ;;  %v129_v0 = vlaneseq  ;;  %v3451_v4 = vld [vmem:[#allocation7] sm:$0xff]  ;;  %v2943_v10 = vld [vmem:[#allocation8] sm:$0xff]   ;;  %vm447_vm0 = vcmask 130048   ;;  %vm233_vm1 = vcmask 261120  }
  0x4a   :  { %v2945_v11 = vld [vmem:[%s4256_s4] sm:$0xff]   ;;  %2886 = vmatprep.subr.bf16.mxu0 %v2943_v10  ;;  %v2946_v14 = vld [vmem:[#allocation8 + $0x8] sm:$0xff]   ;;  %v2949_v16 = vld [vmem:[#allocation5 + $0x8] sm:$0xff]   ;;  %vm3330_vm3 = vmmov 0   ;;  %vm1364_vm9 = vcmask 1041409   ;;  %vm1366_vm12 = vcmask 1042434  }
  0x4b   :  { %v3443_v1 = vshrl.u32 %v129_v0, 7  ;;  %2868 = vmatprep.subr.bf16.mxu1 %v2945_v11  ;;  %2887 = vmatpush3.bf16.msra.mxu0 %v2943_v10  ;;  %v2948_v15 = vld [vmem:[#allocation5] sm:$0xff]   ;;  %v2952_v21 = vld [vmem:[#allocation5 + $0x10] sm:$0xff]   ;;  %v2953_v22 = vld [vmem:[#allocation5 + $0x18] sm:$0xff]   ;;  %vm1368_vm13 = vcmask 1043459   ;;  %s3335_s22 = smov [#allocation10]  }
  0x4c   :  { %2869 = vmatpush3.bf16.msra.mxu1 %v2945_v11  ;;  %2888 = vmatprep.subr.bf16.mxu0 %v2946_v14  ;;  %v2954_v26 = vld [vmem:[#allocation5 + $0x20] sm:$0xff]   ;;  %v2955_v27 = vld [vmem:[#allocation5 + $0x28] sm:$0xff]   ;;  %v2956_v28 = vld [vmem:[#allocation5 + $0x30] sm:$0xff]   ;;  %s2759_s23 = sshll.u32 %s3335_s22, 4  ;;  %s2760_s23 = int_to_ptr.vmem [resolvable:$true] %s2759_s23 }
  0x4d   :  { %v3446_v2 = vsub.s32 0, %v3443_v1  ;;  %v3449_v3 = vsub.s32 1, %v3443_v1  ;;  %v3458_v7 = vsub.s32 2, %v3443_v1  ;;  %v3463_v9 = vsub.s32 3, %v3443_v1  ;;  %2870 = vmatprep.mubr.msk.bf16.mxu1 %vm447_vm0, %v2948_v15  ;;  %v2957_v29 = vld [vmem:[#allocation5 + $0x38] sm:$0xff]   ;;  %v3498_v30 = vld [vmem:[#allocation2 + $0x8] sm:$0xff]   ;;  %vm331_vm4 = vmpackc.low %vm3330_vm3, %vm3330_vm3  ;;  %p3299_p5 = scmp.lt.s32.totalorder %s2760_s23, %s2760_s23 }
  0x4e   :  { %v3471_v13 = vsub.s32 4, %v3443_v1  ;;  %v3477_v18 = vsub.s32 5, %v3443_v1  ;;  %v3483_v20 = vsub.s32 6, %v3443_v1  ;;  %v3489_v24 = vsub.s32 7, %v3443_v1  ;;  %v3500_v31 = vld [vmem:[#allocation2] sm:$0xff]   ;;  %v3506_v38 = vld [vmem:[#allocation2 + $0x10] sm:$0xff]  }
  0x4f   :  { %v143_v5 = vrot.slane %v3451_v4, %v3449_v3  ;;  %v132_v6 = vrot.slane %v3451_v4, %v3446_v2  ;;  %v154_v8 = vrot.slane %v3451_v4, %v3458_v7  ;;  %v165_v12 = vrot.slane %v3451_v4, %v3463_v9  ;;  %2889 = vmatpush3.bf16.msra.mxu0 %v2946_v14  ;;  %v3511_v48 = vld [vmem:[#allocation2 + $0x18] sm:$0xff]   ;;  %v3517_v53 = vld [vmem:[#allocation2 + $0x20] sm:$0xff]   ;;  %s3294_s25 = scalar_lea.vmem %s2760_s23, 128 }
  0x50   :  { %v176_v17 = vrot.slane %v3451_v4, %v3471_v13  ;;  %2871 = vmatmul.mubr.msk.bf16.vlgmr.msra.gmra.mrb[0].mxu1 %vm447_vm0, %v2949_v16  ;;  %v187_v19 = vrot.slane %v3451_v4, %v3477_v18  ;;  %v198_v23 = vrot.slane %v3451_v4, %v3483_v20  ;;  %v209_v25 = vrot.slane %v3451_v4, %v3489_v24  ;;  %p3295_p4 = scmp.ne.s32.totalorder %s2760_s23, %s3294_s25  ;;  %p3300_p6 = scmp.lt.s32.totalorder %s3294_s25, %s3294_s25 }
  0x51   :  { %145 = vbcast.lane.b32.xlu1 %v143_v5, 256  ;;  %134 = vbcast.lane.b32.xlu0 %v132_v6, 256  ;;  %v115_v32 = vunpack.c.l.bf16 %v3498_v30  ;;  %v113_v33 = vunpack.c.l.bf16 %v3500_v31  ;;  %v116_v36 = vunpack.c.h.bf16 %v3498_v30  ;;  %v114_v37 = vunpack.c.h.bf16 %v3500_v31 }
  0x52   :  { %2874 = vmatprep.mubr.msk.bf16.mxu1 %vm447_vm0, %v2952_v21  ;;  %v316_v39 = vadd.s32 8, %v3443_v1  ;;  %v118_v44 = vunpack.c.h.bf16 %v3506_v38  ;;  %v117_v47 = vunpack.c.l.bf16 %v3506_v38  ;;  %v120_v60 = vunpack.c.h.bf16 %v3511_v48  ;;  %p3301_p7 = por %p3300_p6, %p3299_p5 }
  0x53   :  { %v119_v61 = vunpack.c.l.bf16 %v3511_v48  ;;  %v121_v11 = vunpack.c.l.bf16 %v3517_v53 }
  0x54   :  { %vm318_vm2 = vcmp.eq.s32.totalorder %v316_v39, 8  ;;  %p3302_p8 = pnand %p3301_p7, %p3295_p4 }
  0x55   :  { %149 = vbcast.lane.b32.xlu1 %v143_v5, 264  ;;  %138 = vbcast.lane.b32.xlu0 %v132_v6, 264  ;;  %vm332_vm5 = vmpackc.low %vm318_vm2, %vm318_vm2  ;;  %v122_v5 = vunpack.c.h.bf16 %v3517_v53  ;;  %v3524_v6 = vld [vmem:[#allocation2 + $0x28] sm:$0xff]   ;;  %vm1372_vm2 = vcmask 1045509  }
  0x58   :  { %2875 = vmatmul.mubr.msk.bf16.gmra.mrb[4].mxu1 %vm447_vm0, %v2953_v22 }
  0x59   :  { %160 = vbcast.lane.b32.xlu1 %v154_v8, 264  ;;  %156 = vbcast.lane.b32.xlu0 %v154_v8, 256 }
  0x5a   :  { %2878 = vmatprep.mubr.msk.bf16.mxu1 %vm447_vm0, %v2954_v26  ;;  %v124_v26 = vunpack.c.h.bf16 %v3524_v6 }
  0x5d   :  { %171 = vbcast.lane.b32.xlu1 %v165_v12, 264  ;;  %167 = vbcast.lane.b32.xlu0 %v165_v12, 256  ;;  %v3331_v12 = vmov 0  }
  0x5e   :  { %v333_v14 = vsel %vm331_vm4, 65537, %v3331_v12  ;;  %v334_v22 = vsel %vm332_vm5, 65537, %v3331_v12  ;;  %vm1374_vm5 = vcmask 1046534  }
  0x60   :  { %2879 = vmatmul.mubr.msk.bf16.gmra.mrb[8].mxu1 %vm447_vm0, %v2955_v27 }
  0x61   :  { %182 = vbcast.lane.b32.xlu1 %v176_v17, 264  ;;  %178 = vbcast.lane.b32.xlu0 %v176_v17, 256 }
  0x62   :  { %2882 = vmatprep.mubr.msk.bf16.mxu1 %vm447_vm0, %v2956_v28 }
  0x65   :  { %193 = vbcast.lane.b32.xlu1 %v187_v19, 264  ;;  %189 = vbcast.lane.b32.xlu0 %v187_v19, 256 }
  0x68   :  { %2883 = vmatmul.mubr.msk.bf16.gmra.mrb[12].mxu1 %vm447_vm0, %v2957_v29  ;;  %vm1370_vm0 = vcmask 1044484  }
  0x69   :  { %204 = vbcast.lane.b32.xlu1 %v198_v23, 264  ;;  %200 = vbcast.lane.b32.xlu0 %v198_v23, 256 }
  0x6d   :  { %215 = vbcast.lane.b32.xlu1 %v209_v25, 264  ;;  %211 = vbcast.lane.b32.xlu0 %v209_v25, 256 }
  0xc3   :  { %v146_v34 = vpop.permute.xlu1 %145  ;;  %v135_v35 = vpop.permute.xlu0 %134 }
  0xc4   :  { %v219_v40 = vmul.f32 %v146_v34, %v115_v32  ;;  %v217_v41 = vmul.f32 %v135_v35, %v113_v33  ;;  %v123_v32 = vunpack.c.l.bf16 %v3524_v6  ;;  %v3533_v33 = vld [vmem:[#allocation2 + $0x30] sm:$0xff]  }
  0xc6   :  { %v243_v49 = vsel %vm233_vm1, %v219_v40, 0.0  ;;  %v234_v50 = vsel %vm233_vm1, %v217_v41, 0.0 }
  0xc7   :  { %v150_v42 = vpop.permute.xlu1 %149  ;;  %v139_v43 = vpop.permute.xlu0 %138 }
  0xc8   :  { %v220_v45 = vmul.f32 %v150_v42, %v116_v36  ;;  %v218_v46 = vmul.f32 %v139_v43, %v114_v37  ;;  %v2770_v36 = vcombine.low %v333_v14, %v334_v22 }
  0xca   :  { %v244_v51 = vsel %vm233_vm1, %v220_v45, 0.0  ;;  %v235_v52 = vsel %vm233_vm1, %v218_v46, 0.0  ;;  %v126_v46 = vunpack.c.h.bf16 %v3533_v33  ;;  %vm3543_vm6 = vcmp.ne.s16.totalorder %v2770_v36, 0 }
  0xcb   :  { %v245_v54 = vadd.f32 %v244_v51, %v243_v49  ;;  %v236_v55 = vadd.f32 %v235_v52, %v234_v50  ;;  %v161_v56 = vpop.permute.xlu1 %160  ;;  %v157_v57 = vpop.permute.xlu0 %156 }
  0xcc   :  { %v222_v58 = vmul.f32 %v161_v56, %v118_v44  ;;  %v221_v59 = vmul.f32 %v157_v57, %v117_v47  ;;  %v125_v47 = vunpack.c.l.bf16 %v3533_v33 }
  0xcd   :  { %v246_v62 = vrot.slane %v245_v54, 4  ;;  %v237_v63 = vrot.slane %v236_v55, 4 }
  0xce   :  { %v253_v8 = vsel %vm233_vm1, %v222_v58, 0.0  ;;  %v252_v10 = vsel %vm233_vm1, %v221_v59, 0.0 }
  0xcf   :  { %v247_v15 = vadd.f32 %v246_v62, %v245_v54  ;;  %v238_v16 = vadd.f32 %v237_v63, %v236_v55  ;;  %v254_v17 = vadd.f32 %v253_v8, %v252_v10  ;;  %v172_v19 = vpop.permute.xlu1 %171  ;;  %v168_v21 = vpop.permute.xlu0 %167  ;;  %v3539_v54 = vld [vmem:[#allocation2 + $0x38] sm:$0xff]  }
  0xd0   :  { %v224_v23 = vmul.f32 %v172_v19, %v120_v60  ;;  %v223_v25 = vmul.f32 %v168_v21, %v119_v61  ;;  %v128_v10 = vunpack.c.h.bf16 %v3539_v54  ;;  %v127_v22 = vunpack.c.l.bf16 %v3539_v54 }
  0xd1   :  { %v248_v27 = vrot.slane %v247_v15, 2  ;;  %v239_v28 = vrot.slane %v238_v16, 2  ;;  %v255_v29 = vrot.slane %v254_v17, 4 }
  0xd2   :  { %v262_v34 = vsel %vm233_vm1, %v224_v23, 0.0  ;;  %v261_v35 = vsel %vm233_vm1, %v223_v25, 0.0 }
  0xd3   :  { %v249_v37 = vadd.f32 %v248_v27, %v247_v15  ;;  %v256_v39 = vadd.f32 %v255_v29, %v254_v17  ;;  %v263_v40 = vadd.f32 %v262_v34, %v261_v35  ;;  %v183_v41 = vpop.permute.xlu1 %182  ;;  %v179_v42 = vpop.permute.xlu0 %178  ;;  %v240_v43 = vadd.f32 %v239_v28, %v238_v16 }
  0xd4   :  { %v226_v44 = vmul.f32 %v183_v41, %v122_v5  ;;  %v225_v45 = vmul.f32 %v179_v42, %v121_v11 }
  0xd5   :  { %v250_v49 = vrot.slane %v249_v37, 1  ;;  %v257_v50 = vrot.slane %v256_v39, 2  ;;  %v264_v51 = vrot.slane %v263_v40, 4  ;;  %v241_v52 = vrot.slane %v240_v43, 1 }
  0xd6   :  { %v271_v55 = vsel %vm233_vm1, %v226_v44, 0.0  ;;  %v270_v56 = vsel %vm233_vm1, %v225_v45, 0.0 }
  0xd7   :  { %v258_v58 = vadd.f32 %v257_v50, %v256_v39  ;;  %v265_v59 = vadd.f32 %v264_v51, %v263_v40  ;;  %v272_v60 = vadd.f32 %v271_v55, %v270_v56  ;;  %v194_v61 = vpop.permute.xlu1 %193  ;;  %v190_v62 = vpop.permute.xlu0 %189  ;;  %v242_v63 = vadd.f32 %v241_v52, %v240_v43 }
  0xd8   :  { %v228_v5 = vmul.f32 %v194_v61, %v124_v26  ;;  %v227_v8 = vmul.f32 %v190_v62, %v123_v32  ;;  %v251_v11 = vadd.f32 %v250_v49, %v249_v37 }
  0xd9   :  { %v259_v14 = vrot.slane %v258_v58, 1  ;;  %v266_v15 = vrot.slane %v265_v59, 2  ;;  %v273_v16 = vrot.slane %v272_v60, 4  ;;  %v306_v17 = vmul.f32 0.125, %v242_v63 }
  0xda   :  { %v280_v19 = vsel %vm233_vm1, %v228_v5, 0.0  ;;  %v279_v21 = vsel %vm233_vm1, %v227_v8, 0.0  ;;  %v307_v23 = vmul.f32 0.125, %v251_v11 }
  0xdb   :  { %v267_v25 = vadd.f32 %v266_v15, %v265_v59  ;;  %v274_v27 = vadd.f32 %v273_v16, %v272_v60  ;;  %v281_v28 = vadd.f32 %v280_v19, %v279_v21  ;;  %v205_v29 = vpop.permute.xlu1 %204  ;;  %v201_v26 = vpop.permute.xlu0 %200  ;;  %v319_v32 = vpack.c.bf16 %v306_v17, %v306_v17 }
  0xdc   :  { %v230_v34 = vmul.f32 %v205_v29, %v126_v46  ;;  %v229_v35 = vmul.f32 %v201_v26, %v125_v47  ;;  %v320_v36 = vpack.c.bf16 %v307_v23, %v307_v23  ;;  %v260_v37 = vadd.f32 %v259_v14, %v258_v58 }
  0xdd   :  { %v268_v39 = vrot.slane %v267_v25, 1  ;;  %v275_v40 = vrot.slane %v274_v27, 2  ;;  %v282_v41 = vrot.slane %v281_v28, 4  ;;  %v387_v42 = vsel %vm3543_vm6, %v319_v32, %v3500_v31 }
  0xde   :  { %v289_v43 = vsel %vm233_vm1, %v230_v34, 0.0  ;;  %v288_v44 = vsel %vm233_vm1, %v229_v35, 0.0  ;;  %2890 = vmatprep.mubr.msk.bf16.mxu0 %vm233_vm1, %v387_v42  ;;  %v388_v45 = vsel %vm3543_vm6, %v320_v36, %v3498_v30  ;;  %v308_v46 = vmul.f32 0.125, %v260_v37 }
  0xdf   :  { %v276_v47 = vadd.f32 %v275_v40, %v274_v27  ;;  %v283_v49 = vadd.f32 %v282_v41, %v281_v28  ;;  %v290_v50 = vadd.f32 %v289_v43, %v288_v44  ;;  %v216_v51 = vpop.permute.xlu1 %215  ;;  %v212_v52 = vpop.permute.xlu0 %211  ;;  %2891 = vmatmul.mubr.msk.bf16.vlgmr.msra.gmra.mrb[0].mxu0 %vm233_vm1, %v388_v45  ;;  %v269_v55 = vadd.f32 %v268_v39, %v267_v25 }
  0xe0   :  { %v232_v31 = vmul.f32 %v216_v51, %v128_v10  ;;  %v231_v56 = vmul.f32 %v212_v52, %v127_v22  ;;  %v321_v58 = vpack.c.bf16 %v308_v46, %v308_v46 }
  0xe1   :  { %v277_v59 = vrot.slane %v276_v47, 1  ;;  %v284_v60 = vrot.slane %v283_v49, 2  ;;  %v291_v61 = vrot.slane %v290_v50, 4  ;;  %v309_v62 = vmul.f32 0.125, %v269_v55 }
  0xe2   :  { %v298_v63 = vsel %vm233_vm1, %v232_v31, 0.0  ;;  %v297_v30 = vsel %vm233_vm1, %v231_v56, 0.0  ;;  %v389_v5 = vsel %vm3543_vm6, %v321_v58, %v3506_v38 }
  0xe3   :  { %v285_v8 = vadd.f32 %v284_v60, %v283_v49  ;;  %v292_v11 = vadd.f32 %v291_v61, %v290_v50  ;;  %v299_v14 = vadd.f32 %v298_v63, %v297_v30  ;;  %2894 = vmatprep.mubr.msk.bf16.mxu0 %vm233_vm1, %v389_v5  ;;  %v322_v10 = vpack.c.bf16 %v309_v62, %v309_v62  ;;  %v3600_v62 = vld [vmem:[%s4257_s5] ss:$0 sm:$0xff]  ;;  %s3333_s5 = smov 32  }
  0xe4   :  { %v278_v15 = vadd.f32 %v277_v59, %v276_v47  ;;  %v3332_v60 = vmov 96  }
  0xe5   :  { %v286_v16 = vrot.slane %v285_v8, 1  ;;  %v293_v17 = vrot.slane %v292_v11, 2  ;;  %v300_v19 = vrot.slane %v299_v14, 4  ;;  %v390_v21 = vsel %vm3543_vm6, %v322_v10, %v3511_v48  ;;  %2935 = vset.pattern.permute.xlu1 %v3332_v60  ;;  %2936 = vset.pattern.permute.xlu0 %v3332_v60 }
  0xe6   :  { %v310_v22 = vmul.f32 0.125, %v278_v15 }
  0xe7   :  { %v294_v23 = vadd.f32 %v293_v17, %v292_v11  ;;  %v301_v25 = vadd.f32 %v300_v19, %v299_v14  ;;  %2895 = vmatmul.mubr.msk.bf16.gmra.mrb[4].mxu0 %vm233_vm1, %v390_v21  ;;  %v287_v38 = vadd.f32 %v286_v16, %v285_v8 }
  0xe8   :  { %v323_v27 = vpack.c.bf16 %v310_v22, %v310_v22 }
  0xe9   :  { %v295_v28 = vrot.slane %v294_v23, 1  ;;  %v302_v29 = vrot.slane %v301_v25, 2  ;;  %v311_v26 = vmul.f32 0.125, %v287_v38 }
  0xea   :  { %v391_v32 = vsel %vm3543_vm6, %v323_v27, %v3517_v53 }
  0xeb   :  { %v303_v34 = vadd.f32 %v302_v29, %v301_v25  ;;  %2898 = vmatprep.mubr.msk.bf16.mxu0 %vm233_vm1, %v391_v32  ;;  %v324_v35 = vpack.c.bf16 %v311_v26, %v311_v26  ;;  %v296_v36 = vadd.f32 %v295_v28, %v294_v23 }
  0xed   :  { %v304_v48 = vrot.slane %v303_v34, 1  ;;  %v392_v37 = vsel %vm3543_vm6, %v324_v35, %v3524_v6  ;;  %v312_v39 = vmul.f32 0.125, %v296_v36 }
  0xef   :  { %2899 = vmatmul.mubr.msk.bf16.gmra.mrb[8].mxu0 %vm233_vm1, %v392_v37  ;;  %v325_v40 = vpack.c.bf16 %v312_v39, %v312_v39  ;;  %v305_v41 = vadd.f32 %v304_v48, %v303_v34 }
  0xf1   :  { %v393_v42 = vsel %vm3543_vm6, %v325_v40, %v3533_v33  ;;  %v313_v53 = vmul.f32 0.125, %v305_v41 }
  0xf2   :  { %2902 = vmatprep.mubr.msk.bf16.mxu0 %vm233_vm1, %v393_v42 }
  0xf3   :  { %v326_v43 = vpack.c.bf16 %v313_v53, %v313_v53 }
  0xf5   :  { %v394_v44 = vsel %vm3543_vm6, %v326_v43, %v3539_v54  ;;  %vm1376_vm6 = vcmask 1047559  }
  0xf7   :  { %2903 = vmatmul.mubr.msk.bf16.gmra.mrb[12].mxu0 %vm233_vm1, %v394_v44 }
 0x123   :  { %v2872_v6 = vpop.f32.mrb[0].mxu1 }
 0x124   :  { %v506_v45 = vpop.f32.mrb[1].mxu1 }
 0x125   :  { %v2873_v46 = vpop.f32.mrb[2].mxu1 }
 0x126   :  { %v509_v47 = vpop.f32.mrb[3].mxu1 }
 0x12b   :  { %v2876_v49 = vpop.f32.mrb[4].mxu1 }
 0x12c   :  { %v522_v50 = vpop.f32.mrb[5].mxu1 }
 0x12d   :  { %v2877_v51 = vpop.f32.mrb[6].mxu1 }
 0x12e   :  { %v525_v52 = vpop.f32.mrb[7].mxu1 }
 0x133   :  { %v2880_v55 = vpop.f32.mrb[8].mxu1 }
 0x134   :  { %v538_v33 = vpop.f32.mrb[9].mxu1 }
 0x135   :  { %v2881_v31 = vpop.f32.mrb[10].mxu1 }
 0x136   :  { %v3587_v56 = vpop.f32.mrb[11].mxu1 }
 0x13b   :  { %v3589_v58 = vpop.f32.mrb[12].mxu1 }
 0x13c   :  { %v3591_v59 = vpop.f32.mrb[13].mxu1 }
 0x13d   :  { %v3593_v54 = vpop.f32.mrb[14].mxu1 }
 0x13e   :  { %v3595_v57 = vpop.f32.mrb[15].mxu1 }
 0x1b2   :  { %v2892_v61 = vpop.f32.mrb[0].mxu0 }
 0x1b3   :  { %v648_v63 = vadd.f32 %v2892_v61, %v2872_v6  ;;  %v639_v30 = vpop.f32.mrb[1].mxu0 }
 0x1b4   :  { %v640_v5 = vadd.f32 %v639_v30, %v506_v45  ;;  %v2893_v8 = vpop.f32.mrb[2].mxu0 }
 0x1b5   :  { %v651_v11 = vadd.f32 %v2893_v8, %v2873_v46  ;;  %v642_v14 = vpop.f32.mrb[3].mxu0  ;;  %v3603_v10 = vadd.f32 %v3600_v62, %v648_v63 }
 0x1b6   :  { %v643_v15 = vadd.f32 %v642_v14, %v509_v47  ;;  %v3608_v19 = vadd.f32 %v3600_v62, %v640_v5 }
 0x1b7   :  { %v712_v16 = vadd.f32 %v3600_v62, %v651_v11  ;;  %v734_v17 = vmax.f32 %v3603_v10, 0.0 }
 0x1b8   :  { %v710_v21 = vadd.f32 %v3600_v62, %v643_v15  ;;  %v733_v29 = vmax.f32 %v3608_v19, 0.0 }
 0x1b9   :  { %v2808_v22 = vmul.f32 -1.442695, %v712_v16  ;;  %929 = vrot.lane.b32.xlu1 %v734_v17, %s3326_s9  ;;  %v3614_v23 = vmax.f32 %v712_v16, 0.0 }
 0x1ba   :  { %v2807_v25 = vmul.f32 -1.442695, %v710_v21  ;;  %v2896_v38 = vpop.f32.mrb[4].mxu0  ;;  %v3622_v36 = vmax.f32 %v710_v21, 0.0 }
 0x1bb   :  { %2966 = vpow2.f32 %v2808_v22  ;;  %v664_v27 = vadd.f32 %v2896_v38, %v2876_v49  ;;  %931 = vrot.lane.b32.xlu0 %v3614_v23, %s3326_s9  ;;  %v655_v28 = vpop.f32.mrb[5].mxu0 }
 0x1bc   :  { %2968 = vpow2.f32 %v2807_v25  ;;  %v656_v26 = vadd.f32 %v655_v28, %v522_v50  ;;  %v2897_v32 = vpop.f32.mrb[6].mxu0 }
 0x1bd   :  { %v667_v34 = vadd.f32 %v2897_v32, %v2877_v51  ;;  %v658_v35 = vpop.f32.mrb[7].mxu0  ;;  %925 = vrot.lane.b32.xlu1 %v733_v29, %s3326_s9  ;;  %v3625_v48 = vadd.f32 %v3600_v62, %v664_v27 }
 0x1be   :  { %v659_v37 = vadd.f32 %v658_v35, %v525_v52  ;;  %v3632_v41 = vadd.f32 %v3600_v62, %v656_v26 }
 0x1bf   :  { %v716_v39 = vadd.f32 %v3600_v62, %v667_v34  ;;  %927 = vrot.lane.b32.xlu0 %v3622_v36, %s3326_s9  ;;  %v736_v40 = vmax.f32 %v3625_v48, 0.0 }
 0x1c0   :  { %v714_v42 = vadd.f32 %v3600_v62, %v659_v37  ;;  %v735_v47 = vmax.f32 %v3632_v41, 0.0 }
 0x1c1   :  { %v2810_v53 = vmul.f32 -1.442695, %v716_v39  ;;  %937 = vrot.lane.b32.xlu1 %v736_v40, %s3326_s9  ;;  %v3638_v43 = vmax.f32 %v716_v39, 0.0 }
 0x1c2   :  { %v2809_v44 = vmul.f32 -1.442695, %v714_v42  ;;  %v2900_v6 = vpop.f32.mrb[8].mxu0  ;;  %v3646_v61 = vmax.f32 %v714_v42, 0.0 }
 0x1c3   :  { %2970 = vpow2.f32 %v2810_v53  ;;  %v680_v45 = vadd.f32 %v2900_v6, %v2880_v55  ;;  %v671_v46 = vpop.f32.mrb[9].mxu0  ;;  %939 = vrot.lane.b32.xlu0 %v3638_v43, %s3326_s9 }
 0x1c4   :  { %2972 = vpow2.f32 %v2809_v44  ;;  %v672_v49 = vadd.f32 %v671_v46, %v538_v33  ;;  %v2901_v50 = vpop.f32.mrb[10].mxu0 }
 0x1c5   :  { %v2967_v51 = vpop.eup %2966  ;;  %v683_v52 = vadd.f32 %v2901_v50, %v2881_v31  ;;  %v674_v60 = vpop.f32.mrb[11].mxu0  ;;  %933 = vrot.lane.b32.xlu1 %v735_v47, %s3326_s9  ;;  %v3649_v55 = vadd.f32 %v3600_v62, %v680_v45 }
 0x1c6   :  { %v2969_v63 = vpop.eup %2968  ;;  %v766_v30 = vadd.f32 1.0, %v2967_v51  ;;  %v675_v5 = vadd.f32 %v674_v60, %v3587_v56  ;;  %v3657_v11 = vadd.f32 %v3600_v62, %v672_v49 }
 0x1c7   :  { %v765_v8 = vadd.f32 1.0, %v2969_v63  ;;  %v720_v33 = vadd.f32 %v3600_v62, %v683_v52  ;;  %935 = vrot.lane.b32.xlu0 %v3646_v61, %s3326_s9  ;;  %v738_v31 = vmax.f32 %v3649_v55, 0.0 }
 0x1c8   :  { %2974 = vrcp.f32 %v766_v30  ;;  %v718_v14 = vadd.f32 %v3600_v62, %v675_v5  ;;  %v737_v38 = vmax.f32 %v3657_v11, 0.0 }
 0x1c9   :  { %2976 = vrcp.f32 %v765_v8  ;;  %v2812_v15 = vmul.f32 -1.442695, %v720_v33  ;;  %945 = vrot.lane.b32.xlu1 %v738_v31, %s3326_s9  ;;  %v3663_v56 = vmax.f32 %v720_v33, 0.0 }
 0x1ca   :  { %v2811_v16 = vmul.f32 -1.442695, %v718_v14  ;;  %v2904_v21 = vpop.f32.mrb[12].mxu0 }
 0x1cb   :  { %2978 = vpow2.f32 %v2812_v15  ;;  %v3666_v22 = vadd.f32 %v2904_v21, %v3589_v58  ;;  %v687_v25 = vpop.f32.mrb[13].mxu0  ;;  %947 = vrot.lane.b32.xlu0 %v3663_v56, %s3326_s9  ;;  %v3676_v58 = vmax.f32 %v718_v14, 0.0 }
 0x1cc   :  { %2980 = vpow2.f32 %v2811_v16  ;;  %v688_v27 = vadd.f32 %v687_v25, %v3591_v59  ;;  %v2905_v28 = vpop.f32.mrb[14].mxu0 }
 0x1cd   :  { %v2971_v26 = vpop.eup %2970  ;;  %v699_v32 = vadd.f32 %v2905_v28, %v3593_v54  ;;  %v690_v34 = vpop.f32.mrb[15].mxu0  ;;  %941 = vrot.lane.b32.xlu1 %v737_v38, %s3326_s9 }
 0x1ce   :  { %v2973_v35 = vpop.eup %2972  ;;  %v768_v37 = vadd.f32 1.0, %v2971_v26  ;;  %v691_v39 = vadd.f32 %v690_v34, %v3595_v57  ;;  %v3680_v42 = vadd.f32 %v3600_v62, %v688_v27 }
 0x1cf   :  { %v767_v53 = vadd.f32 1.0, %v2973_v35  ;;  %v3683_v59 = vadd.f32 %v3600_v62, %v699_v32  ;;  %943 = vrot.lane.b32.xlu0 %v3676_v58, %s3326_s9 }
 0x1d0   :  { %2982 = vrcp.f32 %v768_v37  ;;  %v722_v54 = vadd.f32 %v3600_v62, %v691_v39  ;;  %v739_v44 = vmax.f32 %v3680_v42, 0.0 }
 0x1d1   :  { %2984 = vrcp.f32 %v767_v53  ;;  %v2814_v6 = vmul.f32 -1.442695, %v3683_v59 }
 0x1d2   :  { %v2975_v45 = vpop.eup %2974  ;;  %v2813_v57 = vmul.f32 -1.442695, %v722_v54  ;;  %949 = vrot.lane.b32.xlu1 %v739_v44, %s3326_s9  ;;  %v3693_v46 = vmax.f32 %v722_v54, 0.0 }
 0x1d3   :  { %v2977_v49 = vpop.eup %2976  ;;  %2986 = vpow2.f32 %v2814_v6  ;;  %v790_v50 = vadd.f32 1.0, %v2975_v45 }
 0x1d4   :  { %2988 = vpow2.f32 %v2813_v57  ;;  %951 = vrot.lane.b32.xlu0 %v3693_v46, %s3326_s9  ;;  %v789_v51 = vadd.f32 1.0, %v2977_v49 }
 0x1d5   :  { %v2979_v52 = vpop.eup %2978  ;;  %vm798_vm7 = vcmp.eq.f32.partialorder %v790_v50, 1.0 }
 0x1d6   :  { %v2981_v60 = vpop.eup %2980  ;;  %v770_v63 = vadd.f32 1.0, %v2979_v52  ;;  %v806_v30 = vsel %vm798_vm7, 1.00001, %v790_v50  ;;  %vm797_vm8 = vcmp.eq.f32.partialorder %v789_v51, 1.0  ;;  %vm1299_vm7 = vcmask 130112  }
 0x1d7   :  { %v769_v5 = vadd.f32 1.0, %v2981_v60  ;;  %v2816_v8 = vadd.f32 -1.0, %v806_v30  ;;  %v805_v33 = vsel %vm797_vm8, 1.00001, %v789_v51  ;;  %vm1470_vm8 = vcmask 64512  }
 0x1d8   :  { %2990 = vrcp.f32 %v770_v63  ;;  %v2815_v14 = vadd.f32 -1.0, %v805_v33 }
 0x1d9   :  { %2992 = vrcp.f32 %v769_v5  ;;  %v822_v15 = vmul.f32 0.17677669, %v2816_v8  ;;  %v1419_v16 = vrot.slane %v2816_v8, 7 }
 0x1da   :  { %v2983_v21 = vpop.eup %2982  ;;  %v821_v25 = vmul.f32 0.17677669, %v2815_v14 }
 0x1db   :  { %v2985_v27 = vpop.eup %2984  ;;  %836 = vperm.xlu1 %2935, %v822_v15   ;;  %v1420_v28 = vsel %vm1364_vm9, %v1419_v16, %v2815_v14  ;;  %v792_v26 = vadd.f32 1.0, %v2983_v21 }
 0x1dc   :  { %831 = vperm.xlu0 %2936, %v821_v25   ;;  %v791_v32 = vadd.f32 1.0, %v2985_v27 }
 0x1dd   :  { %v2987_v34 = vpop.eup %2986  ;;  %vm800_vm10 = vcmp.eq.f32.partialorder %v792_v26, 1.0 }
 0x1de   :  { %v2989_v35 = vpop.eup %2988  ;;  %v772_v37 = vadd.f32 1.0, %v2987_v34  ;;  %v808_v39 = vsel %vm800_vm10, 1.00001, %v792_v26  ;;  %vm799_vm11 = vcmp.eq.f32.partialorder %v791_v32, 1.0 }
 0x1df   :  { %v771_v53 = vadd.f32 1.0, %v2989_v35  ;;  %v2818_v54 = vadd.f32 -1.0, %v808_v39  ;;  %v807_v6 = vsel %vm799_vm11, 1.00001, %v791_v32 }
 0x1e0   :  { %2994 = vrcp.f32 %v772_v37  ;;  %v2817_v45 = vadd.f32 -1.0, %v807_v6 }
 0x1e1   :  { %2996 = vrcp.f32 %v771_v53  ;;  %v824_v57 = vmul.f32 0.17677669, %v2818_v54  ;;  %v1423_v60 = vrot.slane %v2818_v54, 5 }
 0x1e2   :  { %v2991_v49 = vpop.eup %2990  ;;  %v823_v50 = vmul.f32 0.17677669, %v2817_v45  ;;  %v1421_v51 = vrot.slane %v2817_v45, 6  ;;  %v2823_v45 = vadd.f32 -1.0, %v3451_v4 }
 0x1e3   :  { %v2993_v52 = vpop.eup %2992  ;;  %846 = vperm.xlu0 %2936, %v824_v57   ;;  %v794_v63 = vadd.f32 1.0, %v2991_v49 }
 0x1e4   :  { %v1422_v30 = vsel %vm1366_vm12, %v1421_v51, %v1420_v28  ;;  %841 = vperm.xlu1 %2935, %v823_v50   ;;  %v793_v5 = vadd.f32 1.0, %v2993_v52  ;;  %v3705_v52 = vadd.f32 %v3600_v62, %v3666_v22 }
 0x1e5   :  { %vm802_vm14 = vcmp.eq.f32.partialorder %v794_v63, 1.0  ;;  %v1424_v8 = vsel %vm1368_vm13, %v1423_v60, %v1422_v30  ;;  %v3707_v60 = vmul.f32 1e+30, %v2823_v45 }
 0x1e6   :  { %v810_v33 = vsel %vm802_vm14, 1.00001, %v794_v63  ;;  %vm801_vm15 = vcmp.eq.f32.partialorder %v793_v5, 1.0 }
 0x1e7   :  { %v2820_v14 = vadd.f32 -1.0, %v810_v33  ;;  %v809_v15 = vsel %vm801_vm15, 1.00001, %v793_v5  ;;  %v3711_v5 = vmax.f32 %v3683_v59, 0.0  ;;  %v1107_v62 = vrot.slane %v3707_v60, %v3446_v2 }
 0x1e8   :  { %v2819_v16 = vadd.f32 -1.0, %v809_v15  ;;  %v1118_v22 = vrot.slane %v3707_v60, %v3449_v3  ;;  %v1129_v59 = vrot.slane %v3707_v60, %v3458_v7  ;;  %v1140_v33 = vrot.slane %v3707_v60, %v3463_v9 }
 0x1e9   :  { %v826_v21 = vmul.f32 0.17677669, %v2820_v14  ;;  %v1427_v34 = vrot.slane %v2820_v14, 3  ;;  %v1151_v14 = vrot.slane %v3707_v60, %v3471_v13  ;;  %v1173_v15 = vrot.slane %v3707_v60, %v3483_v20 }
 0x1ea   :  { %v2995_v25 = vpop.eup %2994  ;;  %v825_v27 = vmul.f32 0.17677669, %v2819_v16  ;;  %v1425_v26 = vrot.slane %v2819_v16, 4 }
 0x1eb   :  { %v2997_v32 = vpop.eup %2996  ;;  %856 = vperm.xlu0 %2936, %v826_v21   ;;  %v796_v28 = vadd.f32 1.0, %v2995_v25 }
 0x1ec   :  { %851 = vperm.xlu1 %2935, %v825_v27   ;;  %v795_v35 = vadd.f32 1.0, %v2997_v32  ;;  %v1426_v37 = vsel %vm1370_vm0, %v1425_v26, %v1424_v8  ;;  %v740_v8 = vmax.f32 %v3705_v52, 0.0 }
 0x1ed   :  { %vm804_vm3 = vcmp.eq.f32.partialorder %v796_v28, 1.0  ;;  %v1428_v39 = vsel %vm1372_vm2, %v1427_v34, %v1426_v37 }
 0x1ee   :  { %v812_v53 = vsel %vm804_vm3, 1.00001, %v796_v28  ;;  %vm803_vm4 = vcmp.eq.f32.partialorder %v795_v35, 1.0 }
 0x1ef   :  { %v2822_v54 = vadd.f32 -1.0, %v812_v53  ;;  %v811_v6 = vsel %vm803_vm4, 1.00001, %v795_v35 }
 0x1f0   :  { %v2821_v57 = vadd.f32 -1.0, %v811_v6 }
 0x1f1   :  { %v828_v49 = vmul.f32 0.17677669, %v2822_v54  ;;  %v1431_v63 = vrot.slane %v2822_v54, 1 }
 0x1f2   :  { %v827_v50 = vmul.f32 0.17677669, %v2821_v57  ;;  %v1429_v51 = vrot.slane %v2821_v57, 2 }
 0x1f3   :  { %866 = vperm.xlu0 %2936, %v828_v49  }
 0x1f4   :  { %861 = vperm.xlu1 %2935, %v827_v50   ;;  %v1430_v30 = vsel %vm1374_vm5, %v1429_v51, %v1428_v39 }
 0x1f5   :  { %v3714_v4 = vsel %vm1376_vm6, %v1431_v63, %v1430_v30 }
 0x1f7   :  { %955 = vrot.lane.b32.xlu0 %v3711_v5, %s3326_s9 }
 0x1f8   :  { %953 = vrot.lane.b32.xlu1 %v740_v8, %s3326_s9  ;;  %2938 = vset.pattern.permute.xlu0 %v3331_v12 }
 0x1f9   :  { %2937 = vset.pattern.permute.xlu1 %v3331_v12  ;;  %v1162_v12 = vrot.slane %v3707_v60, %v3477_v18 }
 0x1fb   :  { %1109 = vbcast.lane.b32.xlu0 %v1107_v62, 256 }
 0x1fc   :  { %1113 = vbcast.lane.b32.xlu1 %v1107_v62, 264 }
 0x1ff   :  { %1124 = vbcast.lane.b32.xlu0 %v1118_v22, 264 }
 0x200   :  { %1120 = vbcast.lane.b32.xlu1 %v1118_v22, 256 }
 0x203   :  { %1135 = vbcast.lane.b32.xlu0 %v1129_v59, 264 }
 0x204   :  { %1131 = vbcast.lane.b32.xlu1 %v1129_v59, 256 }
 0x207   :  { %1146 = vbcast.lane.b32.xlu0 %v1140_v33, 264 }
 0x208   :  { %1142 = vbcast.lane.b32.xlu1 %v1140_v33, 256 }
 0x20b   :  { %1157 = vbcast.lane.b32.xlu0 %v1151_v14, 264 }
 0x20c   :  { %1153 = vbcast.lane.b32.xlu1 %v1151_v14, 256 }
 0x20f   :  { %1168 = vbcast.lane.b32.xlu0 %v1162_v12, 264 }
 0x210   :  { %1164 = vbcast.lane.b32.xlu1 %v1162_v12, 256 }
 0x213   :  { %1179 = vbcast.lane.b32.xlu0 %v1173_v15, 264 }
 0x214   :  { %1175 = vbcast.lane.b32.xlu1 %v1173_v15, 256 }
 0x22b   :  { %v930_v16 = vpop.permute.xlu1 %929 }
 0x22d   :  { %v932_v21 = vpop.permute.xlu0 %931 }
 0x22f   :  { %v926_v25 = vpop.permute.xlu1 %925 }
 0x231   :  { %v928_v27 = vpop.permute.xlu0 %927 }
 0x233   :  { %v938_v26 = vpop.permute.xlu1 %937 }
 0x235   :  { %v940_v32 = vpop.permute.xlu0 %939 }
 0x237   :  { %v934_v34 = vpop.permute.xlu1 %933 }
 0x239   :  { %v936_v28 = vpop.permute.xlu0 %935 }
 0x23b   :  { %v946_v35 = vpop.permute.xlu1 %945 }
 0x23d   :  { %v948_v37 = vpop.permute.xlu0 %947 }
 0x23f   :  { %v942_v39 = vpop.permute.xlu1 %941 }
 0x241   :  { %v944_v53 = vpop.permute.xlu0 %943 }
 0x244   :  { %v950_v54 = vpop.permute.xlu1 %949 }
 0x246   :  { %v952_v6 = vpop.permute.xlu0 %951 }
 0x25a   :  { %v837_v45 = vpop.permute.xlu1 %836 }
 0x25b   :  { %v870_v57 = vmul.f32 %v837_v45, %v3614_v23  ;;  %v832_v49 = vpop.permute.xlu0 %831 }
 0x25c   :  { %v869_v50 = vmul.f32 %v832_v49, %v3622_v36 }
 0x25d   :  { %v884_v51 = vrot.slane %v870_v57, %v3446_v2 }
 0x25e   :  { %v880_v63 = vrot.slane %v869_v50, %v3446_v2 }
 0x25f   :  { %v976_v30 = vmul.f32 %v932_v21, %v884_v51  ;;  %v975_v62 = vmul.f32 %v930_v16, %v884_v51 }
 0x260   :  { %v974_v14 = vmul.f32 %v928_v27, %v880_v63  ;;  %v973_v12 = vmul.f32 %v926_v25, %v880_v63 }
 0x261   :  { %1011 = vrot.lane.b32.xlu0 %v976_v30, %s3326_s9  ;;  %1009 = vrot.lane.b32.xlu1 %v975_v62, %s3326_s9 }
 0x262   :  { %v847_v22 = vpop.permute.xlu0 %846 }
 0x263   :  { %v872_v59 = vmul.f32 %v847_v22, %v3638_v43  ;;  %v842_v33 = vpop.permute.xlu1 %841 }
 0x264   :  { %v871_v15 = vmul.f32 %v842_v33, %v3646_v61 }
 0x265   :  { %v892_v45 = vrot.slane %v872_v59, %v3446_v2  ;;  %1007 = vrot.lane.b32.xlu0 %v974_v14, %s3326_s9  ;;  %1005 = vrot.lane.b32.xlu1 %v973_v12, %s3326_s9 }
 0x266   :  { %v888_v16 = vrot.slane %v871_v15, %v3446_v2 }
 0x267   :  { %v980_v21 = vmul.f32 %v940_v32, %v892_v45  ;;  %v979_v57 = vmul.f32 %v938_v26, %v892_v45 }
 0x268   :  { %v978_v50 = vmul.f32 %v936_v28, %v888_v16  ;;  %v977_v51 = vmul.f32 %v934_v34, %v888_v16 }
 0x269   :  { %1019 = vrot.lane.b32.xlu0 %v980_v21, %s3326_s9  ;;  %1017 = vrot.lane.b32.xlu1 %v979_v57, %s3326_s9 }
 0x26a   :  { %v857_v49 = vpop.permute.xlu0 %856 }
 0x26b   :  { %v874_v27 = vmul.f32 %v857_v49, %v3663_v56  ;;  %v852_v25 = vpop.permute.xlu1 %851 }
 0x26c   :  { %v873_v63 = vmul.f32 %v852_v25, %v3676_v58 }
 0x26d   :  { %v900_v30 = vrot.slane %v874_v27, %v3446_v2  ;;  %1015 = vrot.lane.b32.xlu0 %v978_v50, %s3326_s9  ;;  %1013 = vrot.lane.b32.xlu1 %v977_v51, %s3326_s9 }
 0x26e   :  { %v896_v26 = vrot.slane %v873_v63, %v3446_v2 }
 0x26f   :  { %v984_v32 = vmul.f32 %v948_v37, %v900_v30  ;;  %v983_v62 = vmul.f32 %v946_v35, %v900_v30 }
 0x270   :  { %v982_v59 = vmul.f32 %v944_v53, %v896_v26  ;;  %v981_v33 = vmul.f32 %v942_v39, %v896_v26 }
 0x271   :  { %1027 = vrot.lane.b32.xlu0 %v984_v32, %s3326_s9  ;;  %1025 = vrot.lane.b32.xlu1 %v983_v62, %s3326_s9 }
 0x272   :  { %v867_v22 = vpop.permute.xlu0 %866 }
 0x273   :  { %v876_v28 = vmul.f32 %v867_v22, %v3711_v5  ;;  %v862_v34 = vpop.permute.xlu1 %861 }
 0x274   :  { %v875_v14 = vmul.f32 %v862_v34, %v3693_v46 }
 0x275   :  { %1023 = vrot.lane.b32.xlu0 %v982_v59, %s3326_s9  ;;  %1021 = vrot.lane.b32.xlu1 %v981_v33, %s3326_s9  ;;  %v908_v12 = vrot.slane %v876_v28, %v3446_v2 }
 0x276   :  { %v956_v37 = vpop.permute.xlu0 %955  ;;  %v904_v35 = vrot.slane %v875_v14, %v3446_v2 }
 0x277   :  { %v988_v15 = vmul.f32 %v956_v37, %v908_v12  ;;  %v954_v45 = vpop.permute.xlu1 %953 }
 0x278   :  { %v987_v16 = vmul.f32 %v954_v45, %v908_v12  ;;  %v986_v53 = vmul.f32 %v952_v6, %v904_v35  ;;  %v985_v39 = vmul.f32 %v950_v54, %v904_v35 }
 0x279   :  { %1035 = vrot.lane.b32.xlu0 %v988_v15, %s3326_s9 }
 0x27a   :  { %1033 = vrot.lane.b32.xlu1 %v987_v16, %s3326_s9  ;;  %v3770_v21 = vpop.permute.xlu0 %1109 }
 0x27b   :  { %v3772_v57 = vpop.permute.xlu1 %1113 }
 0x27d   :  { %1031 = vrot.lane.b32.xlu0 %v986_v53, %s3326_s9 }
 0x27e   :  { %1029 = vrot.lane.b32.xlu1 %v985_v39, %s3326_s9  ;;  %v3774_v49 = vpop.permute.xlu0 %1124  ;;  %s3334_s9 = smov 96  }
 0x27f   :  { %v3776_v27 = vpop.permute.xlu1 %1120 }
 0x282   :  { %v3778_v25 = vpop.permute.xlu0 %1135 }
 0x283   :  { %v3780_v50 = vpop.permute.xlu1 %1131 }
 0x286   :  { %v3782_v51 = vpop.permute.xlu0 %1146 }
 0x287   :  { %v3784_v6 = vpop.permute.xlu1 %1142 }
 0x28a   :  { %v3786_v54 = vpop.permute.xlu0 %1157 }
 0x28b   :  { %v3788_v63 = vpop.permute.xlu1 %1153 }
 0x28e   :  { %v3790_v30 = vpop.permute.xlu0 %1168 }
 0x28f   :  { %v3792_v26 = vpop.permute.xlu1 %1164 }
 0x292   :  { %v3794_v32 = vpop.permute.xlu0 %1179 }
 0x293   :  { %v3796_v62 = vpop.permute.xlu1 %1175 }
 0x2d3   :  { %v1012_v22 = vpop.permute.xlu0 %1011  ;;  %v1010_v28 = vpop.permute.xlu1 %1009 }
 0x2d4   :  { %v1062_v34 = vsel %vm233_vm1, %v1012_v22, 0.0  ;;  %v1059_v59 = vsel %vm233_vm1, %v1010_v28, 0.0 }
 0x2d5   :  { %1063 = vadd.xlane.f32.xlu1 %v1062_v34  ;;  %1060 = vadd.xlane.f32.xlu0 %v1059_v59 }
 0x2d7   :  { %v1008_v33 = vpop.permute.xlu0 %1007  ;;  %v1006_v14 = vpop.permute.xlu1 %1005 }
 0x2d8   :  { %v1056_v12 = vsel %vm233_vm1, %v1008_v33, 0.0  ;;  %v1053_v37 = vsel %vm233_vm1, %v1006_v14, 0.0 }
 0x2d9   :  { %1057 = vadd.xlane.f32.xlu0 %v1056_v12  ;;  %1054 = vadd.xlane.f32.xlu1 %v1053_v37 }
 0x2db   :  { %v1020_v35 = vpop.permute.xlu0 %1019  ;;  %v1018_v15 = vpop.permute.xlu1 %1017 }
 0x2dc   :  { %v1074_v45 = vsel %vm233_vm1, %v1020_v35, 0.0  ;;  %v1071_v16 = vsel %vm233_vm1, %v1018_v15, 0.0 }
 0x2dd   :  { %1075 = vadd.xlane.f32.xlu1 %v1074_v45  ;;  %1072 = vadd.xlane.f32.xlu0 %v1071_v16 }
 0x2df   :  { %v1016_v53 = vpop.permute.xlu0 %1015  ;;  %v1014_v39 = vpop.permute.xlu1 %1013 }
 0x2e0   :  { %v1068_v22 = vsel %vm233_vm1, %v1016_v53, 0.0  ;;  %v1065_v28 = vsel %vm233_vm1, %v1014_v39, 0.0 }
 0x2e1   :  { %1069 = vadd.xlane.f32.xlu1 %v1068_v22  ;;  %1066 = vadd.xlane.f32.xlu0 %v1065_v28 }
 0x2e3   :  { %v1028_v34 = vpop.permute.xlu0 %1027  ;;  %v1026_v59 = vpop.permute.xlu1 %1025 }
 0x2e4   :  { %v1086_v33 = vsel %vm233_vm1, %v1028_v34, 0.0  ;;  %v1083_v14 = vsel %vm233_vm1, %v1026_v59, 0.0 }
 0x2e5   :  { %1087 = vadd.xlane.f32.xlu1 %v1086_v33  ;;  %1084 = vadd.xlane.f32.xlu0 %v1083_v14  ;;  %v1184_v33 = vrot.slane %v3707_v60, %v3489_v24 }
 0x2e7   :  { %v1024_v12 = vpop.permute.xlu0 %1023  ;;  %v1022_v37 = vpop.permute.xlu1 %1021 }
 0x2e8   :  { %v1080_v35 = vsel %vm233_vm1, %v1024_v12, 0.0  ;;  %v1077_v15 = vsel %vm233_vm1, %v1022_v37, 0.0 }
 0x2e9   :  { %1081 = vadd.xlane.f32.xlu1 %v1080_v35  ;;  %1078 = vadd.xlane.f32.xlu0 %v1077_v15 }
 0x2eb   :  { %v1036_v45 = vpop.permute.xlu0 %1035 }
 0x2ec   :  { %v1034_v16 = vpop.permute.xlu1 %1033  ;;  %v1098_v53 = vsel %vm233_vm1, %v1036_v45, 0.0 }
 0x2ed   :  { %1099 = vadd.xlane.f32.xlu1 %v1098_v53  ;;  %v1095_v39 = vsel %vm233_vm1, %v1034_v16, 0.0 }
 0x2ee   :  { %1096 = vadd.xlane.f32.xlu0 %v1095_v39 }
 0x2ef   :  { %v1032_v22 = vpop.permute.xlu0 %1031 }
 0x2f0   :  { %v1030_v28 = vpop.permute.xlu1 %1029  ;;  %v1092_v34 = vsel %vm233_vm1, %v1032_v22, 0.0 }
 0x2f1   :  { %1093 = vadd.xlane.f32.xlu1 %v1092_v34  ;;  %v1089_v59 = vsel %vm233_vm1, %v1030_v28, 0.0 }
 0x2f2   :  { %1090 = vadd.xlane.f32.xlu0 %v1089_v59 }
 0x302   :  { %1186 = vbcast.lane.b32.xlu1 %v1184_v33, 256 }
 0x308   :  { %1190 = vbcast.lane.b32.xlu0 %v1184_v33, 264 }
 0x362   :  { %v1061_v14 = vpop.xlane.xlu0 %1060  ;;  %v1064_v12 = vpop.xlane.xlu1 %1063 }
 0x363   :  { %v1210_v37 = vadd.f32 %v3776_v27, %v1061_v14  ;;  %v1211_v45 = vadd.f32 %v3774_v49, %v1064_v12 }
 0x365   :  { %1247 = vperm.xlu1 %2937, %v1210_v37  }
 0x366   :  { %v1058_v35 = vpop.xlane.xlu0 %1057  ;;  %v1055_v15 = vpop.xlane.xlu1 %1054 }
 0x367   :  { %v1209_v16 = vadd.f32 %v3772_v57, %v1058_v35  ;;  %v1208_v22 = vadd.f32 %v3770_v21, %v1055_v15 }
 0x369   :  { %1244 = vperm.xlu0 %2938, %v1209_v16   ;;  %1250 = vperm.xlu1 %2937, %v1211_v45  }
 0x36a   :  { %v1073_v53 = vpop.xlane.xlu0 %1072  ;;  %v1076_v39 = vpop.xlane.xlu1 %1075 }
 0x36b   :  { %v1214_v60 = vadd.f32 %v3784_v6, %v1073_v53  ;;  %v1215_v27 = vadd.f32 %v3782_v51, %v1076_v39 }
 0x36d   :  { %1259 = vperm.xlu0 %2938, %v1214_v60   ;;  %1241 = vperm.xlu1 %2937, %v1208_v22  }
 0x36e   :  { %v1067_v28 = vpop.xlane.xlu0 %1066  ;;  %v1070_v34 = vpop.xlane.xlu1 %1069 }
 0x36f   :  { %v1212_v59 = vadd.f32 %v3780_v50, %v1067_v28  ;;  %v1213_v33 = vadd.f32 %v3778_v25, %v1070_v34 }
 0x371   :  { %1253 = vperm.xlu0 %2938, %v1212_v59   ;;  %1262 = vperm.xlu1 %2937, %v1215_v27  }
 0x372   :  { %v1085_v49 = vpop.xlane.xlu0 %1084  ;;  %v1088_v57 = vpop.xlane.xlu1 %1087 }
 0x373   :  { %v1218_v14 = vadd.f32 %v3792_v26, %v1085_v49  ;;  %v1219_v12 = vadd.f32 %v3790_v30, %v1088_v57 }
 0x375   :  { %1271 = vperm.xlu0 %2938, %v1218_v14   ;;  %1256 = vperm.xlu1 %2937, %v1213_v33  }
 0x376   :  { %v1079_v21 = vpop.xlane.xlu0 %1078  ;;  %v1082_v6 = vpop.xlane.xlu1 %1081 }
 0x377   :  { %v1216_v37 = vadd.f32 %v3788_v63, %v1079_v21  ;;  %v1217_v50 = vadd.f32 %v3786_v54, %v1082_v6 }
 0x379   :  { %1265 = vperm.xlu0 %2938, %v1216_v37   ;;  %1274 = vperm.xlu1 %2937, %v1219_v12  }
 0x37a   :  { %v1100_v51 = vpop.xlane.xlu1 %1099 }
 0x37b   :  { %v1097_v35 = vpop.xlane.xlu0 %1096 }
 0x37d   :  { %1268 = vperm.xlu1 %2937, %v1217_v50  }
 0x37e   :  { %v1094_v15 = vpop.xlane.xlu1 %1093 }
 0x37f   :  { %v1221_v25 = vadd.f32 %v3794_v32, %v1094_v15  ;;  %v1091_v45 = vpop.xlane.xlu0 %1090  ;;  %v1289_v32 = vand.u32 127, %v129_v0 }
 0x380   :  { %v1220_v26 = vadd.f32 %v3796_v62, %v1091_v45 }
 0x381   :  { %1280 = vperm.xlu1 %2937, %v1221_v25   ;;  %v1294_v27 = vadd.s32 4294967288, %v1289_v32  ;;  %v1292_v49 = vsub.s32 %v1289_v32, %v3443_v1 }
 0x382   :  { %1277 = vperm.xlu0 %2938, %v1220_v26   ;;  %v1187_v16 = vpop.permute.xlu1 %1186 }
 0x383   :  { %v1222_v53 = vadd.f32 %v1187_v16, %v1097_v35  ;;  %v1191_v30 = vpop.permute.xlu0 %1190  ;;  %v1297_v57 = vsub.s32 %v1294_v27, %v3443_v1 }
 0x384   :  { %v1223_v39 = vadd.f32 %v1191_v30, %v1100_v51 }
 0x386   :  { %1286 = vperm.xlu1 %2937, %v1223_v39   ;;  %1283 = vperm.xlu0 %2938, %v1222_v53  }
 0x38a   :  { %1433 = vrot.lane.b32.xlu0 %v3714_v4, %s3333_s5 }
 0x3e4   :  { %v1248_v54 = vpop.permute.xlu1 %1247 }
 0x3e5   :  { %v1304_v51 = vrot.slane %v1248_v54, %v1292_v49 }
 0x3e8   :  { %v1245_v63 = vpop.permute.xlu0 %1244  ;;  %v1251_v22 = vpop.permute.xlu1 %1250 }
 0x3e9   :  { %v1298_v4 = vrot.slane %v1245_v63, %v1297_v57  ;;  %v1308_v12 = vrot.slane %v1251_v22, %v1297_v57 }
 0x3eb   :  { %v1309_v45 = vsel %vm1299_vm7, %v1308_v12, %v1304_v51 }
 0x3ec   :  { %v1260_v60 = vpop.permute.xlu0 %1259  ;;  %v1242_v28 = vpop.permute.xlu1 %1241 }
 0x3ed   :  { %v1293_v14 = vrot.slane %v1242_v28, %v1292_v49  ;;  %v1322_v53 = vrot.slane %v1260_v60, %v1292_v49 }
 0x3ef   :  { %v1300_v50 = vsel %vm1299_vm7, %v1298_v4, %v1293_v14 }
 0x3f0   :  { %v1254_v34 = vpop.permute.xlu0 %1253  ;;  %v1263_v62 = vpop.permute.xlu1 %1262  ;;  %v1365_v1 = vsel %vm1364_vm9, %v1309_v45, %v1300_v50 }
 0x3f1   :  { %v1313_v37 = vrot.slane %v1254_v34, %v1292_v49  ;;  %v1326_v26 = vrot.slane %v1263_v62, %v1297_v57 }
 0x3f3   :  { %v1327_v28 = vsel %vm1299_vm7, %v1326_v26, %v1322_v53 }
 0x3f4   :  { %v1257_v59 = vpop.permute.xlu1 %1256  ;;  %v1272_v33 = vpop.permute.xlu0 %1271 }
 0x3f5   :  { %v1317_v6 = vrot.slane %v1257_v59, %v1297_v57  ;;  %v1340_v59 = vrot.slane %v1272_v33, %v1292_v49 }
 0x3f7   :  { %v1318_v15 = vsel %vm1299_vm7, %v1317_v6, %v1313_v37 }
 0x3f8   :  { %v1275_v21 = vpop.permute.xlu1 %1274  ;;  %v1266_v0 = vpop.permute.xlu0 %1265  ;;  %v1367_v30 = vsel %vm1366_vm12, %v1318_v15, %v1365_v1 }
 0x3f9   :  { %v1331_v16 = vrot.slane %v1266_v0, %v1292_v49  ;;  %v1344_v32 = vrot.slane %v1275_v21, %v1297_v57  ;;  %v1369_v27 = vsel %vm1368_vm13, %v1327_v28, %v1367_v30 }
 0x3fb   :  { %v1345_v4 = vsel %vm1299_vm7, %v1344_v32, %v1340_v59 }
 0x3fc   :  { %v1269_v35 = vpop.permute.xlu1 %1268 }
 0x3fd   :  { %v1335_v25 = vrot.slane %v1269_v35, %v1297_v57 }
 0x3ff   :  { %v1336_v63 = vsel %vm1299_vm7, %v1335_v25, %v1331_v16 }
 0x400   :  { %v1281_v39 = vpop.permute.xlu1 %1280  ;;  %v1371_v62 = vsel %vm1370_vm0, %v1336_v63, %v1369_v27 }
 0x401   :  { %v1353_v54 = vrot.slane %v1281_v39, %v1297_v57  ;;  %v1278_v22 = vpop.permute.xlu0 %1277  ;;  %v1373_v51 = vsel %vm1372_vm2, %v1345_v4, %v1371_v62 }
 0x402   :  { %v1349_v34 = vrot.slane %v1278_v22, %v1292_v49 }
 0x404   :  { %v1354_v14 = vsel %vm1299_vm7, %v1353_v54, %v1349_v34 }
 0x405   :  { %v1284_v6 = vpop.permute.xlu0 %1283  ;;  %v1287_v60 = vpop.permute.xlu1 %1286  ;;  %v1375_v21 = vsel %vm1374_vm5, %v1354_v14, %v1373_v51 }
 0x406   :  { %v1358_v12 = vrot.slane %v1284_v6, %v1292_v49  ;;  %v1362_v37 = vrot.slane %v1287_v60, %v1297_v57 }
 0x408   :  { %v1363_v50 = vsel %vm1299_vm7, %v1362_v37, %v1358_v12 }
 0x409   :  { %v1434_v0 = vpop.permute.xlu0 %1433  ;;  %v1377_v35 = vsel %vm1376_vm6, %v1363_v50, %v1375_v21 }
 0x40a   :  { %1436 = vxpose.xlu0.b32.start.end [1/1] (short) (narrow) %v1434_v0, 8  ;;  %1379 = vxpose.xlu1.b32.start.end [1/1] (short) (narrow) %v1377_v35, 16 }
 0x48a   :  { %v3849_v33 = vpop.trf.xlu1  ;;  %v1452_v15 = vpop.trf.xlu0 }
 0x48b   :  { %v1481_v25 = vmul.f32 -2.7725887, %v1452_v15  ;;  %v1471_v49 = vsel %vm1470_vm8, %v3849_v33, -inf }
 0x48d   :  { %v1482_v45 = vmul.f32 1.442695, %v1481_v25 }
 0x48e   :  { %v3851_v26 = vpop.trf.xlu1 }
 0x48f   :  { %v1472_v57 = vsel %vm1470_vm8, %v3851_v26, -inf  ;;  %2998 = vpow2.f32 %v1482_v45 }
 0x490   :  { %v1473_v1 = vmax.f32 %v1471_v49, %v1472_v57  ;;  %3000 = vrcp.f32 %v1452_v15 }
 0x492   :  { %v1474_v16 = vrot.slane %v1473_v1, 4 }
 0x494   :  { %v1475_v53 = vmax.f32 %v1473_v1, %v1474_v16 }
 0x496   :  { %v1476_v30 = vrot.slane %v1475_v53, 2 }
 0x498   :  { %v1477_v39 = vmax.f32 %v1475_v53, %v1476_v30 }
 0x499   :  { %v2999_v54 = vpop.eup %2998 }
 0x49a   :  { %v1478_v63 = vrot.slane %v1477_v39, 1  ;;  %v3001_v25 = vpop.eup %3000 }
 0x49b   :  { %v3879_v57 = vrot.slane %v3001_v25, %v3446_v2 }
 0x49c   :  { %v1479_v22 = vmax.f32 %v1477_v39, %v1478_v63 }
 0x49e   :  { %v3857_v28 = vadd.f32 -1.0, %v1479_v22  ;;  %v1484_v32 = vsub.f32 %v1479_v22, %v2999_v54 }
 0x4a0   :  { %v1485_v34 = vsub.f32 %v3849_v33, %v3857_v28  ;;  %v1486_v27 = vsub.f32 %v3851_v26, %v3857_v28  ;;  %v1519_v59 = vsub.f32 %v1484_v32, %v3857_v28 }
 0x4a2   :  { %v1487_v62 = vmax.f32 %v1485_v34, 0.0  ;;  %v1488_v14 = vmax.f32 %v1486_v27, 0.0  ;;  %v3864_v6 = vmul.f32 0.5, %v1519_v59 }
 0x4a4   :  { %vm1489_vm10 = vcmp.gt.f32.partialorder %v1487_v62, 0.0  ;;  %vm1490_vm11 = vcmp.gt.f32.partialorder %v1488_v14, 0.0  ;;  %v3868_v60 = vadd.f32 %v3857_v28, %v3864_v6 }
 0x4a5   :  { %v1491_v4 = vsel %vm1489_vm10, %v1487_v62, 1.0  ;;  %v1492_v12 = vsel %vm1490_vm11, %v1488_v14, 1.0 }
 0x4a6   :  { %3002 = vlog2.f32 %v1491_v4  ;;  %v1525_v37 = vrot.slane %v3868_v60, %v3446_v2 }
 0x4a7   :  { %3004 = vlog2.f32 %v1492_v12 }
 0x4a8   :  { %v1526_v51 = vsub.f32 %v3849_v33, %v1525_v37  ;;  %v1527_v50 = vsub.f32 %v3851_v26, %v1525_v37 }
 0x4aa   :  { %v1528_v21 = vmax.f32 %v1526_v51, 0.0  ;;  %v1529_v0 = vmax.f32 %v1527_v50, 0.0 }
 0x4ac   :  { %vm1530_vm14 = vcmp.gt.f32.partialorder %v1528_v21, 0.0  ;;  %vm1531_vm15 = vcmp.gt.f32.partialorder %v1529_v0, 0.0 }
 0x4ad   :  { %v1532_v35 = vsel %vm1530_vm14, %v1528_v21, 1.0  ;;  %v1533_v15 = vsel %vm1531_vm15, %v1529_v0, 1.0 }
 0x4ae   :  { %3006 = vlog2.f32 %v1532_v35 }
 0x4af   :  { %3008 = vlog2.f32 %v1533_v15 }
 0x4b0   :  { %v3003_v45 = vpop.eup %3002 }
 0x4b1   :  { %v3005_v49 = vpop.eup %3004  ;;  %v1494_v1 = vmul.f32 0.6931472, %v3003_v45 }
 0x4b2   :  { %v1496_v16 = vmul.f32 0.6931472, %v3005_v49 }
 0x4b3   :  { %v1501_v53 = vmul.f32 %v3879_v57, %v1494_v1 }
 0x4b4   :  { %v1502_v30 = vmul.f32 %v3879_v57, %v1496_v16 }
 0x4b5   :  { %v1503_v39 = vmul.f32 1.442695, %v1501_v53 }
 0x4b6   :  { %v1505_v63 = vmul.f32 1.442695, %v1502_v30 }
 0x4b7   :  { %3010 = vpow2.f32 %v1503_v39 }
 0x4b8   :  { %v3007_v54 = vpop.eup %3006  ;;  %3012 = vpow2.f32 %v1505_v63 }
 0x4b9   :  { %v3009_v22 = vpop.eup %3008  ;;  %v1535_v32 = vmul.f32 0.6931472, %v3007_v54 }
 0x4ba   :  { %v1537_v34 = vmul.f32 0.6931472, %v3009_v22 }
 0x4bb   :  { %v1538_v27 = vmul.f32 %v1535_v32, %v3879_v57 }
 0x4bc   :  { %v1539_v59 = vmul.f32 %v1537_v34, %v3879_v57 }
 0x4bd   :  { %v1540_v4 = vmul.f32 1.442695, %v1538_v27 }
 0x4be   :  { %v1542_v12 = vmul.f32 1.442695, %v1539_v59 }
 0x4bf   :  { %3014 = vpow2.f32 %v1540_v4 }
 0x4c0   :  { %3016 = vpow2.f32 %v1542_v12 }
 0x4c1   :  { %v3011_v37 = vpop.eup %3010 }
 0x4c2   :  { %v3013_v51 = vpop.eup %3012  ;;  %v1507_v50 = vsel %vm1489_vm10, %v3011_v37, 0.0 }
 0x4c3   :  { %v1508_v35 = vsel %vm1490_vm11, %v3013_v51, 0.0  ;;  %v1509_v15 = vsel %vm1470_vm8, %v1507_v50, 0.0 }
 0x4c4   :  { %v1510_v25 = vsel %vm1470_vm8, %v1508_v35, 0.0  ;;  %v1559_v35 = vmul.f32 0.5, %v3864_v6 }
 0x4c5   :  { %v1511_v45 = vadd.f32 %v1510_v25, %v1509_v15 }
 0x4c7   :  { %v1512_v49 = vrot.slane %v1511_v45, 4 }
 0x4c9   :  { %v3015_v1 = vpop.eup %3014  ;;  %v1513_v16 = vadd.f32 %v1512_v49, %v1511_v45 }
 0x4ca   :  { %v3017_v53 = vpop.eup %3016  ;;  %v1544_v30 = vsel %vm1530_vm14, %v3015_v1, 0.0 }
 0x4cb   :  { %v1514_v39 = vrot.slane %v1513_v16, 2  ;;  %v1545_v63 = vsel %vm1531_vm15, %v3017_v53, 0.0  ;;  %v1546_v54 = vsel %vm1470_vm8, %v1544_v30, 0.0 }
 0x4cc   :  { %v1547_v62 = vsel %vm1470_vm8, %v1545_v63, 0.0 }
 0x4cd   :  { %v1548_v14 = vadd.f32 %v1547_v62, %v1546_v54  ;;  %v1515_v22 = vadd.f32 %v1514_v39, %v1513_v16 }
 0x4cf   :  { %v1549_v32 = vrot.slane %v1548_v14, 4  ;;  %v1516_v27 = vrot.slane %v1515_v22, 1 }
 0x4d1   :  { %v1550_v34 = vadd.f32 %v1549_v32, %v1548_v14  ;;  %v1517_v12 = vadd.f32 %v1516_v27, %v1515_v22 }
 0x4d3   :  { %v1551_v59 = vrot.slane %v1550_v34, 2  ;;  %v3893_v50 = vadd.f32 -1.0, %v1517_v12 }
 0x4d5   :  { %v1552_v4 = vadd.f32 %v1551_v59, %v1550_v34 }
 0x4d7   :  { %v1553_v37 = vrot.slane %v1552_v4, 1 }
 0x4d9   :  { %v1554_v51 = vadd.f32 %v1553_v37, %v1552_v4 }
 0x4db   :  { %v2826_v21 = vadd.f32 -1.0, %v1554_v51 }
 0x4dd   :  { %v1556_v0 = vmul.f32 %v2826_v21, %v3893_v50 }
 0x4df   :  { %vm1557_vm3 = vcmp.ge.f32.partialorder %v1556_v0, 0.0 }
 0x4e0   :  { %v1558_v15 = vsel %vm1557_vm3, %v3868_v60, %v3857_v28 }
 0x4e1   :  { %v1560_v25 = vadd.f32 %v1559_v35, %v1558_v15 }
 0x4e3   :  { %v1564_v45 = vrot.slane %v1560_v25, %v3446_v2 }
 0x4e5   :  { %v1565_v49 = vsub.f32 %v3849_v33, %v1564_v45  ;;  %v1566_v1 = vsub.f32 %v3851_v26, %v1564_v45 }
 0x4e7   :  { %v1567_v16 = vmax.f32 %v1565_v49, 0.0  ;;  %v1568_v53 = vmax.f32 %v1566_v1, 0.0 }
 0x4e9   :  { %vm1569_vm4 = vcmp.gt.f32.partialorder %v1567_v16, 0.0  ;;  %vm1570_vm7 = vcmp.gt.f32.partialorder %v1568_v53, 0.0 }
 0x4ea   :  { %v1571_v30 = vsel %vm1569_vm4, %v1567_v16, 1.0  ;;  %v1572_v39 = vsel %vm1570_vm7, %v1568_v53, 1.0 }
 0x4eb   :  { %3018 = vlog2.f32 %v1571_v30 }
 0x4ec   :  { %3020 = vlog2.f32 %v1572_v39 }
 0x4f5   :  { %v3019_v6 = vpop.eup %3018 }
 0x4f6   :  { %v3021_v63 = vpop.eup %3020  ;;  %v1574_v28 = vmul.f32 0.6931472, %v3019_v6  ;;  %v1598_v6 = vmul.f32 0.5, %v1559_v35 }
 0x4f7   :  { %v1576_v60 = vmul.f32 0.6931472, %v3021_v63 }
 0x4f8   :  { %v1577_v54 = vmul.f32 %v1574_v28, %v3879_v57 }
 0x4f9   :  { %v1578_v62 = vmul.f32 %v1576_v60, %v3879_v57 }
 0x4fa   :  { %v1579_v14 = vmul.f32 1.442695, %v1577_v54 }
 0x4fb   :  { %v1581_v22 = vmul.f32 1.442695, %v1578_v62 }
 0x4fc   :  { %3022 = vpow2.f32 %v1579_v14 }
 0x4fd   :  { %3024 = vpow2.f32 %v1581_v22 }
 0x506   :  { %v3023_v32 = vpop.eup %3022 }
 0x507   :  { %v3025_v34 = vpop.eup %3024  ;;  %v1583_v27 = vsel %vm1569_vm4, %v3023_v32, 0.0 }
 0x508   :  { %v1584_v59 = vsel %vm1570_vm7, %v3025_v34, 0.0  ;;  %v1585_v4 = vsel %vm1470_vm8, %v1583_v27, 0.0 }
 0x509   :  { %v1586_v12 = vsel %vm1470_vm8, %v1584_v59, 0.0 }
 0x50a   :  { %v1587_v37 = vadd.f32 %v1586_v12, %v1585_v4 }
 0x50c   :  { %v1588_v51 = vrot.slane %v1587_v37, 4 }
 0x50e   :  { %v1589_v21 = vadd.f32 %v1588_v51, %v1587_v37 }
 0x510   :  { %v1590_v0 = vrot.slane %v1589_v21, 2 }
 0x512   :  { %v1591_v45 = vadd.f32 %v1590_v0, %v1589_v21 }
 0x514   :  { %v1592_v49 = vrot.slane %v1591_v45, 1 }
 0x516   :  { %v1593_v1 = vadd.f32 %v1592_v49, %v1591_v45 }
 0x518   :  { %v2827_v30 = vadd.f32 -1.0, %v1593_v1 }
 0x51a   :  { %v1595_v39 = vmul.f32 %v2827_v30, %v3893_v50 }
 0x51c   :  { %vm1596_vm10 = vcmp.ge.f32.partialorder %v1595_v39, 0.0 }
 0x51d   :  { %v1597_v16 = vsel %vm1596_vm10, %v1560_v25, %v1558_v15 }
 0x51e   :  { %v1599_v63 = vadd.f32 %v1598_v6, %v1597_v16 }
 0x520   :  { %v1603_v53 = vrot.slane %v1599_v63, %v3446_v2 }
 0x522   :  { %v1604_v28 = vsub.f32 %v3849_v33, %v1603_v53  ;;  %v1605_v60 = vsub.f32 %v3851_v26, %v1603_v53 }
 0x524   :  { %v1606_v54 = vmax.f32 %v1604_v28, 0.0  ;;  %v1607_v62 = vmax.f32 %v1605_v60, 0.0 }
 0x526   :  { %vm1608_vm11 = vcmp.gt.f32.partialorder %v1606_v54, 0.0  ;;  %vm1609_vm14 = vcmp.gt.f32.partialorder %v1607_v62, 0.0 }
 0x527   :  { %v1610_v14 = vsel %vm1608_vm11, %v1606_v54, 1.0  ;;  %v1611_v22 = vsel %vm1609_vm14, %v1607_v62, 1.0 }
 0x528   :  { %3026 = vlog2.f32 %v1610_v14 }
 0x529   :  { %3028 = vlog2.f32 %v1611_v22 }
 0x532   :  { %v3027_v32 = vpop.eup %3026 }
 0x533   :  { %v3029_v35 = vpop.eup %3028  ;;  %v1613_v15 = vmul.f32 0.6931472, %v3027_v32  ;;  %v1637_v32 = vmul.f32 0.5, %v1598_v6 }
 0x534   :  { %v1615_v25 = vmul.f32 0.6931472, %v3029_v35 }
 0x535   :  { %v1616_v34 = vmul.f32 %v1613_v15, %v3879_v57 }
 0x536   :  { %v1617_v27 = vmul.f32 %v1615_v25, %v3879_v57 }
 0x537   :  { %v1618_v59 = vmul.f32 1.442695, %v1616_v34 }
 0x538   :  { %v1620_v4 = vmul.f32 1.442695, %v1617_v27 }
 0x539   :  { %3030 = vpow2.f32 %v1618_v59 }
 0x53a   :  { %3032 = vpow2.f32 %v1620_v4 }
 0x543   :  { %v3031_v12 = vpop.eup %3030 }
 0x544   :  { %v3033_v37 = vpop.eup %3032  ;;  %v1622_v51 = vsel %vm1608_vm11, %v3031_v12, 0.0 }
 0x545   :  { %v1623_v21 = vsel %vm1609_vm14, %v3033_v37, 0.0  ;;  %v1624_v0 = vsel %vm1470_vm8, %v1622_v51, 0.0 }
 0x546   :  { %v1625_v45 = vsel %vm1470_vm8, %v1623_v21, 0.0 }
 0x547   :  { %v1626_v49 = vadd.f32 %v1625_v45, %v1624_v0 }
 0x549   :  { %v1627_v1 = vrot.slane %v1626_v49, 4 }
 0x54b   :  { %v1628_v30 = vadd.f32 %v1627_v1, %v1626_v49 }
 0x54d   :  { %v1629_v39 = vrot.slane %v1628_v30, 2 }
 0x54f   :  { %v1630_v53 = vadd.f32 %v1629_v39, %v1628_v30 }
 0x551   :  { %v1631_v28 = vrot.slane %v1630_v53, 1 }
 0x553   :  { %v1632_v60 = vadd.f32 %v1631_v28, %v1630_v53 }
 0x555   :  { %v2828_v14 = vadd.f32 -1.0, %v1632_v60 }
 0x557   :  { %v1634_v22 = vmul.f32 %v2828_v14, %v3893_v50 }
 0x559   :  { %vm1635_vm15 = vcmp.ge.f32.partialorder %v1634_v22, 0.0 }
 0x55a   :  { %v1636_v54 = vsel %vm1635_vm15, %v1599_v63, %v1597_v16 }
 0x55b   :  { %v1638_v35 = vadd.f32 %v1637_v32, %v1636_v54 }
 0x55d   :  { %v1642_v62 = vrot.slane %v1638_v35, %v3446_v2 }
 0x55f   :  { %v1643_v15 = vsub.f32 %v3849_v33, %v1642_v62  ;;  %v1644_v25 = vsub.f32 %v3851_v26, %v1642_v62 }
 0x561   :  { %v1645_v34 = vmax.f32 %v1643_v15, 0.0  ;;  %v1646_v27 = vmax.f32 %v1644_v25, 0.0 }
 0x563   :  { %vm1647_vm3 = vcmp.gt.f32.partialorder %v1645_v34, 0.0  ;;  %vm1648_vm4 = vcmp.gt.f32.partialorder %v1646_v27, 0.0 }
 0x564   :  { %v1649_v59 = vsel %vm1647_vm3, %v1645_v34, 1.0  ;;  %v1650_v4 = vsel %vm1648_vm4, %v1646_v27, 1.0 }
 0x565   :  { %3034 = vlog2.f32 %v1649_v59 }
 0x566   :  { %3036 = vlog2.f32 %v1650_v4 }
 0x56f   :  { %v3035_v12 = vpop.eup %3034 }
 0x570   :  { %v3037_v6 = vpop.eup %3036  ;;  %v1652_v16 = vmul.f32 0.6931472, %v3035_v12  ;;  %v1676_v12 = vmul.f32 0.5, %v1637_v32 }
 0x571   :  { %v1654_v63 = vmul.f32 0.6931472, %v3037_v6 }
 0x572   :  { %v1655_v37 = vmul.f32 %v1652_v16, %v3879_v57 }
 0x573   :  { %v1656_v51 = vmul.f32 %v1654_v63, %v3879_v57 }
 0x574   :  { %v1657_v21 = vmul.f32 1.442695, %v1655_v37 }
 0x575   :  { %v1659_v0 = vmul.f32 1.442695, %v1656_v51 }
 0x576   :  { %3038 = vpow2.f32 %v1657_v21 }
 0x577   :  { %3040 = vpow2.f32 %v1659_v0 }
 0x580   :  { %v3039_v45 = vpop.eup %3038 }
 0x581   :  { %v3041_v49 = vpop.eup %3040  ;;  %v1661_v1 = vsel %vm1647_vm3, %v3039_v45, 0.0 }
 0x582   :  { %v1662_v30 = vsel %vm1648_vm4, %v3041_v49, 0.0  ;;  %v1663_v39 = vsel %vm1470_vm8, %v1661_v1, 0.0 }
 0x583   :  { %v1664_v53 = vsel %vm1470_vm8, %v1662_v30, 0.0 }
 0x584   :  { %v1665_v28 = vadd.f32 %v1664_v53, %v1663_v39 }
 0x586   :  { %v1666_v60 = vrot.slane %v1665_v28, 4 }
 0x588   :  { %v1667_v14 = vadd.f32 %v1666_v60, %v1665_v28 }
 0x58a   :  { %v1668_v22 = vrot.slane %v1667_v14, 2 }
 0x58c   :  { %v1669_v62 = vadd.f32 %v1668_v22, %v1667_v14 }
 0x58e   :  { %v1670_v15 = vrot.slane %v1669_v62, 1 }
 0x590   :  { %v1671_v25 = vadd.f32 %v1670_v15, %v1669_v62 }
 0x592   :  { %v2829_v59 = vadd.f32 -1.0, %v1671_v25 }
 0x594   :  { %v1673_v4 = vmul.f32 %v2829_v59, %v3893_v50 }
 0x596   :  { %vm1674_vm7 = vcmp.ge.f32.partialorder %v1673_v4, 0.0 }
 0x597   :  { %v1675_v34 = vsel %vm1674_vm7, %v1638_v35, %v1636_v54 }
 0x598   :  { %v1677_v6 = vadd.f32 %v1676_v12, %v1675_v34 }
 0x59a   :  { %v1681_v27 = vrot.slane %v1677_v6, %v3446_v2 }
 0x59c   :  { %v1682_v16 = vsub.f32 %v3849_v33, %v1681_v27  ;;  %v1683_v63 = vsub.f32 %v3851_v26, %v1681_v27 }
 0x59e   :  { %v1684_v37 = vmax.f32 %v1682_v16, 0.0  ;;  %v1685_v51 = vmax.f32 %v1683_v63, 0.0 }
 0x5a0   :  { %vm1686_vm10 = vcmp.gt.f32.partialorder %v1684_v37, 0.0  ;;  %vm1687_vm11 = vcmp.gt.f32.partialorder %v1685_v51, 0.0 }
 0x5a1   :  { %v1688_v21 = vsel %vm1686_vm10, %v1684_v37, 1.0  ;;  %v1689_v0 = vsel %vm1687_vm11, %v1685_v51, 1.0 }
 0x5a2   :  { %3042 = vlog2.f32 %v1688_v21 }
 0x5a3   :  { %3044 = vlog2.f32 %v1689_v0 }
 0x5ac   :  { %v3043_v45 = vpop.eup %3042 }
 0x5ad   :  { %v3045_v32 = vpop.eup %3044  ;;  %v1691_v54 = vmul.f32 0.6931472, %v3043_v45  ;;  %v1715_v45 = vmul.f32 0.5, %v1676_v12 }
 0x5ae   :  { %v1693_v35 = vmul.f32 0.6931472, %v3045_v32 }
 0x5af   :  { %v1694_v49 = vmul.f32 %v1691_v54, %v3879_v57 }
 0x5b0   :  { %v1695_v1 = vmul.f32 %v1693_v35, %v3879_v57 }
 0x5b1   :  { %v1696_v30 = vmul.f32 1.442695, %v1694_v49 }
 0x5b2   :  { %v1698_v39 = vmul.f32 1.442695, %v1695_v1 }
 0x5b3   :  { %3046 = vpow2.f32 %v1696_v30 }
 0x5b4   :  { %3048 = vpow2.f32 %v1698_v39 }
 0x5bd   :  { %v3047_v53 = vpop.eup %3046 }
 0x5be   :  { %v3049_v28 = vpop.eup %3048  ;;  %v1700_v60 = vsel %vm1686_vm10, %v3047_v53, 0.0 }
 0x5bf   :  { %v1701_v14 = vsel %vm1687_vm11, %v3049_v28, 0.0  ;;  %v1702_v22 = vsel %vm1470_vm8, %v1700_v60, 0.0 }
 0x5c0   :  { %v1703_v62 = vsel %vm1470_vm8, %v1701_v14, 0.0 }
 0x5c1   :  { %v1704_v15 = vadd.f32 %v1703_v62, %v1702_v22 }
 0x5c3   :  { %v1705_v25 = vrot.slane %v1704_v15, 4 }
 0x5c5   :  { %v1706_v59 = vadd.f32 %v1705_v25, %v1704_v15 }
 0x5c7   :  { %v1707_v4 = vrot.slane %v1706_v59, 2 }
 0x5c9   :  { %v1708_v27 = vadd.f32 %v1707_v4, %v1706_v59 }
 0x5cb   :  { %v1709_v16 = vrot.slane %v1708_v27, 1 }
 0x5cd   :  { %v1710_v63 = vadd.f32 %v1709_v16, %v1708_v27 }
 0x5cf   :  { %v2830_v21 = vadd.f32 -1.0, %v1710_v63 }
 0x5d1   :  { %v1712_v0 = vmul.f32 %v2830_v21, %v3893_v50 }
 0x5d3   :  { %vm1713_vm14 = vcmp.ge.f32.partialorder %v1712_v0, 0.0 }
 0x5d4   :  { %v1714_v37 = vsel %vm1713_vm14, %v1677_v6, %v1675_v34 }
 0x5d5   :  { %v1716_v32 = vadd.f32 %v1715_v45, %v1714_v37 }
 0x5d7   :  { %v1720_v51 = vrot.slane %v1716_v32, %v3446_v2 }
 0x5d9   :  { %v1721_v54 = vsub.f32 %v3849_v33, %v1720_v51  ;;  %v1722_v35 = vsub.f32 %v3851_v26, %v1720_v51 }
 0x5db   :  { %v1723_v49 = vmax.f32 %v1721_v54, 0.0  ;;  %v1724_v1 = vmax.f32 %v1722_v35, 0.0 }
 0x5dd   :  { %vm1725_vm15 = vcmp.gt.f32.partialorder %v1723_v49, 0.0  ;;  %vm1726_vm3 = vcmp.gt.f32.partialorder %v1724_v1, 0.0 }
 0x5de   :  { %v1727_v30 = vsel %vm1725_vm15, %v1723_v49, 1.0  ;;  %v1728_v39 = vsel %vm1726_vm3, %v1724_v1, 1.0 }
 0x5df   :  { %3050 = vlog2.f32 %v1727_v30 }
 0x5e0   :  { %3052 = vlog2.f32 %v1728_v39 }
 0x5e9   :  { %v3051_v53 = vpop.eup %3050 }
 0x5ea   :  { %v3053_v12 = vpop.eup %3052  ;;  %v1730_v34 = vmul.f32 0.6931472, %v3051_v53  ;;  %v1754_v53 = vmul.f32 0.5, %v1715_v45 }
 0x5eb   :  { %v1732_v6 = vmul.f32 0.6931472, %v3053_v12 }
 0x5ec   :  { %v1733_v28 = vmul.f32 %v1730_v34, %v3879_v57 }
 0x5ed   :  { %v1734_v60 = vmul.f32 %v1732_v6, %v3879_v57 }
 0x5ee   :  { %v1735_v14 = vmul.f32 1.442695, %v1733_v28 }
 0x5ef   :  { %v1737_v22 = vmul.f32 1.442695, %v1734_v60 }
 0x5f0   :  { %3054 = vpow2.f32 %v1735_v14 }
 0x5f1   :  { %3056 = vpow2.f32 %v1737_v22 }
 0x5fa   :  { %v3055_v62 = vpop.eup %3054 }
 0x5fb   :  { %v3057_v15 = vpop.eup %3056  ;;  %v1739_v25 = vsel %vm1725_vm15, %v3055_v62, 0.0 }
 0x5fc   :  { %v1740_v59 = vsel %vm1726_vm3, %v3057_v15, 0.0  ;;  %v1741_v4 = vsel %vm1470_vm8, %v1739_v25, 0.0 }
 0x5fd   :  { %v1742_v27 = vsel %vm1470_vm8, %v1740_v59, 0.0 }
 0x5fe   :  { %v1743_v16 = vadd.f32 %v1742_v27, %v1741_v4 }
 0x600   :  { %v1744_v63 = vrot.slane %v1743_v16, 4 }
 0x602   :  { %v1745_v21 = vadd.f32 %v1744_v63, %v1743_v16 }
 0x604   :  { %v1746_v0 = vrot.slane %v1745_v21, 2 }
 0x606   :  { %v1747_v51 = vadd.f32 %v1746_v0, %v1745_v21 }
 0x608   :  { %v1748_v54 = vrot.slane %v1747_v51, 1 }
 0x60a   :  { %v1749_v35 = vadd.f32 %v1748_v54, %v1747_v51 }
 0x60c   :  { %v2831_v30 = vadd.f32 -1.0, %v1749_v35 }
 0x60e   :  { %v1751_v39 = vmul.f32 %v2831_v30, %v3893_v50 }
 0x610   :  { %vm1752_vm4 = vcmp.ge.f32.partialorder %v1751_v39, 0.0 }
 0x611   :  { %v1753_v49 = vsel %vm1752_vm4, %v1716_v32, %v1714_v37 }
 0x612   :  { %v1755_v12 = vadd.f32 %v1754_v53, %v1753_v49 }
 0x614   :  { %v1759_v1 = vrot.slane %v1755_v12, %v3446_v2 }
 0x616   :  { %v1760_v34 = vsub.f32 %v3849_v33, %v1759_v1  ;;  %v1761_v6 = vsub.f32 %v3851_v26, %v1759_v1 }
 0x618   :  { %v1762_v28 = vmax.f32 %v1760_v34, 0.0  ;;  %v1763_v60 = vmax.f32 %v1761_v6, 0.0 }
 0x61a   :  { %vm1764_vm7 = vcmp.gt.f32.partialorder %v1762_v28, 0.0  ;;  %vm1765_vm10 = vcmp.gt.f32.partialorder %v1763_v60, 0.0 }
 0x61b   :  { %v1766_v14 = vsel %vm1764_vm7, %v1762_v28, 1.0  ;;  %v1767_v22 = vsel %vm1765_vm10, %v1763_v60, 1.0 }
 0x61c   :  { %3058 = vlog2.f32 %v1766_v14 }
 0x61d   :  { %3060 = vlog2.f32 %v1767_v22 }
 0x626   :  { %v3059_v62 = vpop.eup %3058 }
 0x627   :  { %v3061_v45 = vpop.eup %3060  ;;  %v1769_v37 = vmul.f32 0.6931472, %v3059_v62  ;;  %v1793_v62 = vmul.f32 0.5, %v1754_v53 }
 0x628   :  { %v1771_v32 = vmul.f32 0.6931472, %v3061_v45 }
 0x629   :  { %v1772_v15 = vmul.f32 %v1769_v37, %v3879_v57 }
 0x62a   :  { %v1773_v25 = vmul.f32 %v1771_v32, %v3879_v57 }
 0x62b   :  { %v1774_v59 = vmul.f32 1.442695, %v1772_v15 }
 0x62c   :  { %v1776_v4 = vmul.f32 1.442695, %v1773_v25 }
 0x62d   :  { %3062 = vpow2.f32 %v1774_v59 }
 0x62e   :  { %3064 = vpow2.f32 %v1776_v4 }
 0x637   :  { %v3063_v27 = vpop.eup %3062 }
 0x638   :  { %v3065_v16 = vpop.eup %3064  ;;  %v1778_v63 = vsel %vm1764_vm7, %v3063_v27, 0.0 }
 0x639   :  { %v1779_v21 = vsel %vm1765_vm10, %v3065_v16, 0.0  ;;  %v1780_v0 = vsel %vm1470_vm8, %v1778_v63, 0.0 }
 0x63a   :  { %v1781_v51 = vsel %vm1470_vm8, %v1779_v21, 0.0 }
 0x63b   :  { %v1782_v54 = vadd.f32 %v1781_v51, %v1780_v0 }
 0x63d   :  { %v1783_v35 = vrot.slane %v1782_v54, 4 }
 0x63f   :  { %v1784_v30 = vadd.f32 %v1783_v35, %v1782_v54 }
 0x641   :  { %v1785_v39 = vrot.slane %v1784_v30, 2 }
 0x643   :  { %v1786_v1 = vadd.f32 %v1785_v39, %v1784_v30 }
 0x645   :  { %v1787_v34 = vrot.slane %v1786_v1, 1 }
 0x647   :  { %v1788_v6 = vadd.f32 %v1787_v34, %v1786_v1 }
 0x649   :  { %v2832_v14 = vadd.f32 -1.0, %v1788_v6 }
 0x64b   :  { %v1790_v22 = vmul.f32 %v2832_v14, %v3893_v50 }
 0x64d   :  { %vm1791_vm11 = vcmp.ge.f32.partialorder %v1790_v22, 0.0 }
 0x64e   :  { %v1792_v28 = vsel %vm1791_vm11, %v1755_v12, %v1753_v49 }
 0x64f   :  { %v1794_v45 = vadd.f32 %v1793_v62, %v1792_v28 }
 0x651   :  { %v1798_v60 = vrot.slane %v1794_v45, %v3446_v2 }
 0x653   :  { %v1799_v37 = vsub.f32 %v3849_v33, %v1798_v60  ;;  %v1800_v32 = vsub.f32 %v3851_v26, %v1798_v60 }
 0x655   :  { %v1801_v15 = vmax.f32 %v1799_v37, 0.0  ;;  %v1802_v25 = vmax.f32 %v1800_v32, 0.0 }
 0x657   :  { %vm1803_vm14 = vcmp.gt.f32.partialorder %v1801_v15, 0.0  ;;  %vm1804_vm15 = vcmp.gt.f32.partialorder %v1802_v25, 0.0 }
 0x658   :  { %v1805_v59 = vsel %vm1803_vm14, %v1801_v15, 1.0  ;;  %v1806_v4 = vsel %vm1804_vm15, %v1802_v25, 1.0 }
 0x659   :  { %3066 = vlog2.f32 %v1805_v59 }
 0x65a   :  { %3068 = vlog2.f32 %v1806_v4 }
 0x663   :  { %v3067_v27 = vpop.eup %3066 }
 0x664   :  { %v3069_v53 = vpop.eup %3068  ;;  %v1808_v49 = vmul.f32 0.6931472, %v3067_v27  ;;  %v1832_v27 = vmul.f32 0.5, %v1793_v62 }
 0x665   :  { %v1810_v12 = vmul.f32 0.6931472, %v3069_v53 }
 0x666   :  { %v1811_v16 = vmul.f32 %v1808_v49, %v3879_v57 }
 0x667   :  { %v1812_v63 = vmul.f32 %v1810_v12, %v3879_v57 }
 0x668   :  { %v1813_v21 = vmul.f32 1.442695, %v1811_v16 }
 0x669   :  { %v1815_v0 = vmul.f32 1.442695, %v1812_v63 }
 0x66a   :  { %3070 = vpow2.f32 %v1813_v21 }
 0x66b   :  { %3072 = vpow2.f32 %v1815_v0 }
 0x674   :  { %v3071_v51 = vpop.eup %3070 }
 0x675   :  { %v3073_v54 = vpop.eup %3072  ;;  %v1817_v35 = vsel %vm1803_vm14, %v3071_v51, 0.0 }
 0x676   :  { %v1818_v30 = vsel %vm1804_vm15, %v3073_v54, 0.0  ;;  %v1819_v39 = vsel %vm1470_vm8, %v1817_v35, 0.0 }
 0x677   :  { %v1820_v1 = vsel %vm1470_vm8, %v1818_v30, 0.0 }
 0x678   :  { %v1821_v34 = vadd.f32 %v1820_v1, %v1819_v39 }
 0x67a   :  { %v1822_v6 = vrot.slane %v1821_v34, 4 }
 0x67c   :  { %v1823_v14 = vadd.f32 %v1822_v6, %v1821_v34 }
 0x67e   :  { %v1824_v22 = vrot.slane %v1823_v14, 2 }
 0x680   :  { %v1825_v60 = vadd.f32 %v1824_v22, %v1823_v14 }
 0x682   :  { %v1826_v37 = vrot.slane %v1825_v60, 1 }
 0x684   :  { %v1827_v32 = vadd.f32 %v1826_v37, %v1825_v60 }
 0x686   :  { %v2833_v59 = vadd.f32 -1.0, %v1827_v32 }
 0x688   :  { %v1829_v4 = vmul.f32 %v2833_v59, %v3893_v50 }
 0x68a   :  { %vm1830_vm3 = vcmp.ge.f32.partialorder %v1829_v4, 0.0 }
 0x68b   :  { %v1831_v15 = vsel %vm1830_vm3, %v1794_v45, %v1792_v28 }
 0x68c   :  { %v1833_v53 = vadd.f32 %v1832_v27, %v1831_v15 }
 0x68e   :  { %v1837_v25 = vrot.slane %v1833_v53, %v3446_v2 }
 0x690   :  { %v1838_v49 = vsub.f32 %v3849_v33, %v1837_v25  ;;  %v1839_v12 = vsub.f32 %v3851_v26, %v1837_v25 }
 0x692   :  { %v1840_v16 = vmax.f32 %v1838_v49, 0.0  ;;  %v1841_v63 = vmax.f32 %v1839_v12, 0.0 }
 0x694   :  { %vm1842_vm4 = vcmp.gt.f32.partialorder %v1840_v16, 0.0  ;;  %vm1843_vm7 = vcmp.gt.f32.partialorder %v1841_v63, 0.0 }
 0x695   :  { %v1844_v21 = vsel %vm1842_vm4, %v1840_v16, 1.0  ;;  %v1845_v0 = vsel %vm1843_vm7, %v1841_v63, 1.0 }
 0x696   :  { %3074 = vlog2.f32 %v1844_v21 }
 0x697   :  { %3076 = vlog2.f32 %v1845_v0 }
 0x6a0   :  { %v3075_v51 = vpop.eup %3074 }
 0x6a1   :  { %v3077_v62 = vpop.eup %3076  ;;  %v1847_v28 = vmul.f32 0.6931472, %v3075_v51  ;;  %v1871_v51 = vmul.f32 0.5, %v1832_v27 }
 0x6a2   :  { %v1849_v45 = vmul.f32 0.6931472, %v3077_v62 }
 0x6a3   :  { %v1850_v54 = vmul.f32 %v1847_v28, %v3879_v57 }
 0x6a4   :  { %v1851_v35 = vmul.f32 %v1849_v45, %v3879_v57 }
 0x6a5   :  { %v1852_v30 = vmul.f32 1.442695, %v1850_v54 }
 0x6a6   :  { %v1854_v39 = vmul.f32 1.442695, %v1851_v35 }
 0x6a7   :  { %3078 = vpow2.f32 %v1852_v30 }
 0x6a8   :  { %3080 = vpow2.f32 %v1854_v39 }
 0x6b1   :  { %v3079_v1 = vpop.eup %3078 }
 0x6b2   :  { %v3081_v34 = vpop.eup %3080  ;;  %v1856_v6 = vsel %vm1842_vm4, %v3079_v1, 0.0 }
 0x6b3   :  { %v1857_v14 = vsel %vm1843_vm7, %v3081_v34, 0.0  ;;  %v1858_v22 = vsel %vm1470_vm8, %v1856_v6, 0.0 }
 0x6b4   :  { %v1859_v60 = vsel %vm1470_vm8, %v1857_v14, 0.0 }
 0x6b5   :  { %v1860_v37 = vadd.f32 %v1859_v60, %v1858_v22 }
 0x6b7   :  { %v1861_v32 = vrot.slane %v1860_v37, 4 }
 0x6b9   :  { %v1862_v59 = vadd.f32 %v1861_v32, %v1860_v37 }
 0x6bb   :  { %v1863_v4 = vrot.slane %v1862_v59, 2 }
 0x6bd   :  { %v1864_v25 = vadd.f32 %v1863_v4, %v1862_v59 }
 0x6bf   :  { %v1865_v49 = vrot.slane %v1864_v25, 1 }
 0x6c1   :  { %v1866_v12 = vadd.f32 %v1865_v49, %v1864_v25 }
 0x6c3   :  { %v2834_v21 = vadd.f32 -1.0, %v1866_v12 }
 0x6c5   :  { %v1868_v0 = vmul.f32 %v2834_v21, %v3893_v50 }
 0x6c7   :  { %vm1869_vm10 = vcmp.ge.f32.partialorder %v1868_v0, 0.0 }
 0x6c8   :  { %v1870_v16 = vsel %vm1869_vm10, %v1833_v53, %v1831_v15 }
 0x6c9   :  { %v1872_v62 = vadd.f32 %v1871_v51, %v1870_v16 }
 0x6cb   :  { %v1876_v63 = vrot.slane %v1872_v62, %v3446_v2 }
 0x6cd   :  { %v1877_v28 = vsub.f32 %v3849_v33, %v1876_v63  ;;  %v1878_v45 = vsub.f32 %v3851_v26, %v1876_v63 }
 0x6cf   :  { %v1879_v54 = vmax.f32 %v1877_v28, 0.0  ;;  %v1880_v35 = vmax.f32 %v1878_v45, 0.0 }
 0x6d1   :  { %vm1881_vm11 = vcmp.gt.f32.partialorder %v1879_v54, 0.0  ;;  %vm1882_vm14 = vcmp.gt.f32.partialorder %v1880_v35, 0.0 }
 0x6d2   :  { %v1883_v30 = vsel %vm1881_vm11, %v1879_v54, 1.0  ;;  %v1884_v39 = vsel %vm1882_vm14, %v1880_v35, 1.0 }
 0x6d3   :  { %3082 = vlog2.f32 %v1883_v30 }
 0x6d4   :  { %3084 = vlog2.f32 %v1884_v39 }
 0x6dd   :  { %v3083_v1 = vpop.eup %3082 }
 0x6de   :  { %v3085_v27 = vpop.eup %3084  ;;  %v1886_v15 = vmul.f32 0.6931472, %v3083_v1  ;;  %v1910_v1 = vmul.f32 0.5, %v1871_v51 }
 0x6df   :  { %v1888_v53 = vmul.f32 0.6931472, %v3085_v27 }
 0x6e0   :  { %v1889_v34 = vmul.f32 %v1886_v15, %v3879_v57 }
 0x6e1   :  { %v1890_v6 = vmul.f32 %v1888_v53, %v3879_v57 }
 0x6e2   :  { %v1891_v14 = vmul.f32 1.442695, %v1889_v34 }
 0x6e3   :  { %v1893_v22 = vmul.f32 1.442695, %v1890_v6 }
 0x6e4   :  { %3086 = vpow2.f32 %v1891_v14 }
 0x6e5   :  { %3088 = vpow2.f32 %v1893_v22 }
 0x6ee   :  { %v3087_v60 = vpop.eup %3086 }
 0x6ef   :  { %v3089_v37 = vpop.eup %3088  ;;  %v1895_v32 = vsel %vm1881_vm11, %v3087_v60, 0.0 }
 0x6f0   :  { %v1896_v59 = vsel %vm1882_vm14, %v3089_v37, 0.0  ;;  %v1897_v4 = vsel %vm1470_vm8, %v1895_v32, 0.0 }
 0x6f1   :  { %v1898_v25 = vsel %vm1470_vm8, %v1896_v59, 0.0 }
 0x6f2   :  { %v1899_v49 = vadd.f32 %v1898_v25, %v1897_v4 }
 0x6f4   :  { %v1900_v12 = vrot.slane %v1899_v49, 4 }
 0x6f6   :  { %v1901_v21 = vadd.f32 %v1900_v12, %v1899_v49 }
 0x6f8   :  { %v1902_v0 = vrot.slane %v1901_v21, 2 }
 0x6fa   :  { %v1903_v63 = vadd.f32 %v1902_v0, %v1901_v21 }
 0x6fc   :  { %v1904_v28 = vrot.slane %v1903_v63, 1 }
 0x6fe   :  { %v1905_v45 = vadd.f32 %v1904_v28, %v1903_v63 }
 0x700   :  { %v2835_v30 = vadd.f32 -1.0, %v1905_v45 }
 0x702   :  { %v1907_v39 = vmul.f32 %v2835_v30, %v3893_v50 }
 0x704   :  { %vm1908_vm15 = vcmp.ge.f32.partialorder %v1907_v39, 0.0 }
 0x705   :  { %v1909_v54 = vsel %vm1908_vm15, %v1872_v62, %v1870_v16 }
 0x706   :  { %v1911_v27 = vadd.f32 %v1910_v1, %v1909_v54 }
 0x708   :  { %v1915_v35 = vrot.slane %v1911_v27, %v3446_v2 }
 0x70a   :  { %v1916_v15 = vsub.f32 %v3849_v33, %v1915_v35  ;;  %v1917_v53 = vsub.f32 %v3851_v26, %v1915_v35 }
 0x70c   :  { %v1918_v34 = vmax.f32 %v1916_v15, 0.0  ;;  %v1919_v6 = vmax.f32 %v1917_v53, 0.0 }
 0x70e   :  { %vm1920_vm3 = vcmp.gt.f32.partialorder %v1918_v34, 0.0  ;;  %vm1921_vm4 = vcmp.gt.f32.partialorder %v1919_v6, 0.0 }
 0x70f   :  { %v1922_v14 = vsel %vm1920_vm3, %v1918_v34, 1.0  ;;  %v1923_v22 = vsel %vm1921_vm4, %v1919_v6, 1.0 }
 0x710   :  { %3090 = vlog2.f32 %v1922_v14 }
 0x711   :  { %3092 = vlog2.f32 %v1923_v22 }
 0x71a   :  { %v3091_v60 = vpop.eup %3090 }
 0x71b   :  { %v3093_v51 = vpop.eup %3092  ;;  %v1925_v16 = vmul.f32 0.6931472, %v3091_v60  ;;  %v1949_v60 = vmul.f32 0.5, %v1910_v1 }
 0x71c   :  { %v1927_v62 = vmul.f32 0.6931472, %v3093_v51 }
 0x71d   :  { %v1928_v37 = vmul.f32 %v1925_v16, %v3879_v57 }
 0x71e   :  { %v1929_v32 = vmul.f32 %v1927_v62, %v3879_v57 }
 0x71f   :  { %v1930_v59 = vmul.f32 1.442695, %v1928_v37 }
 0x720   :  { %v1932_v4 = vmul.f32 1.442695, %v1929_v32 }
 0x721   :  { %3094 = vpow2.f32 %v1930_v59 }
 0x722   :  { %3096 = vpow2.f32 %v1932_v4 }
 0x72b   :  { %v3095_v25 = vpop.eup %3094 }
 0x72c   :  { %v3097_v49 = vpop.eup %3096  ;;  %v1934_v12 = vsel %vm1920_vm3, %v3095_v25, 0.0 }
 0x72d   :  { %v1935_v21 = vsel %vm1921_vm4, %v3097_v49, 0.0  ;;  %v1936_v0 = vsel %vm1470_vm8, %v1934_v12, 0.0 }
 0x72e   :  { %v1937_v63 = vsel %vm1470_vm8, %v1935_v21, 0.0 }
 0x72f   :  { %v1938_v28 = vadd.f32 %v1937_v63, %v1936_v0 }
 0x731   :  { %v1939_v45 = vrot.slane %v1938_v28, 4 }
 0x733   :  { %v1940_v30 = vadd.f32 %v1939_v45, %v1938_v28 }
 0x735   :  { %v1941_v39 = vrot.slane %v1940_v30, 2 }
 0x737   :  { %v1942_v35 = vadd.f32 %v1941_v39, %v1940_v30 }
 0x739   :  { %v1943_v15 = vrot.slane %v1942_v35, 1 }
 0x73b   :  { %v1944_v53 = vadd.f32 %v1943_v15, %v1942_v35 }
 0x73d   :  { %v2836_v14 = vadd.f32 -1.0, %v1944_v53 }
 0x73f   :  { %v1946_v22 = vmul.f32 %v2836_v14, %v3893_v50 }
 0x741   :  { %vm1947_vm7 = vcmp.ge.f32.partialorder %v1946_v22, 0.0 }
 0x742   :  { %v1948_v34 = vsel %vm1947_vm7, %v1911_v27, %v1909_v54 }
 0x743   :  { %v1950_v51 = vadd.f32 %v1949_v60, %v1948_v34 }
 0x745   :  { %v1954_v6 = vrot.slane %v1950_v51, %v3446_v2 }
 0x747   :  { %v1955_v16 = vsub.f32 %v3849_v33, %v1954_v6  ;;  %v1956_v62 = vsub.f32 %v3851_v26, %v1954_v6 }
 0x749   :  { %v1957_v37 = vmax.f32 %v1955_v16, 0.0  ;;  %v1958_v32 = vmax.f32 %v1956_v62, 0.0 }
 0x74b   :  { %vm1959_vm10 = vcmp.gt.f32.partialorder %v1957_v37, 0.0  ;;  %vm1960_vm11 = vcmp.gt.f32.partialorder %v1958_v32, 0.0 }
 0x74c   :  { %v1961_v59 = vsel %vm1959_vm10, %v1957_v37, 1.0  ;;  %v1962_v4 = vsel %vm1960_vm11, %v1958_v32, 1.0 }
 0x74d   :  { %3098 = vlog2.f32 %v1961_v59 }
 0x74e   :  { %3100 = vlog2.f32 %v1962_v4 }
 0x757   :  { %v3099_v25 = vpop.eup %3098 }
 0x758   :  { %v3101_v1 = vpop.eup %3100  ;;  %v1964_v54 = vmul.f32 0.6931472, %v3099_v25  ;;  %v1988_v25 = vmul.f32 0.5, %v1949_v60 }
 0x759   :  { %v1966_v27 = vmul.f32 0.6931472, %v3101_v1 }
 0x75a   :  { %v1967_v49 = vmul.f32 %v1964_v54, %v3879_v57 }
 0x75b   :  { %v1968_v12 = vmul.f32 %v1966_v27, %v3879_v57 }
 0x75c   :  { %v1969_v21 = vmul.f32 1.442695, %v1967_v49 }
 0x75d   :  { %v1971_v0 = vmul.f32 1.442695, %v1968_v12 }
 0x75e   :  { %3102 = vpow2.f32 %v1969_v21 }
 0x75f   :  { %3104 = vpow2.f32 %v1971_v0 }
 0x768   :  { %v3103_v63 = vpop.eup %3102 }
 0x769   :  { %v3105_v28 = vpop.eup %3104  ;;  %v1973_v45 = vsel %vm1959_vm10, %v3103_v63, 0.0 }
 0x76a   :  { %v1974_v30 = vsel %vm1960_vm11, %v3105_v28, 0.0  ;;  %v1975_v39 = vsel %vm1470_vm8, %v1973_v45, 0.0 }
 0x76b   :  { %v1976_v35 = vsel %vm1470_vm8, %v1974_v30, 0.0 }
 0x76c   :  { %v1977_v15 = vadd.f32 %v1976_v35, %v1975_v39 }
 0x76e   :  { %v1978_v53 = vrot.slane %v1977_v15, 4 }
 0x770   :  { %v1979_v14 = vadd.f32 %v1978_v53, %v1977_v15 }
 0x772   :  { %v1980_v22 = vrot.slane %v1979_v14, 2 }
 0x774   :  { %v1981_v6 = vadd.f32 %v1980_v22, %v1979_v14 }
 0x776   :  { %v1982_v16 = vrot.slane %v1981_v6, 1 }
 0x778   :  { %v1983_v62 = vadd.f32 %v1982_v16, %v1981_v6 }
 0x77a   :  { %v2837_v59 = vadd.f32 -1.0, %v1983_v62 }
 0x77c   :  { %v1985_v4 = vmul.f32 %v2837_v59, %v3893_v50 }
 0x77e   :  { %vm1986_vm14 = vcmp.ge.f32.partialorder %v1985_v4, 0.0 }
 0x77f   :  { %v1987_v37 = vsel %vm1986_vm14, %v1950_v51, %v1948_v34 }
 0x780   :  { %v1989_v1 = vadd.f32 %v1988_v25, %v1987_v37 }
 0x782   :  { %v1993_v32 = vrot.slane %v1989_v1, %v3446_v2 }
 0x784   :  { %v1994_v54 = vsub.f32 %v3849_v33, %v1993_v32  ;;  %v1995_v27 = vsub.f32 %v3851_v26, %v1993_v32 }
 0x786   :  { %v1996_v49 = vmax.f32 %v1994_v54, 0.0  ;;  %v1997_v12 = vmax.f32 %v1995_v27, 0.0 }
 0x788   :  { %vm1998_vm15 = vcmp.gt.f32.partialorder %v1996_v49, 0.0  ;;  %vm1999_vm3 = vcmp.gt.f32.partialorder %v1997_v12, 0.0 }
 0x789   :  { %v2000_v21 = vsel %vm1998_vm15, %v1996_v49, 1.0  ;;  %v2001_v0 = vsel %vm1999_vm3, %v1997_v12, 1.0 }
 0x78a   :  { %3106 = vlog2.f32 %v2000_v21 }
 0x78b   :  { %3108 = vlog2.f32 %v2001_v0 }
 0x794   :  { %v3107_v63 = vpop.eup %3106 }
 0x795   :  { %v3109_v60 = vpop.eup %3108  ;;  %v2003_v34 = vmul.f32 0.6931472, %v3107_v63  ;;  %v2027_v63 = vmul.f32 0.5, %v1988_v25 }
 0x796   :  { %v2005_v51 = vmul.f32 0.6931472, %v3109_v60 }
 0x797   :  { %v2006_v28 = vmul.f32 %v2003_v34, %v3879_v57 }
 0x798   :  { %v2007_v45 = vmul.f32 %v2005_v51, %v3879_v57 }
 0x799   :  { %v2008_v30 = vmul.f32 1.442695, %v2006_v28 }
 0x79a   :  { %v2010_v39 = vmul.f32 1.442695, %v2007_v45 }
 0x79b   :  { %3110 = vpow2.f32 %v2008_v30 }
 0x79c   :  { %3112 = vpow2.f32 %v2010_v39 }
 0x7a5   :  { %v3111_v35 = vpop.eup %3110 }
 0x7a6   :  { %v3113_v15 = vpop.eup %3112  ;;  %v2012_v53 = vsel %vm1998_vm15, %v3111_v35, 0.0 }
 0x7a7   :  { %v2013_v14 = vsel %vm1999_vm3, %v3113_v15, 0.0  ;;  %v2014_v22 = vsel %vm1470_vm8, %v2012_v53, 0.0 }
 0x7a8   :  { %v2015_v6 = vsel %vm1470_vm8, %v2013_v14, 0.0 }
 0x7a9   :  { %v2016_v16 = vadd.f32 %v2015_v6, %v2014_v22 }
 0x7ab   :  { %v2017_v62 = vrot.slane %v2016_v16, 4 }
 0x7ad   :  { %v2018_v59 = vadd.f32 %v2017_v62, %v2016_v16 }
 0x7af   :  { %v2019_v4 = vrot.slane %v2018_v59, 2 }
 0x7b1   :  { %v2020_v32 = vadd.f32 %v2019_v4, %v2018_v59 }
 0x7b3   :  { %v2021_v54 = vrot.slane %v2020_v32, 1 }
 0x7b5   :  { %v2022_v27 = vadd.f32 %v2021_v54, %v2020_v32 }
 0x7b7   :  { %v2838_v21 = vadd.f32 -1.0, %v2022_v27 }
 0x7b9   :  { %v2024_v0 = vmul.f32 %v2838_v21, %v3893_v50 }
 0x7bb   :  { %vm2025_vm4 = vcmp.ge.f32.partialorder %v2024_v0, 0.0 }
 0x7bc   :  { %v2026_v49 = vsel %vm2025_vm4, %v1989_v1, %v1987_v37 }
 0x7bd   :  { %v2028_v60 = vadd.f32 %v2027_v63, %v2026_v49 }
 0x7bf   :  { %v2032_v12 = vrot.slane %v2028_v60, %v3446_v2 }
 0x7c1   :  { %v2033_v34 = vsub.f32 %v3849_v33, %v2032_v12  ;;  %v2034_v51 = vsub.f32 %v3851_v26, %v2032_v12 }
 0x7c3   :  { %v2035_v28 = vmax.f32 %v2033_v34, 0.0  ;;  %v2036_v45 = vmax.f32 %v2034_v51, 0.0 }
 0x7c5   :  { %vm2037_vm7 = vcmp.gt.f32.partialorder %v2035_v28, 0.0  ;;  %vm2038_vm10 = vcmp.gt.f32.partialorder %v2036_v45, 0.0 }
 0x7c6   :  { %v2039_v30 = vsel %vm2037_vm7, %v2035_v28, 1.0  ;;  %v2040_v39 = vsel %vm2038_vm10, %v2036_v45, 1.0 }
 0x7c7   :  { %3114 = vlog2.f32 %v2039_v30 }
 0x7c8   :  { %3116 = vlog2.f32 %v2040_v39 }
 0x7d1   :  { %v3115_v35 = vpop.eup %3114 }
 0x7d2   :  { %v3117_v25 = vpop.eup %3116  ;;  %v2042_v37 = vmul.f32 0.6931472, %v3115_v35  ;;  %v2066_v35 = vmul.f32 0.5, %v2027_v63 }
 0x7d3   :  { %v2044_v1 = vmul.f32 0.6931472, %v3117_v25 }
 0x7d4   :  { %v2045_v15 = vmul.f32 %v2042_v37, %v3879_v57 }
 0x7d5   :  { %v2046_v53 = vmul.f32 %v2044_v1, %v3879_v57 }
 0x7d6   :  { %v2047_v14 = vmul.f32 1.442695, %v2045_v15 }
 0x7d7   :  { %v2049_v22 = vmul.f32 1.442695, %v2046_v53 }
 0x7d8   :  { %3118 = vpow2.f32 %v2047_v14 }
 0x7d9   :  { %3120 = vpow2.f32 %v2049_v22 }
 0x7e2   :  { %v3119_v6 = vpop.eup %3118 }
 0x7e3   :  { %v3121_v16 = vpop.eup %3120  ;;  %v2051_v62 = vsel %vm2037_vm7, %v3119_v6, 0.0 }
 0x7e4   :  { %v2052_v59 = vsel %vm2038_vm10, %v3121_v16, 0.0  ;;  %v2053_v4 = vsel %vm1470_vm8, %v2051_v62, 0.0 }
 0x7e5   :  { %v2054_v32 = vsel %vm1470_vm8, %v2052_v59, 0.0 }
 0x7e6   :  { %v2055_v54 = vadd.f32 %v2054_v32, %v2053_v4 }
 0x7e8   :  { %v2056_v27 = vrot.slane %v2055_v54, 4 }
 0x7ea   :  { %v2057_v21 = vadd.f32 %v2056_v27, %v2055_v54 }
 0x7ec   :  { %v2058_v0 = vrot.slane %v2057_v21, 2 }
 0x7ee   :  { %v2059_v12 = vadd.f32 %v2058_v0, %v2057_v21 }
 0x7f0   :  { %v2060_v34 = vrot.slane %v2059_v12, 1 }
 0x7f2   :  { %v2061_v51 = vadd.f32 %v2060_v34, %v2059_v12 }
 0x7f4   :  { %v2839_v30 = vadd.f32 -1.0, %v2061_v51 }
 0x7f6   :  { %v2063_v39 = vmul.f32 %v2839_v30, %v3893_v50 }
 0x7f8   :  { %vm2064_vm11 = vcmp.ge.f32.partialorder %v2063_v39, 0.0 }
 0x7f9   :  { %v2065_v28 = vsel %vm2064_vm11, %v2028_v60, %v2026_v49 }
 0x7fa   :  { %v2067_v25 = vadd.f32 %v2066_v35, %v2065_v28 }
 0x7fc   :  { %v2071_v45 = vrot.slane %v2067_v25, %v3446_v2 }
 0x7fe   :  { %v2072_v37 = vsub.f32 %v3849_v33, %v2071_v45  ;;  %v2073_v1 = vsub.f32 %v3851_v26, %v2071_v45 }
 0x800   :  { %v2074_v15 = vmax.f32 %v2072_v37, 0.0  ;;  %v2075_v53 = vmax.f32 %v2073_v1, 0.0 }
 0x802   :  { %vm2076_vm14 = vcmp.gt.f32.partialorder %v2074_v15, 0.0  ;;  %vm2077_vm15 = vcmp.gt.f32.partialorder %v2075_v53, 0.0 }
 0x803   :  { %v2078_v14 = vsel %vm2076_vm14, %v2074_v15, 1.0  ;;  %v2079_v22 = vsel %vm2077_vm15, %v2075_v53, 1.0 }
 0x804   :  { %3122 = vlog2.f32 %v2078_v14 }
 0x805   :  { %3124 = vlog2.f32 %v2079_v22 }
 0x80e   :  { %v3123_v6 = vpop.eup %3122 }
 0x80f   :  { %v3125_v63 = vpop.eup %3124  ;;  %v2081_v49 = vmul.f32 0.6931472, %v3123_v6  ;;  %v2105_v6 = vmul.f32 0.5, %v2066_v35 }
 0x810   :  { %v2083_v60 = vmul.f32 0.6931472, %v3125_v63 }
 0x811   :  { %v2084_v16 = vmul.f32 %v2081_v49, %v3879_v57 }
 0x812   :  { %v2085_v62 = vmul.f32 %v2083_v60, %v3879_v57 }
 0x813   :  { %v2086_v59 = vmul.f32 1.442695, %v2084_v16 }
 0x814   :  { %v2088_v4 = vmul.f32 1.442695, %v2085_v62 }
 0x815   :  { %3126 = vpow2.f32 %v2086_v59 }
 0x816   :  { %3128 = vpow2.f32 %v2088_v4 }
 0x81f   :  { %v3127_v32 = vpop.eup %3126 }
 0x820   :  { %v3129_v54 = vpop.eup %3128  ;;  %v2090_v27 = vsel %vm2076_vm14, %v3127_v32, 0.0 }
 0x821   :  { %v2091_v21 = vsel %vm2077_vm15, %v3129_v54, 0.0  ;;  %v2092_v0 = vsel %vm1470_vm8, %v2090_v27, 0.0 }
 0x822   :  { %v2093_v12 = vsel %vm1470_vm8, %v2091_v21, 0.0 }
 0x823   :  { %v2094_v34 = vadd.f32 %v2093_v12, %v2092_v0 }
 0x825   :  { %v2095_v51 = vrot.slane %v2094_v34, 4 }
 0x827   :  { %v2096_v30 = vadd.f32 %v2095_v51, %v2094_v34 }
 0x829   :  { %v2097_v39 = vrot.slane %v2096_v30, 2 }
 0x82b   :  { %v2098_v45 = vadd.f32 %v2097_v39, %v2096_v30 }
 0x82d   :  { %v2099_v37 = vrot.slane %v2098_v45, 1 }
 0x82f   :  { %v2100_v1 = vadd.f32 %v2099_v37, %v2098_v45 }
 0x831   :  { %v2840_v14 = vadd.f32 -1.0, %v2100_v1 }
 0x833   :  { %v2102_v22 = vmul.f32 %v2840_v14, %v3893_v50 }
 0x835   :  { %vm2103_vm3 = vcmp.ge.f32.partialorder %v2102_v22, 0.0 }
 0x836   :  { %v2104_v15 = vsel %vm2103_vm3, %v2067_v25, %v2065_v28 }
 0x837   :  { %v2106_v63 = vadd.f32 %v2105_v6, %v2104_v15 }
 0x839   :  { %v2110_v53 = vrot.slane %v2106_v63, %v3446_v2 }
 0x83b   :  { %v2111_v49 = vsub.f32 %v3849_v33, %v2110_v53  ;;  %v2112_v60 = vsub.f32 %v3851_v26, %v2110_v53 }
 0x83d   :  { %v2113_v16 = vmax.f32 %v2111_v49, 0.0  ;;  %v2114_v62 = vmax.f32 %v2112_v60, 0.0 }
 0x83f   :  { %vm2115_vm4 = vcmp.gt.f32.partialorder %v2113_v16, 0.0  ;;  %vm2116_vm7 = vcmp.gt.f32.partialorder %v2114_v62, 0.0 }
 0x840   :  { %v2117_v59 = vsel %vm2115_vm4, %v2113_v16, 1.0  ;;  %v2118_v4 = vsel %vm2116_vm7, %v2114_v62, 1.0 }
 0x841   :  { %3130 = vlog2.f32 %v2117_v59 }
 0x842   :  { %3132 = vlog2.f32 %v2118_v4 }
 0x84b   :  { %v3131_v32 = vpop.eup %3130 }
 0x84c   :  { %v3133_v35 = vpop.eup %3132  ;;  %v2120_v28 = vmul.f32 0.6931472, %v3131_v32  ;;  %v2144_v32 = vmul.f32 0.5, %v2105_v6 }
 0x84d   :  { %v2122_v25 = vmul.f32 0.6931472, %v3133_v35 }
 0x84e   :  { %v2123_v54 = vmul.f32 %v2120_v28, %v3879_v57 }
 0x84f   :  { %v2124_v27 = vmul.f32 %v2122_v25, %v3879_v57 }
 0x850   :  { %v2125_v21 = vmul.f32 1.442695, %v2123_v54 }
 0x851   :  { %v2127_v0 = vmul.f32 1.442695, %v2124_v27 }
 0x852   :  { %3134 = vpow2.f32 %v2125_v21 }
 0x853   :  { %3136 = vpow2.f32 %v2127_v0 }
 0x85c   :  { %v3135_v12 = vpop.eup %3134 }
 0x85d   :  { %v3137_v34 = vpop.eup %3136  ;;  %v2129_v51 = vsel %vm2115_vm4, %v3135_v12, 0.0 }
 0x85e   :  { %v2130_v30 = vsel %vm2116_vm7, %v3137_v34, 0.0  ;;  %v2131_v39 = vsel %vm1470_vm8, %v2129_v51, 0.0 }
 0x85f   :  { %v2132_v45 = vsel %vm1470_vm8, %v2130_v30, 0.0 }
 0x860   :  { %v2133_v37 = vadd.f32 %v2132_v45, %v2131_v39 }
 0x862   :  { %v2134_v1 = vrot.slane %v2133_v37, 4 }
 0x864   :  { %v2135_v14 = vadd.f32 %v2134_v1, %v2133_v37 }
 0x866   :  { %v2136_v22 = vrot.slane %v2135_v14, 2 }
 0x868   :  { %v2137_v53 = vadd.f32 %v2136_v22, %v2135_v14 }
 0x86a   :  { %v2138_v49 = vrot.slane %v2137_v53, 1 }
 0x86c   :  { %v2139_v60 = vadd.f32 %v2138_v49, %v2137_v53 }
 0x86e   :  { %v2841_v59 = vadd.f32 -1.0, %v2139_v60 }
 0x870   :  { %v2141_v4 = vmul.f32 %v2841_v59, %v3893_v50 }
 0x872   :  { %vm2142_vm10 = vcmp.ge.f32.partialorder %v2141_v4, 0.0 }
 0x873   :  { %v2143_v16 = vsel %vm2142_vm10, %v2106_v63, %v2104_v15 }
 0x874   :  { %v2145_v35 = vadd.f32 %v2144_v32, %v2143_v16 }
 0x876   :  { %v2149_v62 = vrot.slane %v2145_v35, %v3446_v2 }
 0x878   :  { %v2150_v28 = vsub.f32 %v3849_v33, %v2149_v62  ;;  %v2151_v25 = vsub.f32 %v3851_v26, %v2149_v62 }
 0x87a   :  { %v2152_v54 = vmax.f32 %v2150_v28, 0.0  ;;  %v2153_v27 = vmax.f32 %v2151_v25, 0.0 }
 0x87c   :  { %vm2154_vm11 = vcmp.gt.f32.partialorder %v2152_v54, 0.0  ;;  %vm2155_vm14 = vcmp.gt.f32.partialorder %v2153_v27, 0.0 }
 0x87d   :  { %v2156_v21 = vsel %vm2154_vm11, %v2152_v54, 1.0  ;;  %v2157_v0 = vsel %vm2155_vm14, %v2153_v27, 1.0 }
 0x87e   :  { %3138 = vlog2.f32 %v2156_v21 }
 0x87f   :  { %3140 = vlog2.f32 %v2157_v0 }
 0x888   :  { %v3139_v12 = vpop.eup %3138 }
 0x889   :  { %v3141_v6 = vpop.eup %3140  ;;  %v2159_v15 = vmul.f32 0.6931472, %v3139_v12  ;;  %v2183_v12 = vmul.f32 0.5, %v2144_v32 }
 0x88a   :  { %v2161_v63 = vmul.f32 0.6931472, %v3141_v6 }
 0x88b   :  { %v2162_v34 = vmul.f32 %v2159_v15, %v3879_v57 }
 0x88c   :  { %v2163_v51 = vmul.f32 %v2161_v63, %v3879_v57 }
 0x88d   :  { %v2164_v30 = vmul.f32 1.442695, %v2162_v34 }
 0x88e   :  { %v2166_v39 = vmul.f32 1.442695, %v2163_v51 }
 0x88f   :  { %3142 = vpow2.f32 %v2164_v30 }
 0x890   :  { %3144 = vpow2.f32 %v2166_v39 }
 0x899   :  { %v3143_v45 = vpop.eup %3142 }
 0x89a   :  { %v3145_v37 = vpop.eup %3144  ;;  %v2168_v1 = vsel %vm2154_vm11, %v3143_v45, 0.0 }
 0x89b   :  { %v2169_v14 = vsel %vm2155_vm14, %v3145_v37, 0.0  ;;  %v2170_v22 = vsel %vm1470_vm8, %v2168_v1, 0.0 }
 0x89c   :  { %v2171_v53 = vsel %vm1470_vm8, %v2169_v14, 0.0 }
 0x89d   :  { %v2172_v49 = vadd.f32 %v2171_v53, %v2170_v22 }
 0x89f   :  { %v2173_v60 = vrot.slane %v2172_v49, 4 }
 0x8a1   :  { %v2174_v59 = vadd.f32 %v2173_v60, %v2172_v49 }
 0x8a3   :  { %v2175_v4 = vrot.slane %v2174_v59, 2 }
 0x8a5   :  { %v2176_v62 = vadd.f32 %v2175_v4, %v2174_v59 }
 0x8a7   :  { %v2177_v28 = vrot.slane %v2176_v62, 1 }
 0x8a9   :  { %v2178_v25 = vadd.f32 %v2177_v28, %v2176_v62 }
 0x8ab   :  { %v2842_v21 = vadd.f32 -1.0, %v2178_v25 }
 0x8ad   :  { %v2180_v0 = vmul.f32 %v2842_v21, %v3893_v50 }
 0x8af   :  { %vm2181_vm15 = vcmp.ge.f32.partialorder %v2180_v0, 0.0 }
 0x8b0   :  { %v2182_v54 = vsel %vm2181_vm15, %v2145_v35, %v2143_v16 }
 0x8b1   :  { %v2184_v6 = vadd.f32 %v2183_v12, %v2182_v54 }
 0x8b3   :  { %v2188_v27 = vrot.slane %v2184_v6, %v3446_v2 }
 0x8b5   :  { %v2189_v15 = vsub.f32 %v3849_v33, %v2188_v27  ;;  %v2190_v63 = vsub.f32 %v3851_v26, %v2188_v27 }
 0x8b7   :  { %v2191_v34 = vmax.f32 %v2189_v15, 0.0  ;;  %v2192_v51 = vmax.f32 %v2190_v63, 0.0 }
 0x8b9   :  { %vm2193_vm3 = vcmp.gt.f32.partialorder %v2191_v34, 0.0  ;;  %vm2194_vm4 = vcmp.gt.f32.partialorder %v2192_v51, 0.0 }
 0x8ba   :  { %v2195_v30 = vsel %vm2193_vm3, %v2191_v34, 1.0  ;;  %v2196_v39 = vsel %vm2194_vm4, %v2192_v51, 1.0 }
 0x8bb   :  { %3146 = vlog2.f32 %v2195_v30 }
 0x8bc   :  { %3148 = vlog2.f32 %v2196_v39 }
 0x8c5   :  { %v3147_v45 = vpop.eup %3146 }
 0x8c6   :  { %v3149_v32 = vpop.eup %3148  ;;  %v2198_v16 = vmul.f32 0.6931472, %v3147_v45  ;;  %v2222_v45 = vmul.f32 0.5, %v2183_v12 }
 0x8c7   :  { %v2200_v35 = vmul.f32 0.6931472, %v3149_v32 }
 0x8c8   :  { %v2201_v37 = vmul.f32 %v2198_v16, %v3879_v57 }
 0x8c9   :  { %v2202_v1 = vmul.f32 %v2200_v35, %v3879_v57 }
 0x8ca   :  { %v2203_v14 = vmul.f32 1.442695, %v2201_v37 }
 0x8cb   :  { %v2205_v22 = vmul.f32 1.442695, %v2202_v1 }
 0x8cc   :  { %3150 = vpow2.f32 %v2203_v14 }
 0x8cd   :  { %3152 = vpow2.f32 %v2205_v22 }
 0x8d6   :  { %v3151_v53 = vpop.eup %3150 }
 0x8d7   :  { %v3153_v49 = vpop.eup %3152  ;;  %v2207_v60 = vsel %vm2193_vm3, %v3151_v53, 0.0 }
 0x8d8   :  { %v2208_v59 = vsel %vm2194_vm4, %v3153_v49, 0.0  ;;  %v2209_v4 = vsel %vm1470_vm8, %v2207_v60, 0.0 }
 0x8d9   :  { %v2210_v62 = vsel %vm1470_vm8, %v2208_v59, 0.0 }
 0x8da   :  { %v2211_v28 = vadd.f32 %v2210_v62, %v2209_v4 }
 0x8dc   :  { %v2212_v25 = vrot.slane %v2211_v28, 4 }
 0x8de   :  { %v2213_v21 = vadd.f32 %v2212_v25, %v2211_v28 }
 0x8e0   :  { %v2214_v0 = vrot.slane %v2213_v21, 2 }
 0x8e2   :  { %v2215_v27 = vadd.f32 %v2214_v0, %v2213_v21 }
 0x8e4   :  { %v2216_v15 = vrot.slane %v2215_v27, 1 }
 0x8e6   :  { %v2217_v63 = vadd.f32 %v2216_v15, %v2215_v27 }
 0x8e8   :  { %v2843_v30 = vadd.f32 -1.0, %v2217_v63 }
 0x8ea   :  { %v2219_v39 = vmul.f32 %v2843_v30, %v3893_v50 }
 0x8ec   :  { %vm2220_vm7 = vcmp.ge.f32.partialorder %v2219_v39, 0.0 }
 0x8ed   :  { %v2221_v34 = vsel %vm2220_vm7, %v2184_v6, %v2182_v54 }
 0x8ee   :  { %v2223_v32 = vadd.f32 %v2222_v45, %v2221_v34 }
 0x8f0   :  { %v2227_v51 = vrot.slane %v2223_v32, %v3446_v2 }
 0x8f2   :  { %v2228_v16 = vsub.f32 %v3849_v33, %v2227_v51  ;;  %v2229_v35 = vsub.f32 %v3851_v26, %v2227_v51 }
 0x8f4   :  { %v2230_v37 = vmax.f32 %v2228_v16, 0.0  ;;  %v2231_v1 = vmax.f32 %v2229_v35, 0.0 }
 0x8f6   :  { %vm2232_vm10 = vcmp.gt.f32.partialorder %v2230_v37, 0.0  ;;  %vm2233_vm11 = vcmp.gt.f32.partialorder %v2231_v1, 0.0 }
 0x8f7   :  { %v2234_v14 = vsel %vm2232_vm10, %v2230_v37, 1.0  ;;  %v2235_v22 = vsel %vm2233_vm11, %v2231_v1, 1.0 }
 0x8f8   :  { %3154 = vlog2.f32 %v2234_v14 }
 0x8f9   :  { %3156 = vlog2.f32 %v2235_v22 }
 0x902   :  { %v3155_v53 = vpop.eup %3154 }
 0x903   :  { %v3157_v12 = vpop.eup %3156  ;;  %v2237_v54 = vmul.f32 0.6931472, %v3155_v53  ;;  %v2261_v53 = vmul.f32 0.5, %v2222_v45 }
 0x904   :  { %v2239_v6 = vmul.f32 0.6931472, %v3157_v12 }
 0x905   :  { %v2240_v49 = vmul.f32 %v2237_v54, %v3879_v57 }
 0x906   :  { %v2241_v60 = vmul.f32 %v2239_v6, %v3879_v57 }
 0x907   :  { %v2242_v59 = vmul.f32 1.442695, %v2240_v49 }
 0x908   :  { %v2244_v4 = vmul.f32 1.442695, %v2241_v60 }
 0x909   :  { %3158 = vpow2.f32 %v2242_v59 }
 0x90a   :  { %3160 = vpow2.f32 %v2244_v4 }
 0x913   :  { %v3159_v62 = vpop.eup %3158 }
 0x914   :  { %v3161_v28 = vpop.eup %3160  ;;  %v2246_v25 = vsel %vm2232_vm10, %v3159_v62, 0.0 }
 0x915   :  { %v2247_v21 = vsel %vm2233_vm11, %v3161_v28, 0.0  ;;  %v2248_v0 = vsel %vm1470_vm8, %v2246_v25, 0.0 }
 0x916   :  { %v2249_v27 = vsel %vm1470_vm8, %v2247_v21, 0.0 }
 0x917   :  { %v2250_v15 = vadd.f32 %v2249_v27, %v2248_v0 }
 0x919   :  { %v2251_v63 = vrot.slane %v2250_v15, 4 }
 0x91b   :  { %v2252_v30 = vadd.f32 %v2251_v63, %v2250_v15 }
 0x91d   :  { %v2253_v39 = vrot.slane %v2252_v30, 2 }
 0x91f   :  { %v2254_v51 = vadd.f32 %v2253_v39, %v2252_v30 }
 0x921   :  { %v2255_v16 = vrot.slane %v2254_v51, 1 }
 0x923   :  { %v2256_v35 = vadd.f32 %v2255_v16, %v2254_v51 }
 0x925   :  { %v2844_v14 = vadd.f32 -1.0, %v2256_v35 }
 0x927   :  { %v2258_v22 = vmul.f32 %v2844_v14, %v3893_v50 }
 0x929   :  { %vm2259_vm14 = vcmp.ge.f32.partialorder %v2258_v22, 0.0 }
 0x92a   :  { %v2260_v37 = vsel %vm2259_vm14, %v2223_v32, %v2221_v34 }
 0x92b   :  { %v2262_v12 = vadd.f32 %v2261_v53, %v2260_v37 }
 0x92d   :  { %v2266_v1 = vrot.slane %v2262_v12, %v3446_v2 }
 0x92f   :  { %v2267_v54 = vsub.f32 %v3849_v33, %v2266_v1  ;;  %v2268_v6 = vsub.f32 %v3851_v26, %v2266_v1 }
 0x931   :  { %v2269_v49 = vmax.f32 %v2267_v54, 0.0  ;;  %v2270_v60 = vmax.f32 %v2268_v6, 0.0 }
 0x933   :  { %vm2271_vm15 = vcmp.gt.f32.partialorder %v2269_v49, 0.0  ;;  %vm2272_vm3 = vcmp.gt.f32.partialorder %v2270_v60, 0.0 }
 0x934   :  { %v2273_v59 = vsel %vm2271_vm15, %v2269_v49, 1.0  ;;  %v2274_v4 = vsel %vm2272_vm3, %v2270_v60, 1.0 }
 0x935   :  { %3162 = vlog2.f32 %v2273_v59 }
 0x936   :  { %3164 = vlog2.f32 %v2274_v4 }
 0x93f   :  { %v3163_v62 = vpop.eup %3162 }
 0x940   :  { %v3165_v45 = vpop.eup %3164  ;;  %v2276_v34 = vmul.f32 0.6931472, %v3163_v62  ;;  %v2300_v62 = vmul.f32 0.5, %v2261_v53 }
 0x941   :  { %v2278_v32 = vmul.f32 0.6931472, %v3165_v45 }
 0x942   :  { %v2279_v28 = vmul.f32 %v2276_v34, %v3879_v57 }
 0x943   :  { %v2280_v25 = vmul.f32 %v2278_v32, %v3879_v57 }
 0x944   :  { %v2281_v21 = vmul.f32 1.442695, %v2279_v28 }
 0x945   :  { %v2283_v0 = vmul.f32 1.442695, %v2280_v25 }
 0x946   :  { %3166 = vpow2.f32 %v2281_v21 }
 0x947   :  { %3168 = vpow2.f32 %v2283_v0 }
 0x950   :  { %v3167_v27 = vpop.eup %3166 }
 0x951   :  { %v3169_v15 = vpop.eup %3168  ;;  %v2285_v63 = vsel %vm2271_vm15, %v3167_v27, 0.0 }
 0x952   :  { %v2286_v30 = vsel %vm2272_vm3, %v3169_v15, 0.0  ;;  %v2287_v39 = vsel %vm1470_vm8, %v2285_v63, 0.0 }
 0x953   :  { %v2288_v51 = vsel %vm1470_vm8, %v2286_v30, 0.0 }
 0x954   :  { %v2289_v16 = vadd.f32 %v2288_v51, %v2287_v39 }
 0x956   :  { %v2290_v35 = vrot.slane %v2289_v16, 4 }
 0x958   :  { %v2291_v14 = vadd.f32 %v2290_v35, %v2289_v16 }
 0x95a   :  { %v2292_v22 = vrot.slane %v2291_v14, 2 }
 0x95c   :  { %v2293_v1 = vadd.f32 %v2292_v22, %v2291_v14 }
 0x95e   :  { %v2294_v54 = vrot.slane %v2293_v1, 1 }
 0x960   :  { %v2295_v6 = vadd.f32 %v2294_v54, %v2293_v1 }
 0x962   :  { %v2845_v59 = vadd.f32 -1.0, %v2295_v6 }
 0x964   :  { %v2297_v4 = vmul.f32 %v2845_v59, %v3893_v50 }
 0x966   :  { %vm2298_vm4 = vcmp.ge.f32.partialorder %v2297_v4, 0.0 }
 0x967   :  { %v2299_v49 = vsel %vm2298_vm4, %v2262_v12, %v2260_v37 }
 0x968   :  { %v2301_v45 = vadd.f32 %v2300_v62, %v2299_v49 }
 0x96a   :  { %v2305_v60 = vrot.slane %v2301_v45, %v3446_v2 }
 0x96c   :  { %v2306_v34 = vsub.f32 %v3849_v33, %v2305_v60  ;;  %v2307_v32 = vsub.f32 %v3851_v26, %v2305_v60 }
 0x96e   :  { %v2308_v28 = vmax.f32 %v2306_v34, 0.0  ;;  %v2309_v25 = vmax.f32 %v2307_v32, 0.0 }
 0x970   :  { %vm2310_vm7 = vcmp.gt.f32.partialorder %v2308_v28, 0.0  ;;  %vm2311_vm10 = vcmp.gt.f32.partialorder %v2309_v25, 0.0 }
 0x971   :  { %v2312_v21 = vsel %vm2310_vm7, %v2308_v28, 1.0  ;;  %v2313_v0 = vsel %vm2311_vm10, %v2309_v25, 1.0 }
 0x972   :  { %3170 = vlog2.f32 %v2312_v21 }
 0x973   :  { %3172 = vlog2.f32 %v2313_v0 }
 0x97c   :  { %v3171_v27 = vpop.eup %3170 }
 0x97d   :  { %v3173_v53 = vpop.eup %3172  ;;  %v2315_v37 = vmul.f32 0.6931472, %v3171_v27  ;;  %v2339_v27 = vmul.f32 0.5, %v2300_v62 }
 0x97e   :  { %v2317_v12 = vmul.f32 0.6931472, %v3173_v53 }
 0x97f   :  { %v2318_v15 = vmul.f32 %v2315_v37, %v3879_v57 }
 0x980   :  { %v2319_v63 = vmul.f32 %v2317_v12, %v3879_v57 }
 0x981   :  { %v2320_v30 = vmul.f32 1.442695, %v2318_v15 }
 0x982   :  { %v2322_v39 = vmul.f32 1.442695, %v2319_v63 }
 0x983   :  { %3174 = vpow2.f32 %v2320_v30 }
 0x984   :  { %3176 = vpow2.f32 %v2322_v39 }
 0x98d   :  { %v3175_v51 = vpop.eup %3174 }
 0x98e   :  { %v3177_v16 = vpop.eup %3176  ;;  %v2324_v35 = vsel %vm2310_vm7, %v3175_v51, 0.0 }
 0x98f   :  { %v2325_v14 = vsel %vm2311_vm10, %v3177_v16, 0.0  ;;  %v2326_v22 = vsel %vm1470_vm8, %v2324_v35, 0.0 }
 0x990   :  { %v2327_v1 = vsel %vm1470_vm8, %v2325_v14, 0.0 }
 0x991   :  { %v2328_v54 = vadd.f32 %v2327_v1, %v2326_v22 }
 0x993   :  { %v2329_v6 = vrot.slane %v2328_v54, 4 }
 0x995   :  { %v2330_v59 = vadd.f32 %v2329_v6, %v2328_v54 }
 0x997   :  { %v2331_v4 = vrot.slane %v2330_v59, 2 }
 0x999   :  { %v2332_v60 = vadd.f32 %v2331_v4, %v2330_v59 }
 0x99b   :  { %v2333_v34 = vrot.slane %v2332_v60, 1 }
 0x99d   :  { %v2334_v32 = vadd.f32 %v2333_v34, %v2332_v60 }
 0x99f   :  { %v2846_v21 = vadd.f32 -1.0, %v2334_v32 }
 0x9a1   :  { %v2336_v0 = vmul.f32 %v2846_v21, %v3893_v50 }
 0x9a3   :  { %vm2337_vm11 = vcmp.ge.f32.partialorder %v2336_v0, 0.0 }
 0x9a4   :  { %v2338_v28 = vsel %vm2337_vm11, %v2301_v45, %v2299_v49 }
 0x9a5   :  { %v2340_v53 = vadd.f32 %v2339_v27, %v2338_v28 }
 0x9a7   :  { %v2344_v25 = vrot.slane %v2340_v53, %v3446_v2 }
 0x9a9   :  { %v2345_v37 = vsub.f32 %v3849_v33, %v2344_v25  ;;  %v2346_v12 = vsub.f32 %v3851_v26, %v2344_v25 }
 0x9ab   :  { %v2347_v15 = vmax.f32 %v2345_v37, 0.0  ;;  %v2348_v63 = vmax.f32 %v2346_v12, 0.0 }
 0x9ad   :  { %vm2349_vm14 = vcmp.gt.f32.partialorder %v2347_v15, 0.0  ;;  %vm2350_vm15 = vcmp.gt.f32.partialorder %v2348_v63, 0.0 }
 0x9ae   :  { %v2351_v30 = vsel %vm2349_vm14, %v2347_v15, 1.0  ;;  %v2352_v39 = vsel %vm2350_vm15, %v2348_v63, 1.0 }
 0x9af   :  { %3178 = vlog2.f32 %v2351_v30 }
 0x9b0   :  { %3180 = vlog2.f32 %v2352_v39 }
 0x9b9   :  { %v3179_v51 = vpop.eup %3178 }
 0x9ba   :  { %v3181_v62 = vpop.eup %3180  ;;  %v2354_v49 = vmul.f32 0.6931472, %v3179_v51  ;;  %v2378_v51 = vmul.f32 0.5, %v2339_v27 }
 0x9bb   :  { %v2356_v45 = vmul.f32 0.6931472, %v3181_v62 }
 0x9bc   :  { %v2357_v16 = vmul.f32 %v2354_v49, %v3879_v57 }
 0x9bd   :  { %v2358_v35 = vmul.f32 %v2356_v45, %v3879_v57 }
 0x9be   :  { %v2359_v14 = vmul.f32 1.442695, %v2357_v16 }
 0x9bf   :  { %v2361_v22 = vmul.f32 1.442695, %v2358_v35 }
 0x9c0   :  { %3182 = vpow2.f32 %v2359_v14 }
 0x9c1   :  { %3184 = vpow2.f32 %v2361_v22 }
 0x9ca   :  { %v3183_v1 = vpop.eup %3182 }
 0x9cb   :  { %v3185_v54 = vpop.eup %3184  ;;  %v2363_v6 = vsel %vm2349_vm14, %v3183_v1, 0.0 }
 0x9cc   :  { %v2364_v59 = vsel %vm2350_vm15, %v3185_v54, 0.0  ;;  %v2365_v4 = vsel %vm1470_vm8, %v2363_v6, 0.0 }
 0x9cd   :  { %v2366_v60 = vsel %vm1470_vm8, %v2364_v59, 0.0 }
 0x9ce   :  { %v2367_v34 = vadd.f32 %v2366_v60, %v2365_v4 }
 0x9d0   :  { %v2368_v32 = vrot.slane %v2367_v34, 4 }
 0x9d2   :  { %v2369_v21 = vadd.f32 %v2368_v32, %v2367_v34 }
 0x9d4   :  { %v2370_v0 = vrot.slane %v2369_v21, 2 }
 0x9d6   :  { %v2371_v25 = vadd.f32 %v2370_v0, %v2369_v21 }
 0x9d8   :  { %v2372_v37 = vrot.slane %v2371_v25, 1 }
 0x9da   :  { %v2373_v12 = vadd.f32 %v2372_v37, %v2371_v25 }
 0x9dc   :  { %v2847_v30 = vadd.f32 -1.0, %v2373_v12 }
 0x9de   :  { %v2375_v39 = vmul.f32 %v2847_v30, %v3893_v50 }
 0x9e0   :  { %vm2376_vm3 = vcmp.ge.f32.partialorder %v2375_v39, 0.0 }
 0x9e1   :  { %v2377_v15 = vsel %vm2376_vm3, %v2340_v53, %v2338_v28 }
 0x9e2   :  { %v2379_v62 = vadd.f32 %v2378_v51, %v2377_v15 }
 0x9e4   :  { %v2383_v63 = vrot.slane %v2379_v62, %v3446_v2 }
 0x9e6   :  { %v2384_v49 = vsub.f32 %v3849_v33, %v2383_v63  ;;  %v2385_v45 = vsub.f32 %v3851_v26, %v2383_v63 }
 0x9e8   :  { %v2386_v16 = vmax.f32 %v2384_v49, 0.0  ;;  %v2387_v35 = vmax.f32 %v2385_v45, 0.0 }
 0x9ea   :  { %vm2388_vm4 = vcmp.gt.f32.partialorder %v2386_v16, 0.0  ;;  %vm2389_vm7 = vcmp.gt.f32.partialorder %v2387_v35, 0.0 }
 0x9eb   :  { %v2390_v14 = vsel %vm2388_vm4, %v2386_v16, 1.0  ;;  %v2391_v22 = vsel %vm2389_vm7, %v2387_v35, 1.0 }
 0x9ec   :  { %3186 = vlog2.f32 %v2390_v14 }
 0x9ed   :  { %3188 = vlog2.f32 %v2391_v22 }
 0x9f6   :  { %v3187_v1 = vpop.eup %3186 }
 0x9f7   :  { %v3189_v27 = vpop.eup %3188  ;;  %v2393_v28 = vmul.f32 0.6931472, %v3187_v1  ;;  %v2417_v1 = vmul.f32 0.5, %v2378_v51 }
 0x9f8   :  { %v2395_v53 = vmul.f32 0.6931472, %v3189_v27 }
 0x9f9   :  { %v2396_v54 = vmul.f32 %v2393_v28, %v3879_v57 }
 0x9fa   :  { %v2397_v6 = vmul.f32 %v2395_v53, %v3879_v57 }
 0x9fb   :  { %v2398_v59 = vmul.f32 1.442695, %v2396_v54 }
 0x9fc   :  { %v2400_v4 = vmul.f32 1.442695, %v2397_v6 }
 0x9fd   :  { %3190 = vpow2.f32 %v2398_v59 }
 0x9fe   :  { %3192 = vpow2.f32 %v2400_v4 }
 0xa07   :  { %v3191_v60 = vpop.eup %3190 }
 0xa08   :  { %v3193_v34 = vpop.eup %3192  ;;  %v2402_v32 = vsel %vm2388_vm4, %v3191_v60, 0.0 }
 0xa09   :  { %v2403_v21 = vsel %vm2389_vm7, %v3193_v34, 0.0  ;;  %v2404_v0 = vsel %vm1470_vm8, %v2402_v32, 0.0 }
 0xa0a   :  { %v2405_v25 = vsel %vm1470_vm8, %v2403_v21, 0.0 }
 0xa0b   :  { %v2406_v37 = vadd.f32 %v2405_v25, %v2404_v0 }
 0xa0d   :  { %v2407_v12 = vrot.slane %v2406_v37, 4 }
 0xa0f   :  { %v2408_v30 = vadd.f32 %v2407_v12, %v2406_v37 }
 0xa11   :  { %v2409_v39 = vrot.slane %v2408_v30, 2 }
 0xa13   :  { %v2410_v63 = vadd.f32 %v2409_v39, %v2408_v30 }
 0xa15   :  { %v2411_v49 = vrot.slane %v2410_v63, 1 }
 0xa17   :  { %v2412_v45 = vadd.f32 %v2411_v49, %v2410_v63 }
 0xa19   :  { %v2848_v14 = vadd.f32 -1.0, %v2412_v45 }
 0xa1b   :  { %v2414_v22 = vmul.f32 %v2848_v14, %v3893_v50 }
 0xa1d   :  { %vm2415_vm10 = vcmp.ge.f32.partialorder %v2414_v22, 0.0 }
 0xa1e   :  { %v2416_v16 = vsel %vm2415_vm10, %v2379_v62, %v2377_v15 }
 0xa1f   :  { %v2418_v27 = vadd.f32 %v2417_v1, %v2416_v16 }
 0xa21   :  { %v2422_v35 = vrot.slane %v2418_v27, %v3446_v2 }
 0xa23   :  { %v2423_v28 = vsub.f32 %v3849_v33, %v2422_v35  ;;  %v2424_v53 = vsub.f32 %v3851_v26, %v2422_v35 }
 0xa25   :  { %v2425_v54 = vmax.f32 %v2423_v28, 0.0  ;;  %v2426_v6 = vmax.f32 %v2424_v53, 0.0 }
 0xa27   :  { %vm2427_vm11 = vcmp.gt.f32.partialorder %v2425_v54, 0.0  ;;  %vm2428_vm14 = vcmp.gt.f32.partialorder %v2426_v6, 0.0 }
 0xa28   :  { %v2429_v59 = vsel %vm2427_vm11, %v2425_v54, 1.0  ;;  %v2430_v4 = vsel %vm2428_vm14, %v2426_v6, 1.0 }
 0xa29   :  { %3194 = vlog2.f32 %v2429_v59 }
 0xa2a   :  { %3196 = vlog2.f32 %v2430_v4 }
 0xa33   :  { %v3195_v50 = vpop.eup %3194 }
 0xa34   :  { %v3197_v51 = vpop.eup %3196  ;;  %v2432_v15 = vmul.f32 0.6931472, %v3195_v50 }
 0xa35   :  { %v2434_v62 = vmul.f32 0.6931472, %v3197_v51 }
 0xa36   :  { %v2435_v60 = vmul.f32 %v2432_v15, %v3879_v57 }
 0xa37   :  { %v2436_v33 = vmul.f32 %v2434_v62, %v3879_v57 }
 0xa38   :  { %v2437_v34 = vmul.f32 1.442695, %v2435_v60 }
 0xa39   :  { %v2439_v26 = vmul.f32 1.442695, %v2436_v33 }
 0xa3a   :  { %3198 = vpow2.f32 %v2437_v34 }
 0xa3b   :  { %3200 = vpow2.f32 %v2439_v26 }
 0xa44   :  { %v3199_v32 = vpop.eup %3198 }
 0xa45   :  { %v3201_v21 = vpop.eup %3200  ;;  %v2441_v0 = vsel %vm2427_vm11, %v3199_v32, 0.0 }
 0xa46   :  { %v2442_v25 = vsel %vm2428_vm14, %v3201_v21, 0.0  ;;  %v2443_v37 = vsel %vm1470_vm8, %v2441_v0, 0.0 }
 0xa47   :  { %v2444_v12 = vsel %vm1470_vm8, %v2442_v25, 0.0  ;;  %vm2591_vm8 = vcmask 523520  }
 0xa48   :  { %v2445_v30 = vadd.f32 %v2444_v12, %v2443_v37 }
 0xa4a   :  { %v2446_v39 = vrot.slane %v2445_v30, 4 }
 0xa4c   :  { %v2447_v63 = vadd.f32 %v2446_v39, %v2445_v30 }
 0xa4e   :  { %v2448_v49 = vrot.slane %v2447_v63, 2 }
 0xa50   :  { %v2449_v45 = vadd.f32 %v2448_v49, %v2447_v63 }
 0xa52   :  { %v2450_v57 = vrot.slane %v2449_v45, 1 }
 0xa54   :  { %v2451_v14 = vadd.f32 %v2450_v57, %v2449_v45 }
 0xa56   :  { %3202 = vrcp.f32 %v2451_v14 }
 0xa60   :  { %v3203_v22 = vpop.eup %3202 }
 0xa61   :  { %v2453_v1 = vmul.f32 %v3203_v22, %v2441_v0  ;;  %v2454_v16 = vmul.f32 %v3203_v22, %v2442_v25 }
 0xa63   :  { %2455 = vxpose.xlu0.b32.start [1/2] (short) (narrow) %v2453_v1, 8 }
 0xa67   :  { %2456 = vxpose.xlu0.b32.end [2/2] (short) (narrow) %v2454_v16, 8 }
 0xae3   :  { %v2471_v27 = vpop.trf.xlu0 }
 0xae4   :  { %v2490_v35 = vrot.slane %v2471_v27, %v3446_v2  ;;  %v2512_v28 = vrot.slane %v2471_v27, %v3458_v7  ;;  %v2501_v53 = vrot.slane %v2471_v27, %v3449_v3  ;;  %v2523_v54 = vrot.slane %v2471_v27, %v3463_v9 }
 0xae5   :  { %v2534_v6 = vrot.slane %v2471_v27, %v3471_v13  ;;  %v2545_v59 = vrot.slane %v2471_v27, %v3477_v18  ;;  %v2556_v2 = vrot.slane %v2471_v27, %v3483_v20  ;;  %v2567_v3 = vrot.slane %v2471_v27, %v3489_v24 }
 0xae6   :  { %2496 = vbcast.lane.b32.xlu0 %v2490_v35, 264  ;;  %2492 = vbcast.lane.b32.xlu1 %v2490_v35, 256 }
 0xaea   :  { %2514 = vbcast.lane.b32.xlu0 %v2512_v28, 256  ;;  %2503 = vbcast.lane.b32.xlu1 %v2501_v53, 256 }
 0xaee   :  { %2525 = vbcast.lane.b32.xlu0 %v2523_v54, 256  ;;  %2507 = vbcast.lane.b32.xlu1 %v2501_v53, 264 }
 0xaf2   :  { %2536 = vbcast.lane.b32.xlu0 %v2534_v6, 256  ;;  %2518 = vbcast.lane.b32.xlu1 %v2512_v28, 264 }
 0xaf6   :  { %2547 = vbcast.lane.b32.xlu0 %v2545_v59, 256  ;;  %2529 = vbcast.lane.b32.xlu1 %v2523_v54, 264 }
 0xafa   :  { %2558 = vbcast.lane.b32.xlu0 %v2556_v2, 256  ;;  %2540 = vbcast.lane.b32.xlu1 %v2534_v6, 264 }
 0xafe   :  { %2569 = vbcast.lane.b32.xlu0 %v2567_v3, 256  ;;  %2551 = vbcast.lane.b32.xlu1 %v2545_v59, 264 }
 0xb02   :  { %2562 = vbcast.lane.b32.xlu1 %v2556_v2, 264 }
 0xb06   :  { %2573 = vbcast.lane.b32.xlu1 %v2567_v3, 264 }
 0xb58   :  { %v2497_v7 = vpop.permute.xlu0 %2496  ;;  %v2493_v9 = vpop.permute.xlu1 %2492 }
 0xb59   :  { %v2576_v50 = vmul.f32 %v2497_v7, %v3622_v36  ;;  %v2575_v18 = vmul.f32 %v2493_v9, %v733_v29 }
 0xb5b   :  { %v2593_v62 = vsel %vm2591_vm8, %v2576_v50, 0.0  ;;  %v2592_v60 = vsel %vm2591_vm8, %v2575_v18, 0.0 }
 0xb5c   :  { %v2515_v4 = vpop.permute.xlu0 %2514  ;;  %v2504_v13 = vpop.permute.xlu1 %2503 }
 0xb5d   :  { %v2577_v20 = vmul.f32 %v2504_v13, %v734_v17  ;;  %v2579_v33 = vmul.f32 %v2515_v4, %v735_v47  ;;  %v2594_v17 = vadd.f32 %v2593_v62, %v2592_v60 }
 0xb5f   :  { %v2601_v36 = vsel %vm2591_vm8, %v2577_v20, 0.0  ;;  %v2610_v32 = vsel %vm2591_vm8, %v2579_v33, 0.0  ;;  %v2595_v12 = vrot.slane %v2594_v17, 4 }
 0xb60   :  { %v2526_v51 = vpop.permute.xlu0 %2525  ;;  %v2508_v15 = vpop.permute.xlu1 %2507 }
 0xb61   :  { %v2578_v24 = vmul.f32 %v2508_v15, %v3614_v23  ;;  %v2581_v23 = vmul.f32 %v2526_v51, %v736_v40  ;;  %v2596_v14 = vadd.f32 %v2595_v12, %v2594_v17 }
 0xb63   :  { %v2602_v34 = vsel %vm2591_vm8, %v2578_v24, 0.0  ;;  %v2619_v39 = vsel %vm2591_vm8, %v2581_v23, 0.0  ;;  %v2597_v6 = vrot.slane %v2596_v14, 2 }
 0xb64   :  { %v2603_v19 = vadd.f32 %v2602_v34, %v2601_v36  ;;  %v2537_v29 = vpop.permute.xlu0 %2536  ;;  %v2519_v26 = vpop.permute.xlu1 %2518 }
 0xb65   :  { %v2580_v10 = vmul.f32 %v2519_v26, %v3646_v61  ;;  %v2583_v61 = vmul.f32 %v2537_v29, %v737_v38  ;;  %v2598_v20 = vadd.f32 %v2597_v6, %v2596_v14 }
 0xb66   :  { %v2604_v0 = vrot.slane %v2603_v19, 4 }
 0xb67   :  { %v2611_v21 = vsel %vm2591_vm8, %v2580_v10, 0.0 }
 0xb68   :  { %v2612_v41 = vadd.f32 %v2611_v21, %v2610_v32  ;;  %v2548_v47 = vpop.permute.xlu0 %2547  ;;  %v2530_v25 = vpop.permute.xlu1 %2529  ;;  %v2605_v49 = vadd.f32 %v2604_v0, %v2603_v19 }
 0xb69   :  { %v2582_v37 = vmul.f32 %v2530_v25, %v3638_v43  ;;  %v2628_v43 = vsel %vm2591_vm8, %v2583_v61, 0.0  ;;  %v2585_v11 = vmul.f32 %v2548_v47, %v738_v31 }
 0xb6a   :  { %v2613_v30 = vrot.slane %v2612_v41, 4  ;;  %v2606_v27 = vrot.slane %v2605_v49, 2 }
 0xb6b   :  { %v2620_v63 = vsel %vm2591_vm8, %v2582_v37, 0.0  ;;  %v2637_v9 = vsel %vm2591_vm8, %v2585_v11, 0.0 }
 0xb6c   :  { %v2621_v48 = vadd.f32 %v2620_v63, %v2619_v39  ;;  %v2541_v40 = vpop.permute.xlu1 %2540  ;;  %v2614_v45 = vadd.f32 %v2613_v30, %v2612_v41  ;;  %v2559_v1 = vpop.permute.xlu0 %2558  ;;  %v2607_v7 = vadd.f32 %v2606_v27, %v2605_v49 }
 0xb6d   :  { %v2584_v57 = vmul.f32 %v2541_v40, %v3676_v58  ;;  %v2587_v2 = vmul.f32 %v2559_v1, %v739_v44 }
 0xb6e   :  { %v2622_v22 = vrot.slane %v2621_v48, 4  ;;  %v2615_v53 = vrot.slane %v2614_v45, 2  ;;  %v2608_v62 = vrot.slane %v2607_v7, 1 }
 0xb6f   :  { %v2629_v16 = vsel %vm2591_vm8, %v2584_v57, 0.0  ;;  %v2646_v15 = vsel %vm2591_vm8, %v2587_v2, 0.0 }
 0xb70   :  { %v2623_v38 = vadd.f32 %v2622_v22, %v2621_v48  ;;  %v2630_v35 = vadd.f32 %v2629_v16, %v2628_v43  ;;  %v2552_v28 = vpop.permute.xlu1 %2551  ;;  %v2570_v55 = vpop.permute.xlu0 %2569  ;;  %v2616_v13 = vadd.f32 %v2615_v53, %v2614_v45 }
 0xb71   :  { %v2586_v54 = vmul.f32 %v2552_v28, %v3663_v56  ;;  %v2589_v42 = vmul.f32 %v2570_v55, %v740_v8  ;;  %v2609_v8 = vadd.f32 %v2608_v62, %v2607_v7 }
 0xb72   :  { %v2624_v59 = vrot.slane %v2623_v38, 2  ;;  %v2631_v58 = vrot.slane %v2630_v35, 4  ;;  %v2617_v34 = vrot.slane %v2616_v13, 1 }
 0xb73   :  { %v2638_v3 = vsel %vm2591_vm8, %v2586_v54, 0.0  ;;  %v2655_v32 = vsel %vm2591_vm8, %v2589_v42, 0.0  ;;  %v2665_v61 = vmax.f32 %v2609_v8, 0.0 }
 0xb74   :  { %v2632_v4 = vadd.f32 %v2631_v58, %v2630_v35  ;;  %v2563_v31 = vpop.permute.xlu1 %2562  ;;  %v2639_v50 = vadd.f32 %v2638_v3, %v2637_v9  ;;  %v2625_v56 = vadd.f32 %v2624_v59, %v2623_v38  ;;  %v2618_v41 = vadd.f32 %v2617_v34, %v2616_v13 }
 0xb75   :  { %v2588_v18 = vmul.f32 %v2563_v31, %v3693_v46  ;;  %v2599_v46 = vrot.slane %v2598_v20, 1  ;;  %v2673_v43 = vmul.f32 %v2665_v61, %v2665_v61 }
 0xb76   :  { %v2633_v51 = vrot.slane %v2632_v4, 2  ;;  %v2640_v44 = vrot.slane %v2639_v50, 4  ;;  %v2626_v26 = vrot.slane %v2625_v56, 1  ;;  %v2666_v48 = vmax.f32 %v2618_v41, 0.0 }
 0xb77   :  { %v2647_v24 = vsel %vm2591_vm8, %v2588_v18, 0.0  ;;  %v2600_v25 = vadd.f32 %v2599_v46, %v2598_v20 }
 0xb78   :  { %v2634_v60 = vadd.f32 %v2633_v51, %v2632_v4  ;;  %v2648_v33 = vadd.f32 %v2647_v24, %v2646_v15  ;;  %v2574_v36 = vpop.permute.xlu1 %2573  ;;  %v2641_v19 = vadd.f32 %v2640_v44, %v2639_v50  ;;  %v2627_v37 = vadd.f32 %v2626_v26, %v2625_v56 }
 0xb79   :  { %v2590_v29 = vmul.f32 %v2574_v36, %v3711_v5  ;;  %v2664_v45 = vmax.f32 %v2600_v25, 0.0  ;;  %v2674_v38 = vmul.f32 %v2666_v48, %v2666_v48 }
 0xb7a   :  { %v2649_v10 = vrot.slane %v2648_v33, 4  ;;  %v2635_v17 = vrot.slane %v2634_v60, 1  ;;  %v2642_v23 = vrot.slane %v2641_v19, 2  ;;  %v2667_v57 = vmax.f32 %v2627_v37, 0.0 }
 0xb7b   :  { %v2656_v52 = vsel %vm2591_vm8, %v2590_v29, 0.0  ;;  %v2672_v35 = vmul.f32 %v2664_v45, %v2664_v45 }
 0xb7c   :  { %v2650_v21 = vadd.f32 %v2649_v10, %v2648_v33  ;;  %v2657_v0 = vadd.f32 %v2656_v52, %v2655_v32  ;;  %v2643_v47 = vadd.f32 %v2642_v23, %v2641_v19  ;;  %v2636_v39 = vadd.f32 %v2635_v17, %v2634_v60 }
 0xb7d   :  { %v2675_v28 = vmul.f32 %v2667_v57, %v2667_v57  ;;  %v2688_v59 = vsel %vm1364_vm9, %v2673_v43, %v2672_v35 }
 0xb7e   :  { %v2651_v12 = vrot.slane %v2650_v21, 2  ;;  %v2658_v30 = vrot.slane %v2657_v0, 4  ;;  %v2644_v5 = vrot.slane %v2643_v47, 1  ;;  %v2668_v1 = vmax.f32 %v2636_v39, 0.0 }
 0xb7f   :  { %v2689_v7 = vsel %vm1366_vm12, %v2674_v38, %v2688_v59 }
 0xb80   :  { %v2652_v63 = vadd.f32 %v2651_v12, %v2650_v21  ;;  %v2659_v49 = vadd.f32 %v2658_v30, %v2657_v0  ;;  %v2645_v40 = vadd.f32 %v2644_v5, %v2643_v47  ;;  %v2676_v6 = vmul.f32 %v2668_v1, %v2668_v1 }
 0xb81   :  { %v2690_v4 = vsel %vm1368_vm13, %v2675_v28, %v2689_v7 }
 0xb82   :  { %v2653_v14 = vrot.slane %v2652_v63, 1  ;;  %v2660_v22 = vrot.slane %v2659_v49, 2  ;;  %v2669_v16 = vmax.f32 %v2645_v40, 0.0  ;;  %v2691_v55 = vsel %vm1370_vm0, %v2676_v6, %v2690_v4 }
 0xb84   :  { %v2654_v27 = vadd.f32 %v2653_v14, %v2652_v63  ;;  %v2661_v11 = vadd.f32 %v2660_v22, %v2659_v49  ;;  %v2677_v58 = vmul.f32 %v2669_v16, %v2669_v16 }
 0xb86   :  { %v2670_v53 = vmax.f32 %v2654_v27, 0.0  ;;  %v2662_v54 = vrot.slane %v2661_v11, 1  ;;  %v2692_v13 = vsel %vm1372_vm2, %v2677_v58, %v2691_v55 }
 0xb88   :  { %v2663_v2 = vadd.f32 %v2662_v54, %v2661_v11  ;;  %v2678_v3 = vmul.f32 %v2670_v53, %v2670_v53 }
 0xb8a   :  { %v2671_v9 = vmax.f32 %v2663_v2, 0.0  ;;  %v2693_v50 = vsel %vm1374_vm5, %v2678_v3, %v2692_v13 }
 0xb8c   :  { %v2679_v31 = vmul.f32 %v2671_v9, %v2671_v9 }
 0xb8e   :  { %v2694_v18 = vsel %vm1376_vm6, %v2679_v31, %v2693_v50 }
 0xb8f   :  { %2695 = vrot.lane.b32.xlu0 %v2694_v18, %s3334_s9 }
 0xc01   :  { %v2696_v20 = vpop.permute.xlu0 %2695 }
 0xc02   :  { %v2698_v56 = vsel %vm233_vm1, %v2696_v20, 0.0 }
 0xc03   :  { %2699 = vadd.xlane.f32.xlu1 %v2698_v56 }
 0xc90   :  { %v2700_v51 = vpop.xlane.xlu1 %2699 }
 0xc91   :  { %v2701_v15 = vmax.f32 %v2700_v51, 1e-24 }
 0xc93   :  { %3204 = vrsqrt.f32 %v2701_v15 }
 0xc9d   :  { %v3205_v42 = vpop.eup %3204 }
 0xc9e   :  { %v2704_v44 = vrot.slane %v3205_v42, 1  ;;  %v2705_v24 = vrot.slane %v3205_v42, 2  ;;  %v2706_v62 = vrot.slane %v3205_v42, 3  ;;  %v2707_v60 = vrot.slane %v3205_v42, 4 }
 0xc9f   :  { %v2708_v33 = vrot.slane %v3205_v42, 5  ;;  %v2709_v36 = vrot.slane %v3205_v42, 6  ;;  %v2710_v34 = vrot.slane %v3205_v42, 7  ;;  %v2719_v10 = vmul.f32 %v3205_v42, %v2664_v45 }
 0xca0   :  { %v2720_v19 = vmul.f32 %v2704_v44, %v2665_v61  ;;  %v2721_v29 = vmul.f32 %v2705_v24, %v2666_v48  ;;  %v2722_v46 = vmul.f32 %v2706_v62, %v2667_v57  ;;  %v2723_v26 = vmul.f32 %v2707_v60, %v2668_v1 }
 0xca1   :  { %v2724_v17 = vmul.f32 %v2708_v33, %v2669_v16  ;;  %v2725_v52 = vmul.f32 %v2709_v36, %v2670_v53  ;;  %v2726_v8 = vmul.f32 %v2710_v34, %v2671_v9 }
 0xca2   :  { %v2735_v32 = vrot.slane %v2720_v19, 7  ;;  %v2737_v23 = vrot.slane %v2721_v29, 6  ;;  %v2739_v0 = vrot.slane %v2722_v46, 5  ;;  %v2741_v47 = vrot.slane %v2723_v26, 4 }
 0xca3   :  { %v2743_v37 = vrot.slane %v2724_v17, 3  ;;  %v2745_v30 = vrot.slane %v2725_v52, 2  ;;  %v2747_v5 = vrot.slane %v2726_v8, 1 }
 0xca4   :  { %v2736_v21 = vsel %vm1364_vm9, %v2735_v32, %v2719_v10 }
 0xca5   :  { %v2738_v41 = vsel %vm1366_vm12, %v2737_v23, %v2736_v21 }
 0xca6   :  { %v2740_v25 = vsel %vm1368_vm13, %v2739_v0, %v2738_v41 }
 0xca7   :  { %v2742_v12 = vsel %vm1370_vm0, %v2741_v47, %v2740_v25 }
 0xca8   :  { %v2744_v39 = vsel %vm1372_vm2, %v2743_v37, %v2742_v12 }
 0xca9   :  { %v2746_v61 = vsel %vm1374_vm5, %v2745_v30, %v2744_v39 }
 0xcaa   :  { %v2748_v63 = vsel %vm1376_vm6, %v2747_v5, %v2746_v61 }
 0xcab   :  { %2749 = vrot.lane.b32.xlu0 %v2748_v63, %s3334_s9 }
 0xd1d   :  { %v2750_v49 = vpop.permute.xlu0 %2749 }
 0xd1e   :  { %2752 = vst.msk [vmem:[#allocation10] sm:$0xff] %vm233_vm1, %v2750_v49 }
 0xd1f   :  { %3305 = shalt.err (!%p3302_p8)
}
 0xd20   :  { %s3306_s28 = scalar_lea.hbm %s4258_s6, 128 }
 0xd21   :  { %p3307_p9 = scmp.ne.s32.totalorder %s4258_s6, %s3306_s28  ;;  %p3310_p10 = scmp.lt.u32.totalorder %s3306_s28, %s4258_s6 }
 0xd23   :  { %p3312_p11 = pnand %p3310_p10, %p3307_p9 }
 0xd25   :  { %3315 = shalt.err (!%p3312_p11)
}
 0xd26   :  { %2762 = dma.vmem_to_hbm [thread:$0]  %s2760_s23, 128, %s4258_s6, [#allocation4]  }
 0xd27   :  { %3322 = dma.done.wait [#allocation4], 128  }
 0xd28   :  { %3323 = vsyncadd [#allocation4], 4294967168 }
 0xd29   :  { %2766 = vsyncpa [#allocation3], 1 }
 0xd2a   :  { %2767 = vsyncpa [#allocation6], 1 }
 0xd2b   :  { %2768 = vsyncpa [#allocation9], 1 }
 0xd2c   :  { %2769 = vsyncpa [#allocation4], 1 }

</bundles_post_ra>
